<compile_context>
chip_gen: v5e
topology: v5e:2x2
jax: 0.10.0
libtpu: 0.0.40
codegen_flags: <defaults>
</compile_context>

<pallas_src>
import numpy as np
import jax
import jax.numpy as jnp
from jax.experimental import pallas as pl
from jax.experimental.pallas import tpu as pltpu

# ---- problem dimensions (fixed by the PyTorch module) ----
C_OUT = 16
K = 5
H_IN = W_IN = 28                  # implied by fc1 = 16 * 12 * 12
H_CONV = W_CONV = H_IN - K + 1    # 24
H_POOL = W_POOL = H_CONV // 2     # 12
FEAT = C_OUT * H_POOL * W_POOL    # 2304
HID = 128
N_CLS = 10

# ---- kernel-side layout constants ----
IMG_FLAT = H_IN * W_IN            # 784 : flat image per batch row
KDIM = 6 * W_IN                   # 168 : 6 consecutive image rows (t = dy + py)
PHASE_W = 256                     # pooled feats per pool phase (12*16=192, padded to 2 lane tiles)
CONV_LANES = 4 * PHASE_W          # 1024: the four 2x2-pool phases side by side
OUT_PAD = 128                     # logits padded to one full lane tile


# --------------------------- fused Pallas kernel -----------------------------

def _net_fwd_kernel(x_ref, wconv_ref, bconv_ref, w1_ref, b1_ref, w2_ref, b2_ref,
                    o_ref):
    # x_ref    : (TB, 784)      f32   flat 28x28 images
    # wconv_ref: (168, 1024)    bf16  Toeplitz-expanded conv weights
    # bconv_ref: (1, 256)       f32   conv bias tiled over j (lanes >=192 are 0)
    # w1_ref   : (12, 256, 128) bf16  fc1 weights regrouped per pooled row i
    # b1_ref   : (1, 128)       f32
    # w2_ref   : (128, 128)     bf16  fc2 weights padded 10 -> 128 columns
    # b2_ref   : (1, 128)       f32
    # o_ref    : (TB, 128)      f32   padded logits
    tb = x_ref.shape[0]
    wconv = wconv_ref[...]
    # Hoist the bias broadcast out of the unrolled loop (no CSE of
    # broadcast_in_dim inside the 12x-unrolled body otherwise).
    bconv = jnp.broadcast_to(bconv_ref[...], (tb, PHASE_W))

    h = None
    for i in range(H_POOL):  # 12 pooled output rows, fully unrolled
        # A_i[b, t*28 + u] = img[b, 2i + t, u]  (t = 0..5): contiguous lane slice.
        a_i = x_ref[:, 2 * W_IN * i: 2 * W_IN * i + KDIM]            # (TB, 168)
        conv_i = jnp.dot(a_i.astype(jnp.bfloat16), wconv,
                         preferred_element_type=jnp.float32)         # (TB, 1024)
        # 2x2 max-pool: the four phases are contiguous, 128-aligned lane chunks.
        pooled = jnp.maximum(
            jnp.maximum(conv_i[:, 0:PHASE_W], conv_i[:, PHASE_W:2 * PHASE_W]),
            jnp.maximum(conv_i[:, 2 * PHASE_W:3 * PHASE_W],
                        conv_i[:, 3 * PHASE_W:4 * PHASE_W]))          # (TB, 256)
        pooled = jnp.maximum(pooled + bconv, 0.0)                     # bias + ReLU (f32)
        # fc1 contribution of pooled row i (accumulated in f32).
        part = jnp.dot(pooled.astype(jnp.bfloat16), w1_ref[i],
                       preferred_element_type=jnp.float32)            # (TB, 128)
        h = part if h is None else h + part
    h = jnp.maximum(h + b1_ref[...], 0.0)                             # fc1 bias + ReLU
    o_ref[...] = jnp.dot(h.astype(jnp.bfloat16), w2_ref[...],
                         preferred_element_type=jnp.float32) + b2_ref[...]


# --------------------------- parameter preparation ---------------------------

def prepare_params(params):
    """One-time (host-side) re-layout of PyTorch-shaped parameters."""
    conv_w = np.asarray(params["conv_w"], np.float32).reshape(C_OUT, K, K)
    conv_b = np.asarray(params["conv_b"], np.float32)
    fc1_w = np.asarray(params["fc1_w"], np.float32)     # (128, 2304)
    fc1_b = np.asarray(params["fc1_b"], np.float32)
    fc2_w = np.asarray(params["fc2_w"], np.float32)     # (10, 128)
    fc2_b = np.asarray(params["fc2_b"], np.float32)

    # Toeplitz-expanded conv matrix: row k = t*28 + u addresses image row 2i+t,
    # column u; output lane f = (2*py+px)*256 + j*16 + c is conv output
    # (channel c, y = 2i+py, x = 2j+px).
    wconv = np.zeros((KDIM, CONV_LANES), np.float32)
    for py in range(2):
        for px in range(2):
            base = (2 * py + px) * PHASE_W
            for j in range(W_POOL):
                for c in range(C_OUT):
                    f = base + j * C_OUT + c
                    for dy in range(K):
                        t = dy + py
                        u0 = 2 * j + px
                        wconv[t * W_IN + u0: t * W_IN + u0 + K, f] = conv_w[c, dy, :]

    bconv = np.zeros((1, PHASE_W), np.float32)
    bconv[0, :W_POOL * C_OUT] = np.tile(conv_b, W_POOL)       # lane j*16 + c -> bias[c]

    # fc1 weights regrouped to pooled-feature order (i, j, c), lanes padded to 256.
    # torch flatten index = c*144 + i*12 + j.
    w1r = fc1_w.reshape(HID, C_OUT, H_POOL, W_POOL).transpose(2, 3, 1, 0)  # (i,j,c,o)
    w1p = np.zeros((H_POOL, PHASE_W, HID), np.float32)
    w1p[:, :W_POOL * C_OUT, :] = w1r.reshape(H_POOL, W_POOL * C_OUT, HID)

    # fc2 padded to a full 128-lane output tile.
    w2p = np.zeros((HID, OUT_PAD), np.float32)
    w2p[:, :N_CLS] = fc2_w.T
    b2p = np.zeros((1, OUT_PAD), np.float32)
    b2p[0, :N_CLS] = fc2_b

    return {
        "wconv": jnp.asarray(wconv, jnp.bfloat16),
        "bconv": jnp.asarray(bconv),
        "w1": jnp.asarray(w1p, jnp.bfloat16),
        "b1": jnp.asarray(fc1_b.reshape(1, HID)),
        "w2": jnp.asarray(w2p, jnp.bfloat16),
        "b2": jnp.asarray(b2p),
    }


# --------------------------- wrapper ------------------------------------------

def _batch_tile(n):
    # VMEM-safe on v5e/v6e/v7x (a few MiB per step incl. double buffering and
    # in-kernel intermediates); small batches are rounded up to one 8-aligned tile.
    if n >= 256:
        return 256
    return max(8, ((n + 7) // 8) * 8)


def _cost_estimate(n_pad):
    # Per-example MXU flops: 12 conv matmuls + 12 fc1 matmuls + fc2.
    flops_per_ex = (12 * 2 * KDIM * CONV_LANES
                    + 12 * 2 * PHASE_W * HID
                    + 2 * HID * OUT_PAD)
    weight_bytes = (KDIM * CONV_LANES * 2 + H_POOL * PHASE_W * HID * 2
                    + HID * OUT_PAD * 2 + (PHASE_W + HID + OUT_PAD) * 4)
    bytes_accessed = n_pad * (IMG_FLAT * 4 + OUT_PAD * 4) + weight_bytes
    return pl.CostEstimate(flops=n_pad * flops_per_ex,
                           transcendentals=0,
                           bytes_accessed=bytes_accessed)


def net_forward(x, prep):
    """x: (N, 1, 28, 28) float32 (NCHW, like PyTorch). Returns (N, 10) logits."""
    n = x.shape[0]
    tb = _batch_tile(n)
    n_pad = ((n + tb - 1) // tb) * tb

    xr = x.astype(jnp.float32).reshape(n, IMG_FLAT)     # pure metadata reshape
    if n_pad != n:
        xr = jnp.pad(xr, ((0, n_pad - n), (0, 0)))

    out = pl.pallas_call(
        _net_fwd_kernel,
        out_shape=jax.ShapeDtypeStruct((n_pad, OUT_PAD), jnp.float32),
        grid=(n_pad // tb,),
        in_specs=[
            pl.BlockSpec((tb, IMG_FLAT), lambda i: (i, 0)),
            pl.BlockSpec((KDIM, CONV_LANES), lambda i: (0, 0)),
            pl.BlockSpec((1, PHASE_W), lambda i: (0, 0)),
            pl.BlockSpec((H_POOL, PHASE_W, HID), lambda i: (0, 0, 0)),
            pl.BlockSpec((1, HID), lambda i: (0, 0)),
            pl.BlockSpec((HID, OUT_PAD), lambda i: (0, 0)),
            pl.BlockSpec((1, OUT_PAD), lambda i: (0, 0)),
        ],
        out_specs=pl.BlockSpec((tb, OUT_PAD), lambda i: (i, 0)),
        compiler_params=pltpu.CompilerParams(
            dimension_semantics=("parallel",)),
        cost_estimate=_cost_estimate(n_pad),
    )(xr, prep["wconv"], prep["bconv"], prep["w1"], prep["b1"],
      prep["w2"], prep["b2"])

    return out[:n, :N_CLS]


# --------------------------- params & reference ------------------------------

def init_params(key):
    ks = jax.random.split(key, 6)
    return {
        # PyTorch shapes: conv.weight [16,1,5,5], conv.bias [16],
        # fc1.weight [128, 2304], fc1.bias [128], fc2.weight [10, 128], fc2.bias [10]
        "conv_w": 0.1 * jax.random.normal(ks[0], (C_OUT, 1, K, K), jnp.float32),
        "conv_b": 0.1 * jax.random.normal(ks[1], (C_OUT,), jnp.float32),
        "fc1_w": 0.02 * jax.random.normal(ks[2], (HID, FEAT), jnp.float32),
        "fc1_b": 0.02 * jax.random.normal(ks[3], (HID,), jnp.float32),
        "fc2_w": 0.1 * jax.random.normal(ks[4], (N_CLS, HID), jnp.float32),
        "fc2_b": 0.1 * jax.random.normal(ks[5], (N_CLS,), jnp.float32),
    }


def reference_forward_np(x, params):
    """Pure-numpy (float64) replica of the PyTorch forward for verification."""
    x = np.asarray(x, np.float64)
    w = np.asarray(params["conv_w"], np.float64)
    b = np.asarray(params["conv_b"], np.float64)
    w1 = np.asarray(params["fc1_w"], np.float64)
    b1 = np.asarray(params["fc1_b"], np.float64)
    w2 = np.asarray(params["fc2_w"], np.float64)
    b2 = np.asarray(params["fc2_b"], np.float64)

    n = x.shape[0]
    xi = x[:, 0]                                        # (N, 28, 28)
    conv = np.zeros((n, C_OUT, H_CONV, W_CONV), np.float64)
    for dy in range(K):
        for dx in range(K):
            conv += xi[:, None, dy:dy + H_CONV, dx:dx + W_CONV] * \
                    w[None, :, 0, dy, dx][:, :, None, None]
    conv += b[None, :, None, None]
    conv = np.maximum(conv, 0.0)
    pooled = conv.reshape(n, C_OUT, H_POOL, 2, W_POOL, 2).max(axis=(3, 5))
    feat = pooled.reshape(n, FEAT)
    h = np.maximum(feat @ w1.T + b1, 0.0)
    return h @ w2.T + b2


# --------------------------- main --------------------------------------------

if __name__ == "__main__":
    key = jax.random.PRNGKey(0)
    pkey, xkey = jax.random.split(key)
    params = init_params(pkey)
    prep = prepare_params(params)

    # batch=2; spatial 28x28 is implied by fc1 = 16 * 12 * 12
    x = jax.random.normal(xkey, (2, 1, H_IN, W_IN), jnp.float32)

    fwd = jax.jit(net_forward)
    out = jax.block_until_ready(fwd(x, prep))

    ref = reference_forward_np(np.asarray(x),
                               {k: np.asarray(v) for k, v in params.items()})
    assert out.shape == (2, N_CLS)
    if not np.allclose(np.asarray(out), ref, rtol=5e-2, atol=5e-2):
        raise AssertionError("Pallas output does not match reference:\n"
                             f"got:\n{np.asarray(out)}\nref:\n{ref}")

    print("KERNEL_OK")
</pallas_src>

<mosaic_0001>
module attributes {stable_mosaic.version = 11 : i64} {
  func.func @_net_fwd_kernel(%arg0: i32, %arg1: memref<8x784xf32, #tpu.memory_space<vmem>>, %arg2: memref<168x1024xbf16, #tpu.memory_space<vmem>>, %arg3: memref<1x256xf32, #tpu.memory_space<vmem>>, %arg4: memref<12x256x128xbf16, #tpu.memory_space<vmem>>, %arg5: memref<1x128xf32, #tpu.memory_space<vmem>>, %arg6: memref<128x128xbf16, #tpu.memory_space<vmem>>, %arg7: memref<1x128xf32, #tpu.memory_space<vmem>>, %arg8: memref<8x128xf32, #tpu.memory_space<vmem>>) attributes {dimension_semantics = [#tpu.dimension_semantics<parallel>], iteration_bounds = array<i64: 1>, scalar_prefetch = 0 : i64, scratch_operands = 0 : i64, tpu.core_type = #tpu.core_type<tc>, window_params = [{transform_indices = @transform_0, window_bounds = array<i64: 8, 784>}, {pipeline_mode = #tpu.pipeline_mode<synchronous>, transform_indices = @transform_1, window_bounds = array<i64: 168, 1024>}, {pipeline_mode = #tpu.pipeline_mode<synchronous>, transform_indices = @transform_2, window_bounds = array<i64: 1, 256>}, {pipeline_mode = #tpu.pipeline_mode<synchronous>, transform_indices = @transform_3, window_bounds = array<i64: 12, 256, 128>}, {pipeline_mode = #tpu.pipeline_mode<synchronous>, transform_indices = @transform_4, window_bounds = array<i64: 1, 128>}, {pipeline_mode = #tpu.pipeline_mode<synchronous>, transform_indices = @transform_5, window_bounds = array<i64: 128, 128>}, {pipeline_mode = #tpu.pipeline_mode<synchronous>, transform_indices = @transform_6, window_bounds = array<i64: 1, 128>}, {transform_indices = @transform_7, window_bounds = array<i64: 8, 128>}]} {
    %c0 = arith.constant 0 : index
    %c0_0 = arith.constant 0 : index
    %0 = vector.load %arg2[%c0, %c0_0] : memref<168x1024xbf16, #tpu.memory_space<vmem>>, vector<168x1024xbf16>
    %c0_1 = arith.constant 0 : index
    %c0_2 = arith.constant 0 : index
    %1 = vector.load %arg3[%c0_1, %c0_2] : memref<1x256xf32, #tpu.memory_space<vmem>>, vector<1x256xf32>
    %2 = vector.shape_cast %1 : vector<1x256xf32> to vector<1x256xf32>
    %3 = vector.broadcast %2 : vector<1x256xf32> to vector<8x256xf32>
    %c0_3 = arith.constant 0 : index
    %c0_4 = arith.constant 0 : index
    %4 = vector.load %arg1[%c0_3, %c0_4] : memref<8x784xf32, #tpu.memory_space<vmem>>, vector<8x168xf32>
    %5 = arith.truncf %4 : vector<8x168xf32> to vector<8x168xbf16>
    %cst = arith.constant dense<0.000000e+00> : vector<8x1024xf32>
    %6 = tpu.matmul %5, %0, %cst {dimension_numbers = #tpu.dot_dimension_numbers<[1], [0], [0], [1], [0, 0, 1, 1], [], []>} : vector<8x168xbf16>, vector<168x1024xbf16>, vector<8x1024xf32> -> vector<8x1024xf32>
    %7 = vector.extract_strided_slice %6 {offsets = [0, 0], sizes = [8, 256], strides = [1, 1]} : vector<8x1024xf32> to vector<8x256xf32>
    %8 = vector.extract_strided_slice %6 {offsets = [0, 256], sizes = [8, 256], strides = [1, 1]} : vector<8x1024xf32> to vector<8x256xf32>
    %9 = arith.maximumf %7, %8 : vector<8x256xf32>
    %10 = vector.extract_strided_slice %6 {offsets = [0, 512], sizes = [8, 256], strides = [1, 1]} : vector<8x1024xf32> to vector<8x256xf32>
    %11 = vector.extract_strided_slice %6 {offsets = [0, 768], sizes = [8, 256], strides = [1, 1]} : vector<8x1024xf32> to vector<8x256xf32>
    %12 = arith.maximumf %10, %11 : vector<8x256xf32>
    %13 = arith.maximumf %9, %12 : vector<8x256xf32>
    %14 = arith.addf %13, %3 : vector<8x256xf32>
    %cst_5 = arith.constant 0.000000e+00 : f32
    %15 = vector.broadcast %cst_5 : f32 to vector<8x256xf32>
    %16 = arith.maximumf %14, %15 : vector<8x256xf32>
    %17 = arith.truncf %16 : vector<8x256xf32> to vector<8x256xbf16>
    %c0_6 = arith.constant 0 : index
    %c0_7 = arith.constant 0 : index
    %c0_8 = arith.constant 0 : index
    %18 = vector.load %arg4[%c0_6, %c0_7, %c0_8] : memref<12x256x128xbf16, #tpu.memory_space<vmem>>, vector<1x256x128xbf16>
    %19 = vector.shape_cast %18 : vector<1x256x128xbf16> to vector<256x128xbf16>
    %cst_9 = arith.constant dense<0.000000e+00> : vector<8x128xf32>
    %20 = tpu.matmul %17, %19, %cst_9 {dimension_numbers = #tpu.dot_dimension_numbers<[1], [0], [0], [1], [0, 0, 1, 1], [], []>} : vector<8x256xbf16>, vector<256x128xbf16>, vector<8x128xf32> -> vector<8x128xf32>
    %c0_10 = arith.constant 0 : index
    %c56 = arith.constant 56 : index
    %21 = vector.load %arg1[%c0_10, %c56] : memref<8x784xf32, #tpu.memory_space<vmem>>, vector<8x168xf32>
    %22 = arith.truncf %21 : vector<8x168xf32> to vector<8x168xbf16>
    %cst_11 = arith.constant dense<0.000000e+00> : vector<8x1024xf32>
    %23 = tpu.matmul %22, %0, %cst_11 {dimension_numbers = #tpu.dot_dimension_numbers<[1], [0], [0], [1], [0, 0, 1, 1], [], []>} : vector<8x168xbf16>, vector<168x1024xbf16>, vector<8x1024xf32> -> vector<8x1024xf32>
    %24 = vector.extract_strided_slice %23 {offsets = [0, 0], sizes = [8, 256], strides = [1, 1]} : vector<8x1024xf32> to vector<8x256xf32>
    %25 = vector.extract_strided_slice %23 {offsets = [0, 256], sizes = [8, 256], strides = [1, 1]} : vector<8x1024xf32> to vector<8x256xf32>
    %26 = arith.maximumf %24, %25 : vector<8x256xf32>
    %27 = vector.extract_strided_slice %23 {offsets = [0, 512], sizes = [8, 256], strides = [1, 1]} : vector<8x1024xf32> to vector<8x256xf32>
    %28 = vector.extract_strided_slice %23 {offsets = [0, 768], sizes = [8, 256], strides = [1, 1]} : vector<8x1024xf32> to vector<8x256xf32>
    %29 = arith.maximumf %27, %28 : vector<8x256xf32>
    %30 = arith.maximumf %26, %29 : vector<8x256xf32>
    %31 = arith.addf %30, %3 : vector<8x256xf32>
    %cst_12 = arith.constant 0.000000e+00 : f32
    %32 = vector.broadcast %cst_12 : f32 to vector<8x256xf32>
    %33 = arith.maximumf %31, %32 : vector<8x256xf32>
    %34 = arith.truncf %33 : vector<8x256xf32> to vector<8x256xbf16>
    %c1 = arith.constant 1 : index
    %c0_13 = arith.constant 0 : index
    %c0_14 = arith.constant 0 : index
    %35 = vector.load %arg4[%c1, %c0_13, %c0_14] : memref<12x256x128xbf16, #tpu.memory_space<vmem>>, vector<1x256x128xbf16>
    %36 = vector.shape_cast %35 : vector<1x256x128xbf16> to vector<256x128xbf16>
    %cst_15 = arith.constant dense<0.000000e+00> : vector<8x128xf32>
    %37 = tpu.matmul %34, %36, %cst_15 {dimension_numbers = #tpu.dot_dimension_numbers<[1], [0], [0], [1], [0, 0, 1, 1], [], []>} : vector<8x256xbf16>, vector<256x128xbf16>, vector<8x128xf32> -> vector<8x128xf32>
    %38 = arith.addf %20, %37 : vector<8x128xf32>
    %c0_16 = arith.constant 0 : index
    %c112 = arith.constant 112 : index
    %39 = vector.load %arg1[%c0_16, %c112] : memref<8x784xf32, #tpu.memory_space<vmem>>, vector<8x168xf32>
    %40 = arith.truncf %39 : vector<8x168xf32> to vector<8x168xbf16>
    %cst_17 = arith.constant dense<0.000000e+00> : vector<8x1024xf32>
    %41 = tpu.matmul %40, %0, %cst_17 {dimension_numbers = #tpu.dot_dimension_numbers<[1], [0], [0], [1], [0, 0, 1, 1], [], []>} : vector<8x168xbf16>, vector<168x1024xbf16>, vector<8x1024xf32> -> vector<8x1024xf32>
    %42 = vector.extract_strided_slice %41 {offsets = [0, 0], sizes = [8, 256], strides = [1, 1]} : vector<8x1024xf32> to vector<8x256xf32>
    %43 = vector.extract_strided_slice %41 {offsets = [0, 256], sizes = [8, 256], strides = [1, 1]} : vector<8x1024xf32> to vector<8x256xf32>
    %44 = arith.maximumf %42, %43 : vector<8x256xf32>
    %45 = vector.extract_strided_slice %41 {offsets = [0, 512], sizes = [8, 256], strides = [1, 1]} : vector<8x1024xf32> to vector<8x256xf32>
    %46 = vector.extract_strided_slice %41 {offsets = [0, 768], sizes = [8, 256], strides = [1, 1]} : vector<8x1024xf32> to vector<8x256xf32>
    %47 = arith.maximumf %45, %46 : vector<8x256xf32>
    %48 = arith.maximumf %44, %47 : vector<8x256xf32>
    %49 = arith.addf %48, %3 : vector<8x256xf32>
    %cst_18 = arith.constant 0.000000e+00 : f32
    %50 = vector.broadcast %cst_18 : f32 to vector<8x256xf32>
    %51 = arith.maximumf %49, %50 : vector<8x256xf32>
    %52 = arith.truncf %51 : vector<8x256xf32> to vector<8x256xbf16>
    %c2 = arith.constant 2 : index
    %c0_19 = arith.constant 0 : index
    %c0_20 = arith.constant 0 : index
    %53 = vector.load %arg4[%c2, %c0_19, %c0_20] : memref<12x256x128xbf16, #tpu.memory_space<vmem>>, vector<1x256x128xbf16>
    %54 = vector.shape_cast %53 : vector<1x256x128xbf16> to vector<256x128xbf16>
    %cst_21 = arith.constant dense<0.000000e+00> : vector<8x128xf32>
    %55 = tpu.matmul %52, %54, %cst_21 {dimension_numbers = #tpu.dot_dimension_numbers<[1], [0], [0], [1], [0, 0, 1, 1], [], []>} : vector<8x256xbf16>, vector<256x128xbf16>, vector<8x128xf32> -> vector<8x128xf32>
    %56 = arith.addf %38, %55 : vector<8x128xf32>
    %c0_22 = arith.constant 0 : index
    %c168 = arith.constant 168 : index
    %57 = vector.load %arg1[%c0_22, %c168] : memref<8x784xf32, #tpu.memory_space<vmem>>, vector<8x168xf32>
    %58 = arith.truncf %57 : vector<8x168xf32> to vector<8x168xbf16>
    %cst_23 = arith.constant dense<0.000000e+00> : vector<8x1024xf32>
    %59 = tpu.matmul %58, %0, %cst_23 {dimension_numbers = #tpu.dot_dimension_numbers<[1], [0], [0], [1], [0, 0, 1, 1], [], []>} : vector<8x168xbf16>, vector<168x1024xbf16>, vector<8x1024xf32> -> vector<8x1024xf32>
    %60 = vector.extract_strided_slice %59 {offsets = [0, 0], sizes = [8, 256], strides = [1, 1]} : vector<8x1024xf32> to vector<8x256xf32>
    %61 = vector.extract_strided_slice %59 {offsets = [0, 256], sizes = [8, 256], strides = [1, 1]} : vector<8x1024xf32> to vector<8x256xf32>
    %62 = arith.maximumf %60, %61 : vector<8x256xf32>
    %63 = vector.extract_strided_slice %59 {offsets = [0, 512], sizes = [8, 256], strides = [1, 1]} : vector<8x1024xf32> to vector<8x256xf32>
    %64 = vector.extract_strided_slice %59 {offsets = [0, 768], sizes = [8, 256], strides = [1, 1]} : vector<8x1024xf32> to vector<8x256xf32>
    %65 = arith.maximumf %63, %64 : vector<8x256xf32>
    %66 = arith.maximumf %62, %65 : vector<8x256xf32>
    %67 = arith.addf %66, %3 : vector<8x256xf32>
    %cst_24 = arith.constant 0.000000e+00 : f32
    %68 = vector.broadcast %cst_24 : f32 to vector<8x256xf32>
    %69 = arith.maximumf %67, %68 : vector<8x256xf32>
    %70 = arith.truncf %69 : vector<8x256xf32> to vector<8x256xbf16>
    %c3 = arith.constant 3 : index
    %c0_25 = arith.constant 0 : index
    %c0_26 = arith.constant 0 : index
    %71 = vector.load %arg4[%c3, %c0_25, %c0_26] : memref<12x256x128xbf16, #tpu.memory_space<vmem>>, vector<1x256x128xbf16>
    %72 = vector.shape_cast %71 : vector<1x256x128xbf16> to vector<256x128xbf16>
    %cst_27 = arith.constant dense<0.000000e+00> : vector<8x128xf32>
    %73 = tpu.matmul %70, %72, %cst_27 {dimension_numbers = #tpu.dot_dimension_numbers<[1], [0], [0], [1], [0, 0, 1, 1], [], []>} : vector<8x256xbf16>, vector<256x128xbf16>, vector<8x128xf32> -> vector<8x128xf32>
    %74 = arith.addf %56, %73 : vector<8x128xf32>
    %c0_28 = arith.constant 0 : index
    %c224 = arith.constant 224 : index
    %75 = vector.load %arg1[%c0_28, %c224] : memref<8x784xf32, #tpu.memory_space<vmem>>, vector<8x168xf32>
    %76 = arith.truncf %75 : vector<8x168xf32> to vector<8x168xbf16>
    %cst_29 = arith.constant dense<0.000000e+00> : vector<8x1024xf32>
    %77 = tpu.matmul %76, %0, %cst_29 {dimension_numbers = #tpu.dot_dimension_numbers<[1], [0], [0], [1], [0, 0, 1, 1], [], []>} : vector<8x168xbf16>, vector<168x1024xbf16>, vector<8x1024xf32> -> vector<8x1024xf32>
    %78 = vector.extract_strided_slice %77 {offsets = [0, 0], sizes = [8, 256], strides = [1, 1]} : vector<8x1024xf32> to vector<8x256xf32>
    %79 = vector.extract_strided_slice %77 {offsets = [0, 256], sizes = [8, 256], strides = [1, 1]} : vector<8x1024xf32> to vector<8x256xf32>
    %80 = arith.maximumf %78, %79 : vector<8x256xf32>
    %81 = vector.extract_strided_slice %77 {offsets = [0, 512], sizes = [8, 256], strides = [1, 1]} : vector<8x1024xf32> to vector<8x256xf32>
    %82 = vector.extract_strided_slice %77 {offsets = [0, 768], sizes = [8, 256], strides = [1, 1]} : vector<8x1024xf32> to vector<8x256xf32>
    %83 = arith.maximumf %81, %82 : vector<8x256xf32>
    %84 = arith.maximumf %80, %83 : vector<8x256xf32>
    %85 = arith.addf %84, %3 : vector<8x256xf32>
    %cst_30 = arith.constant 0.000000e+00 : f32
    %86 = vector.broadcast %cst_30 : f32 to vector<8x256xf32>
    %87 = arith.maximumf %85, %86 : vector<8x256xf32>
    %88 = arith.truncf %87 : vector<8x256xf32> to vector<8x256xbf16>
    %c4 = arith.constant 4 : index
    %c0_31 = arith.constant 0 : index
    %c0_32 = arith.constant 0 : index
    %89 = vector.load %arg4[%c4, %c0_31, %c0_32] : memref<12x256x128xbf16, #tpu.memory_space<vmem>>, vector<1x256x128xbf16>
    %90 = vector.shape_cast %89 : vector<1x256x128xbf16> to vector<256x128xbf16>
    %cst_33 = arith.constant dense<0.000000e+00> : vector<8x128xf32>
    %91 = tpu.matmul %88, %90, %cst_33 {dimension_numbers = #tpu.dot_dimension_numbers<[1], [0], [0], [1], [0, 0, 1, 1], [], []>} : vector<8x256xbf16>, vector<256x128xbf16>, vector<8x128xf32> -> vector<8x128xf32>
    %92 = arith.addf %74, %91 : vector<8x128xf32>
    %c0_34 = arith.constant 0 : index
    %c280 = arith.constant 280 : index
    %93 = vector.load %arg1[%c0_34, %c280] : memref<8x784xf32, #tpu.memory_space<vmem>>, vector<8x168xf32>
    %94 = arith.truncf %93 : vector<8x168xf32> to vector<8x168xbf16>
    %cst_35 = arith.constant dense<0.000000e+00> : vector<8x1024xf32>
    %95 = tpu.matmul %94, %0, %cst_35 {dimension_numbers = #tpu.dot_dimension_numbers<[1], [0], [0], [1], [0, 0, 1, 1], [], []>} : vector<8x168xbf16>, vector<168x1024xbf16>, vector<8x1024xf32> -> vector<8x1024xf32>
    %96 = vector.extract_strided_slice %95 {offsets = [0, 0], sizes = [8, 256], strides = [1, 1]} : vector<8x1024xf32> to vector<8x256xf32>
    %97 = vector.extract_strided_slice %95 {offsets = [0, 256], sizes = [8, 256], strides = [1, 1]} : vector<8x1024xf32> to vector<8x256xf32>
    %98 = arith.maximumf %96, %97 : vector<8x256xf32>
    %99 = vector.extract_strided_slice %95 {offsets = [0, 512], sizes = [8, 256], strides = [1, 1]} : vector<8x1024xf32> to vector<8x256xf32>
    %100 = vector.extract_strided_slice %95 {offsets = [0, 768], sizes = [8, 256], strides = [1, 1]} : vector<8x1024xf32> to vector<8x256xf32>
    %101 = arith.maximumf %99, %100 : vector<8x256xf32>
    %102 = arith.maximumf %98, %101 : vector<8x256xf32>
    %103 = arith.addf %102, %3 : vector<8x256xf32>
    %cst_36 = arith.constant 0.000000e+00 : f32
    %104 = vector.broadcast %cst_36 : f32 to vector<8x256xf32>
    %105 = arith.maximumf %103, %104 : vector<8x256xf32>
    %106 = arith.truncf %105 : vector<8x256xf32> to vector<8x256xbf16>
    %c5 = arith.constant 5 : index
    %c0_37 = arith.constant 0 : index
    %c0_38 = arith.constant 0 : index
    %107 = vector.load %arg4[%c5, %c0_37, %c0_38] : memref<12x256x128xbf16, #tpu.memory_space<vmem>>, vector<1x256x128xbf16>
    %108 = vector.shape_cast %107 : vector<1x256x128xbf16> to vector<256x128xbf16>
    %cst_39 = arith.constant dense<0.000000e+00> : vector<8x128xf32>
    %109 = tpu.matmul %106, %108, %cst_39 {dimension_numbers = #tpu.dot_dimension_numbers<[1], [0], [0], [1], [0, 0, 1, 1], [], []>} : vector<8x256xbf16>, vector<256x128xbf16>, vector<8x128xf32> -> vector<8x128xf32>
    %110 = arith.addf %92, %109 : vector<8x128xf32>
    %c0_40 = arith.constant 0 : index
    %c336 = arith.constant 336 : index
    %111 = vector.load %arg1[%c0_40, %c336] : memref<8x784xf32, #tpu.memory_space<vmem>>, vector<8x168xf32>
    %112 = arith.truncf %111 : vector<8x168xf32> to vector<8x168xbf16>
    %cst_41 = arith.constant dense<0.000000e+00> : vector<8x1024xf32>
    %113 = tpu.matmul %112, %0, %cst_41 {dimension_numbers = #tpu.dot_dimension_numbers<[1], [0], [0], [1], [0, 0, 1, 1], [], []>} : vector<8x168xbf16>, vector<168x1024xbf16>, vector<8x1024xf32> -> vector<8x1024xf32>
    %114 = vector.extract_strided_slice %113 {offsets = [0, 0], sizes = [8, 256], strides = [1, 1]} : vector<8x1024xf32> to vector<8x256xf32>
    %115 = vector.extract_strided_slice %113 {offsets = [0, 256], sizes = [8, 256], strides = [1, 1]} : vector<8x1024xf32> to vector<8x256xf32>
    %116 = arith.maximumf %114, %115 : vector<8x256xf32>
    %117 = vector.extract_strided_slice %113 {offsets = [0, 512], sizes = [8, 256], strides = [1, 1]} : vector<8x1024xf32> to vector<8x256xf32>
    %118 = vector.extract_strided_slice %113 {offsets = [0, 768], sizes = [8, 256], strides = [1, 1]} : vector<8x1024xf32> to vector<8x256xf32>
    %119 = arith.maximumf %117, %118 : vector<8x256xf32>
    %120 = arith.maximumf %116, %119 : vector<8x256xf32>
    %121 = arith.addf %120, %3 : vector<8x256xf32>
    %cst_42 = arith.constant 0.000000e+00 : f32
    %122 = vector.broadcast %cst_42 : f32 to vector<8x256xf32>
    %123 = arith.maximumf %121, %122 : vector<8x256xf32>
    %124 = arith.truncf %123 : vector<8x256xf32> to vector<8x256xbf16>
    %c6 = arith.constant 6 : index
    %c0_43 = arith.constant 0 : index
    %c0_44 = arith.constant 0 : index
    %125 = vector.load %arg4[%c6, %c0_43, %c0_44] : memref<12x256x128xbf16, #tpu.memory_space<vmem>>, vector<1x256x128xbf16>
    %126 = vector.shape_cast %125 : vector<1x256x128xbf16> to vector<256x128xbf16>
    %cst_45 = arith.constant dense<0.000000e+00> : vector<8x128xf32>
    %127 = tpu.matmul %124, %126, %cst_45 {dimension_numbers = #tpu.dot_dimension_numbers<[1], [0], [0], [1], [0, 0, 1, 1], [], []>} : vector<8x256xbf16>, vector<256x128xbf16>, vector<8x128xf32> -> vector<8x128xf32>
    %128 = arith.addf %110, %127 : vector<8x128xf32>
    %c0_46 = arith.constant 0 : index
    %c392 = arith.constant 392 : index
    %129 = vector.load %arg1[%c0_46, %c392] : memref<8x784xf32, #tpu.memory_space<vmem>>, vector<8x168xf32>
    %130 = arith.truncf %129 : vector<8x168xf32> to vector<8x168xbf16>
    %cst_47 = arith.constant dense<0.000000e+00> : vector<8x1024xf32>
    %131 = tpu.matmul %130, %0, %cst_47 {dimension_numbers = #tpu.dot_dimension_numbers<[1], [0], [0], [1], [0, 0, 1, 1], [], []>} : vector<8x168xbf16>, vector<168x1024xbf16>, vector<8x1024xf32> -> vector<8x1024xf32>
    %132 = vector.extract_strided_slice %131 {offsets = [0, 0], sizes = [8, 256], strides = [1, 1]} : vector<8x1024xf32> to vector<8x256xf32>
    %133 = vector.extract_strided_slice %131 {offsets = [0, 256], sizes = [8, 256], strides = [1, 1]} : vector<8x1024xf32> to vector<8x256xf32>
    %134 = arith.maximumf %132, %133 : vector<8x256xf32>
    %135 = vector.extract_strided_slice %131 {offsets = [0, 512], sizes = [8, 256], strides = [1, 1]} : vector<8x1024xf32> to vector<8x256xf32>
    %136 = vector.extract_strided_slice %131 {offsets = [0, 768], sizes = [8, 256], strides = [1, 1]} : vector<8x1024xf32> to vector<8x256xf32>
    %137 = arith.maximumf %135, %136 : vector<8x256xf32>
    %138 = arith.maximumf %134, %137 : vector<8x256xf32>
    %139 = arith.addf %138, %3 : vector<8x256xf32>
    %cst_48 = arith.constant 0.000000e+00 : f32
    %140 = vector.broadcast %cst_48 : f32 to vector<8x256xf32>
    %141 = arith.maximumf %139, %140 : vector<8x256xf32>
    %142 = arith.truncf %141 : vector<8x256xf32> to vector<8x256xbf16>
    %c7 = arith.constant 7 : index
    %c0_49 = arith.constant 0 : index
    %c0_50 = arith.constant 0 : index
    %143 = vector.load %arg4[%c7, %c0_49, %c0_50] : memref<12x256x128xbf16, #tpu.memory_space<vmem>>, vector<1x256x128xbf16>
    %144 = vector.shape_cast %143 : vector<1x256x128xbf16> to vector<256x128xbf16>
    %cst_51 = arith.constant dense<0.000000e+00> : vector<8x128xf32>
    %145 = tpu.matmul %142, %144, %cst_51 {dimension_numbers = #tpu.dot_dimension_numbers<[1], [0], [0], [1], [0, 0, 1, 1], [], []>} : vector<8x256xbf16>, vector<256x128xbf16>, vector<8x128xf32> -> vector<8x128xf32>
    %146 = arith.addf %128, %145 : vector<8x128xf32>
    %c0_52 = arith.constant 0 : index
    %c448 = arith.constant 448 : index
    %147 = vector.load %arg1[%c0_52, %c448] : memref<8x784xf32, #tpu.memory_space<vmem>>, vector<8x168xf32>
    %148 = arith.truncf %147 : vector<8x168xf32> to vector<8x168xbf16>
    %cst_53 = arith.constant dense<0.000000e+00> : vector<8x1024xf32>
    %149 = tpu.matmul %148, %0, %cst_53 {dimension_numbers = #tpu.dot_dimension_numbers<[1], [0], [0], [1], [0, 0, 1, 1], [], []>} : vector<8x168xbf16>, vector<168x1024xbf16>, vector<8x1024xf32> -> vector<8x1024xf32>
    %150 = vector.extract_strided_slice %149 {offsets = [0, 0], sizes = [8, 256], strides = [1, 1]} : vector<8x1024xf32> to vector<8x256xf32>
    %151 = vector.extract_strided_slice %149 {offsets = [0, 256], sizes = [8, 256], strides = [1, 1]} : vector<8x1024xf32> to vector<8x256xf32>
    %152 = arith.maximumf %150, %151 : vector<8x256xf32>
    %153 = vector.extract_strided_slice %149 {offsets = [0, 512], sizes = [8, 256], strides = [1, 1]} : vector<8x1024xf32> to vector<8x256xf32>
    %154 = vector.extract_strided_slice %149 {offsets = [0, 768], sizes = [8, 256], strides = [1, 1]} : vector<8x1024xf32> to vector<8x256xf32>
    %155 = arith.maximumf %153, %154 : vector<8x256xf32>
    %156 = arith.maximumf %152, %155 : vector<8x256xf32>
    %157 = arith.addf %156, %3 : vector<8x256xf32>
    %cst_54 = arith.constant 0.000000e+00 : f32
    %158 = vector.broadcast %cst_54 : f32 to vector<8x256xf32>
    %159 = arith.maximumf %157, %158 : vector<8x256xf32>
    %160 = arith.truncf %159 : vector<8x256xf32> to vector<8x256xbf16>
    %c8 = arith.constant 8 : index
    %c0_55 = arith.constant 0 : index
    %c0_56 = arith.constant 0 : index
    %161 = vector.load %arg4[%c8, %c0_55, %c0_56] : memref<12x256x128xbf16, #tpu.memory_space<vmem>>, vector<1x256x128xbf16>
    %162 = vector.shape_cast %161 : vector<1x256x128xbf16> to vector<256x128xbf16>
    %cst_57 = arith.constant dense<0.000000e+00> : vector<8x128xf32>
    %163 = tpu.matmul %160, %162, %cst_57 {dimension_numbers = #tpu.dot_dimension_numbers<[1], [0], [0], [1], [0, 0, 1, 1], [], []>} : vector<8x256xbf16>, vector<256x128xbf16>, vector<8x128xf32> -> vector<8x128xf32>
    %164 = arith.addf %146, %163 : vector<8x128xf32>
    %c0_58 = arith.constant 0 : index
    %c504 = arith.constant 504 : index
    %165 = vector.load %arg1[%c0_58, %c504] : memref<8x784xf32, #tpu.memory_space<vmem>>, vector<8x168xf32>
    %166 = arith.truncf %165 : vector<8x168xf32> to vector<8x168xbf16>
    %cst_59 = arith.constant dense<0.000000e+00> : vector<8x1024xf32>
    %167 = tpu.matmul %166, %0, %cst_59 {dimension_numbers = #tpu.dot_dimension_numbers<[1], [0], [0], [1], [0, 0, 1, 1], [], []>} : vector<8x168xbf16>, vector<168x1024xbf16>, vector<8x1024xf32> -> vector<8x1024xf32>
    %168 = vector.extract_strided_slice %167 {offsets = [0, 0], sizes = [8, 256], strides = [1, 1]} : vector<8x1024xf32> to vector<8x256xf32>
    %169 = vector.extract_strided_slice %167 {offsets = [0, 256], sizes = [8, 256], strides = [1, 1]} : vector<8x1024xf32> to vector<8x256xf32>
    %170 = arith.maximumf %168, %169 : vector<8x256xf32>
    %171 = vector.extract_strided_slice %167 {offsets = [0, 512], sizes = [8, 256], strides = [1, 1]} : vector<8x1024xf32> to vector<8x256xf32>
    %172 = vector.extract_strided_slice %167 {offsets = [0, 768], sizes = [8, 256], strides = [1, 1]} : vector<8x1024xf32> to vector<8x256xf32>
    %173 = arith.maximumf %171, %172 : vector<8x256xf32>
    %174 = arith.maximumf %170, %173 : vector<8x256xf32>
    %175 = arith.addf %174, %3 : vector<8x256xf32>
    %cst_60 = arith.constant 0.000000e+00 : f32
    %176 = vector.broadcast %cst_60 : f32 to vector<8x256xf32>
    %177 = arith.maximumf %175, %176 : vector<8x256xf32>
    %178 = arith.truncf %177 : vector<8x256xf32> to vector<8x256xbf16>
    %c9 = arith.constant 9 : index
    %c0_61 = arith.constant 0 : index
    %c0_62 = arith.constant 0 : index
    %179 = vector.load %arg4[%c9, %c0_61, %c0_62] : memref<12x256x128xbf16, #tpu.memory_space<vmem>>, vector<1x256x128xbf16>
    %180 = vector.shape_cast %179 : vector<1x256x128xbf16> to vector<256x128xbf16>
    %cst_63 = arith.constant dense<0.000000e+00> : vector<8x128xf32>
    %181 = tpu.matmul %178, %180, %cst_63 {dimension_numbers = #tpu.dot_dimension_numbers<[1], [0], [0], [1], [0, 0, 1, 1], [], []>} : vector<8x256xbf16>, vector<256x128xbf16>, vector<8x128xf32> -> vector<8x128xf32>
    %182 = arith.addf %164, %181 : vector<8x128xf32>
    %c0_64 = arith.constant 0 : index
    %c560 = arith.constant 560 : index
    %183 = vector.load %arg1[%c0_64, %c560] : memref<8x784xf32, #tpu.memory_space<vmem>>, vector<8x168xf32>
    %184 = arith.truncf %183 : vector<8x168xf32> to vector<8x168xbf16>
    %cst_65 = arith.constant dense<0.000000e+00> : vector<8x1024xf32>
    %185 = tpu.matmul %184, %0, %cst_65 {dimension_numbers = #tpu.dot_dimension_numbers<[1], [0], [0], [1], [0, 0, 1, 1], [], []>} : vector<8x168xbf16>, vector<168x1024xbf16>, vector<8x1024xf32> -> vector<8x1024xf32>
    %186 = vector.extract_strided_slice %185 {offsets = [0, 0], sizes = [8, 256], strides = [1, 1]} : vector<8x1024xf32> to vector<8x256xf32>
    %187 = vector.extract_strided_slice %185 {offsets = [0, 256], sizes = [8, 256], strides = [1, 1]} : vector<8x1024xf32> to vector<8x256xf32>
    %188 = arith.maximumf %186, %187 : vector<8x256xf32>
    %189 = vector.extract_strided_slice %185 {offsets = [0, 512], sizes = [8, 256], strides = [1, 1]} : vector<8x1024xf32> to vector<8x256xf32>
    %190 = vector.extract_strided_slice %185 {offsets = [0, 768], sizes = [8, 256], strides = [1, 1]} : vector<8x1024xf32> to vector<8x256xf32>
    %191 = arith.maximumf %189, %190 : vector<8x256xf32>
    %192 = arith.maximumf %188, %191 : vector<8x256xf32>
    %193 = arith.addf %192, %3 : vector<8x256xf32>
    %cst_66 = arith.constant 0.000000e+00 : f32
    %194 = vector.broadcast %cst_66 : f32 to vector<8x256xf32>
    %195 = arith.maximumf %193, %194 : vector<8x256xf32>
    %196 = arith.truncf %195 : vector<8x256xf32> to vector<8x256xbf16>
    %c10 = arith.constant 10 : index
    %c0_67 = arith.constant 0 : index
    %c0_68 = arith.constant 0 : index
    %197 = vector.load %arg4[%c10, %c0_67, %c0_68] : memref<12x256x128xbf16, #tpu.memory_space<vmem>>, vector<1x256x128xbf16>
    %198 = vector.shape_cast %197 : vector<1x256x128xbf16> to vector<256x128xbf16>
    %cst_69 = arith.constant dense<0.000000e+00> : vector<8x128xf32>
    %199 = tpu.matmul %196, %198, %cst_69 {dimension_numbers = #tpu.dot_dimension_numbers<[1], [0], [0], [1], [0, 0, 1, 1], [], []>} : vector<8x256xbf16>, vector<256x128xbf16>, vector<8x128xf32> -> vector<8x128xf32>
    %200 = arith.addf %182, %199 : vector<8x128xf32>
    %c0_70 = arith.constant 0 : index
    %c616 = arith.constant 616 : index
    %201 = vector.load %arg1[%c0_70, %c616] : memref<8x784xf32, #tpu.memory_space<vmem>>, vector<8x168xf32>
    %202 = arith.truncf %201 : vector<8x168xf32> to vector<8x168xbf16>
    %cst_71 = arith.constant dense<0.000000e+00> : vector<8x1024xf32>
    %203 = tpu.matmul %202, %0, %cst_71 {dimension_numbers = #tpu.dot_dimension_numbers<[1], [0], [0], [1], [0, 0, 1, 1], [], []>} : vector<8x168xbf16>, vector<168x1024xbf16>, vector<8x1024xf32> -> vector<8x1024xf32>
    %204 = vector.extract_strided_slice %203 {offsets = [0, 0], sizes = [8, 256], strides = [1, 1]} : vector<8x1024xf32> to vector<8x256xf32>
    %205 = vector.extract_strided_slice %203 {offsets = [0, 256], sizes = [8, 256], strides = [1, 1]} : vector<8x1024xf32> to vector<8x256xf32>
    %206 = arith.maximumf %204, %205 : vector<8x256xf32>
    %207 = vector.extract_strided_slice %203 {offsets = [0, 512], sizes = [8, 256], strides = [1, 1]} : vector<8x1024xf32> to vector<8x256xf32>
    %208 = vector.extract_strided_slice %203 {offsets = [0, 768], sizes = [8, 256], strides = [1, 1]} : vector<8x1024xf32> to vector<8x256xf32>
    %209 = arith.maximumf %207, %208 : vector<8x256xf32>
    %210 = arith.maximumf %206, %209 : vector<8x256xf32>
    %211 = arith.addf %210, %3 : vector<8x256xf32>
    %cst_72 = arith.constant 0.000000e+00 : f32
    %212 = vector.broadcast %cst_72 : f32 to vector<8x256xf32>
    %213 = arith.maximumf %211, %212 : vector<8x256xf32>
    %214 = arith.truncf %213 : vector<8x256xf32> to vector<8x256xbf16>
    %c11 = arith.constant 11 : index
    %c0_73 = arith.constant 0 : index
    %c0_74 = arith.constant 0 : index
    %215 = vector.load %arg4[%c11, %c0_73, %c0_74] : memref<12x256x128xbf16, #tpu.memory_space<vmem>>, vector<1x256x128xbf16>
    %216 = vector.shape_cast %215 : vector<1x256x128xbf16> to vector<256x128xbf16>
    %cst_75 = arith.constant dense<0.000000e+00> : vector<8x128xf32>
    %217 = tpu.matmul %214, %216, %cst_75 {dimension_numbers = #tpu.dot_dimension_numbers<[1], [0], [0], [1], [0, 0, 1, 1], [], []>} : vector<8x256xbf16>, vector<256x128xbf16>, vector<8x128xf32> -> vector<8x128xf32>
    %218 = arith.addf %200, %217 : vector<8x128xf32>
    %c0_76 = arith.constant 0 : index
    %c0_77 = arith.constant 0 : index
    %219 = vector.load %arg5[%c0_76, %c0_77] : memref<1x128xf32, #tpu.memory_space<vmem>>, vector<1x128xf32>
    %220 = vector.broadcast %219 : vector<1x128xf32> to vector<8x128xf32>
    %221 = arith.addf %218, %220 : vector<8x128xf32>
    %cst_78 = arith.constant 0.000000e+00 : f32
    %222 = vector.broadcast %cst_78 : f32 to vector<8x128xf32>
    %223 = arith.maximumf %221, %222 : vector<8x128xf32>
    %224 = arith.truncf %223 : vector<8x128xf32> to vector<8x128xbf16>
    %c0_79 = arith.constant 0 : index
    %c0_80 = arith.constant 0 : index
    %225 = vector.load %arg6[%c0_79, %c0_80] : memref<128x128xbf16, #tpu.memory_space<vmem>>, vector<128x128xbf16>
    %cst_81 = arith.constant dense<0.000000e+00> : vector<8x128xf32>
    %226 = tpu.matmul %224, %225, %cst_81 {dimension_numbers = #tpu.dot_dimension_numbers<[1], [0], [0], [1], [0, 0, 1, 1], [], []>} : vector<8x128xbf16>, vector<128x128xbf16>, vector<8x128xf32> -> vector<8x128xf32>
    %c0_82 = arith.constant 0 : index
    %c0_83 = arith.constant 0 : index
    %227 = vector.load %arg7[%c0_82, %c0_83] : memref<1x128xf32, #tpu.memory_space<vmem>>, vector<1x128xf32>
    %228 = vector.broadcast %227 : vector<1x128xf32> to vector<8x128xf32>
    %229 = arith.addf %226, %228 : vector<8x128xf32>
    %c0_84 = arith.constant 0 : index
    %c0_85 = arith.constant 0 : index
    %230 = vector.load %arg8[%c0_84, %c0_85] : memref<8x128xf32, #tpu.memory_space<vmem>>, vector<8x128xf32>
    tpu.vector_store %arg8[%c0_84, %c0_85], %229 {strides = array<i32>} : memref<8x128xf32, #tpu.memory_space<vmem>>, vector<8x128xf32>,
    return
  }
  func.func @transform_0(%arg0: i32) -> (i32, i32) {
    %c0_i32 = arith.constant 0 : i32
    %c0_i32_0 = arith.constant 0 : i32
    return %arg0, %c0_i32 : i32, i32
  }
  func.func @transform_1(%arg0: i32) -> (i32, i32) {
    %c0_i32 = arith.constant 0 : i32
    %c0_i32_0 = arith.constant 0 : i32
    %c0_i32_1 = arith.constant 0 : i32
    return %c0_i32, %c0_i32_0 : i32, i32
  }
  func.func @transform_2(%arg0: i32) -> (i32, i32) {
    %c0_i32 = arith.constant 0 : i32
    %c0_i32_0 = arith.constant 0 : i32
    %c0_i32_1 = arith.constant 0 : i32
    return %c0_i32, %c0_i32_0 : i32, i32
  }
  func.func @transform_3(%arg0: i32) -> (i32, i32, i32) {
    %c0_i32 = arith.constant 0 : i32
    %c0_i32_0 = arith.constant 0 : i32
    %c0_i32_1 = arith.constant 0 : i32
    %c0_i32_2 = arith.constant 0 : i32
    return %c0_i32, %c0_i32_0, %c0_i32_1 : i32, i32, i32
  }
  func.func @transform_4(%arg0: i32) -> (i32, i32) {
    %c0_i32 = arith.constant 0 : i32
    %c0_i32_0 = arith.constant 0 : i32
    %c0_i32_1 = arith.constant 0 : i32
    return %c0_i32, %c0_i32_0 : i32, i32
  }
  func.func @transform_5(%arg0: i32) -> (i32, i32) {
    %c0_i32 = arith.constant 0 : i32
    %c0_i32_0 = arith.constant 0 : i32
    %c0_i32_1 = arith.constant 0 : i32
    return %c0_i32, %c0_i32_0 : i32, i32
  }
  func.func @transform_6(%arg0: i32) -> (i32, i32) {
    %c0_i32 = arith.constant 0 : i32
    %c0_i32_0 = arith.constant 0 : i32
    %c0_i32_1 = arith.constant 0 : i32
    return %c0_i32, %c0_i32_0 : i32, i32
  }
  func.func @transform_7(%arg0: i32) -> (i32, i32) {
    %c0_i32 = arith.constant 0 : i32
    %c0_i32_0 = arith.constant 0 : i32
    return %arg0, %c0_i32 : i32, i32
  }
}

</mosaic_0001>

<bundles_post_ra>
// kernel: net_forward.1
= control target key start
LH: loop header
LB: loop body
LE: loop exit
PB: predicated region body
PF: predicated region fallthrough
CT: control target
= control target key end

     0   :  { %12 = vsyncpa [#allocation3], 0  ;;  %s9052_s0 = inlined_call_operand.vmem [shape: f32[8,784], index: 0, kind: input, shape index: {}]   ;;  %s9053_s1 = inlined_call_operand.hbm [shape: bf16[168,1024], index: 1, kind: input, shape index: {}]   ;;  %s9054_s2 = inlined_call_operand.vmem [shape: f32[1,256], index: 2, kind: input, shape index: {}]   ;;  %s9055_s3 = inlined_call_operand.hbm [shape: bf16[12,256,128], index: 3, kind: input, shape index: {}]   ;;  %s9056_s4 = inlined_call_operand.vmem [shape: f32[1,128], index: 4, kind: input, shape index: {}]   ;;  %s9057_s5 = inlined_call_operand.vmem [shape: bf16[128,128], index: 5, kind: input, shape index: {}]   ;;  %s9058_s6 = inlined_call_operand.vmem [shape: f32[1,128], index: 6, kind: input, shape index: {}]   ;;  %s9059_s7 = inlined_call_operand.vmem [shape: f32[8,128], index: 7, kind: output, shape index: {}]  }
   0x1   :  { %s20_s26 = sshll.u32 %s9053_s1, 4  ;;  %s21_s26 = int_to_ptr.hbm [resolvable:$true] %s20_s26 }
   0x2   :  { %13 = vsyncpa [#allocation5], 0  ;;  %s6937_s27 = smov [#allocation2]   ;;  %s35_s8 = sshll.u32 %s9055_s3, 4  ;;  %s36_s8 = int_to_ptr.hbm [resolvable:$true] %s35_s8 }
   0x3   :  { %s22_s28 = sshll.u32 %s6937_s27, 4  ;;  %s6938_s9 = smov 512   ;;  %s23_s28 = int_to_ptr.vmem [resolvable:$true] %s22_s28 }
   0x4   :  { %s6939_s10 = smov 32   ;;  %s6940_s11 = smov [#allocation4]  }
   0x5   :  { %28 = dma.hbm_to_vmem [thread:$0]  %s21_s26, 10752, %s23_s28, [#allocation3], %s6938_s9, %s6938_s9, %s6939_s10  }
   0x6   :  { %s37_s12 = sshll.u32 %s6940_s11, 4  ;;  %s6941_s13 = smov 64   ;;  %s38_s12 = int_to_ptr.vmem [resolvable:$true] %s37_s12 }
   0x7   :  { %s6942_s14 = smov 4  }
   0x8   :  { %43 = dma.hbm_to_vmem [thread:$0]  %s36_s8, 24576, %s38_s12, [#allocation5], %s6941_s13, %s6941_s13, %s6942_s14  }
   0x9   :  { %6933 = dma.done.wait [#allocation3], 10752  }
   0xa   :  { %6934 = vsyncadd [#allocation3], 4294956544 }
   0xb   :  { %6935 = dma.done.wait [#allocation5], 24576  }
   0xc   :  { %6936 = vsyncadd [#allocation5], 4294942720  ;;  %v149_v0 = vld [vmem:[%s9052_s0] sm:$0xff]  ;;  %vm577_vm0 = vcmask 1043456   ;;  %s6943_s3 = smov 72   ;;  %v150_v20 = vld [vmem:[%s9052_s0 + $0x8] sm:$0xff] }
   0xd   :  { %v5598_v1 = vld [vmem:[#allocation2 + $0x1c0] sm:$0xf]  ;;  %v7004_v3 = vpack.c.bf16 %v149_v0, %v149_v0  ;;  %v6644_v10 = vld [vmem:[#allocation2 + $0x1c4] sm:$0xf]  ;;  %v7034_v35 = vpack.c.bf16 %v150_v20, %v150_v20  ;;  %v5606_v38 = vld [vmem:[#allocation2 + $0x1c8] sm:$0xf] }
   0xe   :  { %v6648_v2 = vld [vmem:[#allocation2 + $0x1dc] sm:$0xf0]  ;;  %v5600_v11 = vld [vmem:[#allocation2 + $0x1e0] sm:$0xf0]  ;;  %v7038_v39 = vld [vmem:[#allocation2 + $0x288] sm:$0xff]  ;;  %vm573_vm1 = vcmask 326656  }
   0xf   :  { %v7006_v4 = vor.u32 %v6648_v2, %v5598_v1  ;;  %v139_v5 = vld [vmem:[#allocation2 + $0x280] sm:$0xff]  ;;  %856 = vrot.lane.b32.xlu0 %v7004_v3, %s6943_s3  ;;  %v7011_v12 = vor.u32 %v6644_v10, %v5600_v11  ;;  %v6649_v40 = vld [vmem:[#allocation2 + $0x1e4] sm:$0xf0]  ;;  %v399_v41 = vunpack.c.l.b16 %v7038_v39  ;;  %s6944_s18 = smov 16   ;;  %vm860_vm2 = vcmask 588800   ;;  %s6945_s21 = smov 88  }
  0x10   :  { %v5566_v6 = vld [vmem:[#allocation2 + $0x180] sm:$0xf]  ;;  %v397_v8 = vunpack.c.l.b16 %v139_v5  ;;  %v398_v9 = vunpack.c.h.b16 %v139_v5  ;;  %v6660_v15 = vld [vmem:[#allocation2 + $0x244] sm:$0xf]  ;;  %v7055_v50 = vor.u32 %v6649_v40, %v5606_v38  ;;  %v5574_v54 = vld [vmem:[#allocation2 + $0x188] sm:$0xf]  ;;  %1372 = vrot.lane.b32.xlu1 %v7004_v3, %s6944_s18 }
  0x11   :  { %9307 = vst [vmem:[#allocation8_spill] sm:$0xff] %v7006_v4  ;;  %v6640_v7 = vld [vmem:[#allocation2 + $0x19c] sm:$0xf0]  ;;  %602 = vmatpush.bf16.msra.mxu0 %v7006_v4  ;;  %v5664_v19 = vld [vmem:[#allocation2 + $0x260] sm:$0xf0]  ;;  %628 = vmatpush.bf16.msra.mxu2 %v7011_v12  ;;  %v487_v47 = vpack.c.b16 %v399_v41, %v399_v41  ;;  %vm1378_vm3 = vcmask 130048  }
  0x12   :  { %9308 = vst [vmem:[#allocation9_spill] sm:$0xff] %v7011_v12  ;;  %v5662_v13 = vld [vmem:[#allocation2 + $0x240] sm:$0xf]  ;;  %v485_v16 = vpack.c.b16 %v397_v8, %v397_v8  ;;  %v486_v17 = vpack.c.b16 %v398_v9, %v398_v9  ;;  %v7013_v18 = vor.u32 %v6640_v7, %v5566_v6  ;;  %v6636_v23 = vld [vmem:[#allocation2 + $0x184] sm:$0xf]  ;;  %v7031_v31 = vor.u32 %v6660_v15, %v5664_v19  ;;  %s6946_s29 = smov 104  }
  0x13   :  { %v6664_v14 = vld [vmem:[#allocation2 + $0x25c] sm:$0xf0]  ;;  %v5568_v24 = vld [vmem:[#allocation2 + $0x1a0] sm:$0xf0]  ;;  %9320 = vst [vmem:[#allocation21_spill] sm:$0xff] %v7055_v50  ;;  %v7061_v58 = vsel %vm577_vm0, %v487_v47, 0 }
  0x14   :  { %9309 = vst [vmem:[#allocation10_spill] sm:$0xff] %v7013_v18  ;;  %v5534_v21 = vld [vmem:[#allocation2 + $0x140] sm:$0xf]  ;;  %v7020_v25 = vsel %vm577_vm0, %v485_v16, 0  ;;  %v7023_v26 = vsel %vm577_vm0, %v486_v17, 0  ;;  %v7025_v27 = vor.u32 %v6636_v23, %v5568_v24  ;;  %v7029_v30 = vor.u32 %v6664_v14, %v5662_v13  ;;  %s6947_s30 = smov 48  }
  0x15   :  { %v6632_v22 = vld [vmem:[#allocation2 + $0x15c] sm:$0xf0]  ;;  %9310 = vst [vmem:[#allocation11_spill] sm:$0xff] %v7020_v25  ;;  %620 = vmatpush.bf16.msra.mxu1 %v7020_v25  ;;  %646 = vmatpush.bf16.msra.mxu3 %v7023_v26  ;;  %v6652_v32 = vld [vmem:[#allocation2 + $0x204] sm:$0xf]  ;;  %vm1765_vm4 = vcmask 719872  }
  0x16   :  { %9311 = vst [vmem:[#allocation12_spill] sm:$0xff] %v7023_v26  ;;  %v5630_v28 = vld [vmem:[#allocation2 + $0x200] sm:$0xf]  ;;  %v5632_v33 = vld [vmem:[#allocation2 + $0x220] sm:$0xf0]  ;;  %603 = vmatpush.bf16.msra.mxu0 %v7013_v18  ;;  %v7036_v36 = vor.u32 %v6632_v22, %v5534_v21  ;;  %629 = vmatpush.bf16.msra.mxu2 %v7025_v27  ;;  %vm2162_vm5 = vcmask 261120  }
  0x17   :  { %9312 = vst [vmem:[#allocation13_spill] sm:$0xff] %v7025_v27  ;;  %v6656_v29 = vld [vmem:[#allocation2 + $0x21c] sm:$0xf0]  ;;  %v6628_v42 = vld [vmem:[#allocation2 + $0x144] sm:$0xf]  ;;  %v7048_v46 = vor.u32 %v6652_v32, %v5632_v33  ;;  %858 = vrot.lane.b32.xlu0 %v7034_v35, %s6943_s3  ;;  %vm2549_vm6 = vcmask 850944  }
  0x18   :  { %9313 = vst [vmem:[#allocation14_spill] sm:$0xff] %v7029_v30  ;;  %v5502_v34 = vld [vmem:[#allocation2 + $0x100] sm:$0xf]  ;;  %v5536_v43 = vld [vmem:[#allocation2 + $0x160] sm:$0xf0]  ;;  %v7046_v45 = vor.u32 %v6656_v29, %v5630_v28  ;;  %1374 = vrot.lane.b32.xlu1 %v7034_v35, %s6944_s18  ;;  %vm2935_vm7 = vcmask 392192  }
  0x19   :  { %9314 = vst [vmem:[#allocation15_spill] sm:$0xff] %v7031_v31  ;;  %v6624_v37 = vld [vmem:[#allocation2 + $0x11c] sm:$0xf0]  ;;  %v7042_v44 = vor.u32 %v6628_v42, %v5536_v43  ;;  %621 = vmatpush.bf16.msra.mxu1 %v7029_v30  ;;  %647 = vmatpush.bf16.msra.mxu3 %v7031_v31  ;;  %v6620_v48 = vld [vmem:[#allocation2 + $0x104] sm:$0xf]  ;;  %vm3327_vm8 = vcmask 982016  }
  0x1a   :  { %9315 = vst [vmem:[#allocation16_spill] sm:$0xff] %v7036_v36  ;;  %604 = vmatpush.bf16.msra.mxu0 %v7036_v36  ;;  %v7053_v49 = vor.u32 %v6624_v37, %v5502_v34  ;;  %v5470_v51 = vld [vmem:[#allocation2 + $0xc0] sm:$0xf]  ;;  %v5504_v53 = vld [vmem:[#allocation2 + $0x120] sm:$0xf0]  ;;  %vm3713_vm9 = vcmask 523264  }
  0x1b   :  { %9316 = vst [vmem:[#allocation17_spill] sm:$0xff] %v7042_v44  ;;  %v6616_v52 = vld [vmem:[#allocation2 + $0xdc] sm:$0xf0]  ;;  %630 = vmatpush.bf16.msra.mxu2 %v7042_v44  ;;  %v6641_v55 = vld [vmem:[#allocation2 + $0x1a4] sm:$0xf0]  ;;  %v7058_v57 = vor.u32 %v6620_v48, %v5504_v53  ;;  %s6950_s15 = smov 80  }
  0x1c   :  { %9317 = vst [vmem:[#allocation18_spill] sm:$0xff] %v7046_v45  ;;  %v5670_v56 = vld [vmem:[#allocation2 + $0x248] sm:$0xf]  ;;  %v6612_v60 = vld [vmem:[#allocation2 + $0xc4] sm:$0xf]  ;;  %v7067_v62 = vor.u32 %v6616_v52, %v5470_v51  ;;  %v7069_v63 = vor.u32 %v6641_v55, %v5574_v54  ;;  %vm4110_vm10 = vcmask 64512  }
  0x1d   :  { %9318 = vst [vmem:[#allocation19_spill] sm:$0xff] %v7048_v46  ;;  %v6665_v59 = vld [vmem:[#allocation2 + $0x264] sm:$0xf0]  ;;  %622 = vmatpush.bf16.msra.mxu1 %v7046_v45  ;;  %648 = vmatpush.bf16.msra.mxu3 %v7048_v46  ;;  %v5472_v61 = vld [vmem:[#allocation2 + $0xe0] sm:$0xf0]  ;;  %s6951_s3 = smov 24  }
  0x1e   :  { %9319 = vst [vmem:[#allocation20_spill] sm:$0xff] %v7053_v49  ;;  %605 = vmatpush.bf16.msra.mxu0 %v7053_v49  ;;  %v5438_v0 = vld [vmem:[#allocation2 + $0x80] sm:$0xf]  ;;  %v7072_v2 = vor.u32 %v6665_v59, %v5670_v56  ;;  %v5542_v5 = vld [vmem:[#allocation2 + $0x148] sm:$0xf]  ;;  %v7075_v8 = vor.u32 %v6612_v60, %v5472_v61  ;;  %vm4497_vm11 = vcmask 654336  }
  0x1f   :  { %9321 = vst [vmem:[#allocation22_spill] sm:$0xff] %v7058_v57  ;;  %v6608_v1 = vld [vmem:[#allocation2 + $0x9c] sm:$0xf0]  ;;  %631 = vmatpush.bf16.msra.mxu2 %v7058_v57  ;;  %v6633_v6 = vld [vmem:[#allocation2 + $0x164] sm:$0xf0]  ;;  %vm4894_vm12 = vcmask 195584  }
  0x20   :  { %9322 = vst [vmem:[#allocation23_spill] sm:$0xff] %v7061_v58  ;;  %v5638_v7 = vld [vmem:[#allocation2 + $0x208] sm:$0xf]  ;;  %5692 = vmatmul.msk.bf16.vlgmr.msra.gmra.mxu1 %vm573_vm1, %v7034_v35  ;;  %5693 = vmatmul.msk.bf16.vlgmr.msra.gmra.mxu3 %vm573_vm1, %v7034_v35  ;;  %v6604_v10 = vld [vmem:[#allocation2 + $0x84] sm:$0xf]  ;;  %v7083_v15 = vor.u32 %v6608_v1, %v5438_v0  ;;  %v7085_v16 = vor.u32 %v6633_v6, %v5542_v5 }
  0x21   :  { %654 = vmatpush.bf16.msrb.mxu1 %v7055_v50  ;;  %9323 = vst [vmem:[#allocation24_spill] sm:$0xff] %v7067_v62  ;;  %672 = vmatpush.bf16.msrb.mxu3 %v7061_v58  ;;  %v6657_v9 = vld [vmem:[#allocation2 + $0x224] sm:$0xf0]  ;;  %v5440_v11 = vld [vmem:[#allocation2 + $0xa0] sm:$0xf0] }
  0x22   :  { %9324 = vst [vmem:[#allocation25_spill] sm:$0xff] %v7069_v63  ;;  %v6645_v13 = vld [vmem:[#allocation2 + $0x1cc] sm:$0xf]  ;;  %606 = vmatpush.bf16.msra.mxu0 %v7067_v62  ;;  %v5406_v17 = vld [vmem:[#allocation2 + $0x40] sm:$0xf]  ;;  %v7088_v19 = vor.u32 %v6657_v9, %v5638_v7  ;;  %v7091_v23 = vor.u32 %v6604_v10, %v5440_v11 }
  0x23   :  { %9325 = vst [vmem:[#allocation26_spill] sm:$0xff] %v7072_v2  ;;  %v5608_v14 = vld [vmem:[#allocation2 + $0x1e8] sm:$0xf0]  ;;  %632 = vmatpush.bf16.msra.mxu2 %v7075_v8  ;;  %v6600_v20 = vld [vmem:[#allocation2 + $0x5c] sm:$0xf0] }
  0x24   :  { %9326 = vst [vmem:[#allocation27_spill] sm:$0xff] %v7075_v8  ;;  %v5510_v21 = vld [vmem:[#allocation2 + $0x108] sm:$0xf]  ;;  %v7093_v24 = vor.u32 %v6645_v13, %v5608_v14  ;;  %v6596_v28 = vld [vmem:[#allocation2 + $0x44] sm:$0xf]  ;;  %v7097_v34 = vor.u32 %v6600_v20, %v5406_v17 }
  0x25   :  { %655 = vmatpush.bf16.msrb.mxu1 %v7069_v63  ;;  %9327 = vst [vmem:[#allocation28_spill] sm:$0xff] %v7083_v15  ;;  %673 = vmatpush.bf16.msrb.mxu3 %v7072_v2  ;;  %v6625_v22 = vld [vmem:[#allocation2 + $0x124] sm:$0xf0]  ;;  %v5408_v29 = vld [vmem:[#allocation2 + $0x60] sm:$0xf0] }
  0x26   :  { %9328 = vst [vmem:[#allocation29_spill] sm:$0xff] %v7085_v16  ;;  %v6637_v32 = vld [vmem:[#allocation2 + $0x18c] sm:$0xf]  ;;  %607 = vmatpush.bf16.msra.mxu0 %v7083_v15  ;;  %v7099_v37 = vor.u32 %v6625_v22, %v5510_v21  ;;  %v5374_v38 = vld [vmem:[#allocation2] sm:$0xf]  ;;  %v7103_v43 = vor.u32 %v6596_v28, %v5408_v29  ;;  %v400_v22 = vunpack.c.h.b16 %v7038_v39 }
  0x27   :  { %9329 = vst [vmem:[#allocation30_spill] sm:$0xff] %v7088_v19  ;;  %v5576_v33 = vld [vmem:[#allocation2 + $0x1a8] sm:$0xf0]  ;;  %633 = vmatpush.bf16.msra.mxu2 %v7091_v23  ;;  %v6592_v40 = vld [vmem:[#allocation2 + $0x1c] sm:$0xf0] }
  0x28   :  { %9330 = vst [vmem:[#allocation31_spill] sm:$0xff] %v7091_v23  ;;  %v5478_v41 = vld [vmem:[#allocation2 + $0xc8] sm:$0xf]  ;;  %v7106_v47 = vor.u32 %v6637_v32, %v5576_v33  ;;  %v6629_v48 = vld [vmem:[#allocation2 + $0x14c] sm:$0xf]  ;;  %v7110_v56 = vor.u32 %v6592_v40, %v5374_v38 }
  0x29   :  { %656 = vmatpush.bf16.msrb.mxu1 %v7085_v16  ;;  %9331 = vst [vmem:[#allocation32_spill] sm:$0xff] %v7097_v34  ;;  %674 = vmatpush.bf16.msrb.mxu3 %v7088_v19  ;;  %v6617_v42 = vld [vmem:[#allocation2 + $0xe4] sm:$0xf0]  ;;  %v6588_v51 = vld [vmem:[#allocation2 + $0x4] sm:$0xf] }
  0x2a   :  { %9332 = vst [vmem:[#allocation33_spill] sm:$0xff] %v7099_v37  ;;  %v5376_v52 = vld [vmem:[#allocation2 + $0x20] sm:$0xf0]  ;;  %v5544_v53 = vld [vmem:[#allocation2 + $0x168] sm:$0xf0]  ;;  %608 = vmatpush.bf16.msra.mxu0 %v7097_v34  ;;  %v7112_v59 = vor.u32 %v6617_v42, %v5478_v41 }
  0x2b   :  { %9333 = vst [vmem:[#allocation34_spill] sm:$0xff] %v7103_v43  ;;  %v5614_v54 = vld [vmem:[#allocation2 + $0x1d0] sm:$0xf]  ;;  %634 = vmatpush.bf16.msra.mxu2 %v7103_v43  ;;  %v5446_v60 = vld [vmem:[#allocation2 + $0x88] sm:$0xf]  ;;  %v7115_v0 = vor.u32 %v6588_v51, %v5376_v52  ;;  %v7118_v1 = vor.u32 %v6629_v48, %v5544_v53 }
  0x2c   :  { %v6650_v55 = vld [vmem:[#allocation2 + $0x1ec] sm:$0xf0]  ;;  %9334 = vst [vmem:[#allocation35_spill] sm:$0xff] %v7110_v56  ;;  %v6609_v61 = vld [vmem:[#allocation2 + $0xa4] sm:$0xf0] }
  0x2d   :  { %680 = vmatpush.bf16.msra.mxu3 %v7093_v24  ;;  %657 = vmatpush.bf16.msrb.mxu1 %v7099_v37  ;;  %9335 = vst [vmem:[#allocation36_spill] sm:$0xff] %v7112_v59  ;;  %v6621_v5 = vld [vmem:[#allocation2 + $0x10c] sm:$0xf]  ;;  %v7120_v6 = vor.u32 %v6650_v55, %v5614_v54  ;;  %v6646_v7 = vld [vmem:[#allocation2 + $0x1d4] sm:$0xf]  ;;  %v7126_v17 = vor.u32 %v6609_v61, %v5446_v60 }
  0x2e   :  { %9336 = vst [vmem:[#allocation37_spill] sm:$0xff] %v7115_v0  ;;  %v5616_v9 = vld [vmem:[#allocation2 + $0x1f0] sm:$0xf0]  ;;  %v5512_v10 = vld [vmem:[#allocation2 + $0x128] sm:$0xf0]  ;;  %609 = vmatpush.bf16.msra.mxu0 %v7110_v56  ;;  %v488_v60 = vpack.c.b16 %v400_v22, %v400_v22 }
  0x2f   :  { %9337 = vst [vmem:[#allocation38_spill] sm:$0xff] %v7118_v1  ;;  %v5582_v11 = vld [vmem:[#allocation2 + $0x190] sm:$0xf]  ;;  %v7122_v14 = vor.u32 %v6646_v7, %v5616_v9  ;;  %v5414_v20 = vld [vmem:[#allocation2 + $0x48] sm:$0xf]  ;;  %635 = vmatpush.bf16.msra.mxu2 %v7115_v0  ;;  %v7132_v32 = vor.u32 %v6621_v5, %v5512_v10 }
  0x30   :  { %9338 = vst [vmem:[#allocation39_spill] sm:$0xff] %v7120_v6  ;;  %v6642_v13 = vld [vmem:[#allocation2 + $0x1ac] sm:$0xf0]  ;;  %v6601_v21 = vld [vmem:[#allocation2 + $0x64] sm:$0xf0]  ;;  %5694 = vmatmul.msk.bf16.vlgmr.msrb.gmra.mxu3 %vm573_vm1, %v7034_v35 }
  0x31   :  { %681 = vmatpush.bf16.msra.mxu3 %v7106_v47  ;;  %9339 = vst [vmem:[#allocation40_spill] sm:$0xff] %v7122_v14  ;;  %658 = vmatpush.bf16.msrb.mxu1 %v7112_v59  ;;  %v6638_v28 = vld [vmem:[#allocation2 + $0x194] sm:$0xf]  ;;  %v6613_v33 = vld [vmem:[#allocation2 + $0xcc] sm:$0xf]  ;;  %v7135_v40 = vor.u32 %v6642_v13, %v5582_v11  ;;  %v7143_v48 = vor.u32 %v6601_v21, %v5414_v20 }
  0x32   :  { %9340 = vst [vmem:[#allocation41_spill] sm:$0xff] %v7126_v17  ;;  %732 = vmatpush.bf16.msrb.mxu0 %v7122_v14  ;;  %v5584_v29 = vld [vmem:[#allocation2 + $0x1b0] sm:$0xf0]  ;;  %v5480_v38 = vld [vmem:[#allocation2 + $0xe8] sm:$0xf0]  ;;  %636 = vmatmul.bf16.vlgmr.msra.gmra.mxu2 %v7004_v3 }
  0x33   :  { %9341 = vst [vmem:[#allocation42_spill] sm:$0xff] %v7132_v32  ;;  %706 = vmatpush.bf16.msrb.mxu2 %v7120_v6  ;;  %v7137_v41 = vor.u32 %v6638_v28, %v5584_v29  ;;  %610 = vmatmul.bf16.vlgmr.msra.gmra.mxu0 %v7004_v3  ;;  %v5550_v39 = vld [vmem:[#allocation2 + $0x150] sm:$0xf]  ;;  %v6630_v51 = vld [vmem:[#allocation2 + $0x154] sm:$0xf]  ;;  %v7152_v5 = vor.u32 %v6613_v33, %v5480_v38  ;;  %v7163_v29 = vsel %vm577_vm0, %v488_v60, 0 }
  0x34   :  { %9342 = vst [vmem:[#allocation43_spill] sm:$0xff] %v7135_v40  ;;  %v6634_v42 = vld [vmem:[#allocation2 + $0x16c] sm:$0xf0]  ;;  %v5552_v52 = vld [vmem:[#allocation2 + $0x170] sm:$0xf0] }
  0x35   :  { %682 = vmatpush.bf16.msra.mxu3 %v7118_v1  ;;  %9343 = vst [vmem:[#allocation44_spill] sm:$0xff] %v7137_v41  ;;  %659 = vmatpush.bf16.msrb.mxu1 %v7126_v17  ;;  %v5382_v53 = vld [vmem:[#allocation2 + $0x8] sm:$0xf]  ;;  %v6605_v55 = vld [vmem:[#allocation2 + $0x8c] sm:$0xf]  ;;  %v7147_v61 = vor.u32 %v6630_v51, %v5552_v52  ;;  %v7155_v9 = vor.u32 %v6634_v42, %v5550_v39  ;;  %v7157_v20 = vld [vmem:[#allocation2 + $0x290] sm:$0xff] }
  0x36   :  { %9344 = vst [vmem:[#allocation45_spill] sm:$0xff] %v7143_v48  ;;  %v6593_v54 = vld [vmem:[#allocation2 + $0x24] sm:$0xf0]  ;;  %733 = vmatpush.bf16.msrb.mxu0 %v7137_v41  ;;  %v5448_v7 = vld [vmem:[#allocation2 + $0xa8] sm:$0xf0]  ;;  %v401_v52 = vunpack.c.l.b16 %v7157_v20 }
  0x37   :  { %9345 = vst [vmem:[#allocation46_spill] sm:$0xff] %v7147_v61  ;;  %707 = vmatpush.bf16.msrb.mxu2 %v7135_v40  ;;  %v5518_v10 = vld [vmem:[#allocation2 + $0x110] sm:$0xf]  ;;  %v6622_v11 = vld [vmem:[#allocation2 + $0x114] sm:$0xf]  ;;  %v7160_v22 = vor.u32 %v6593_v54, %v5382_v53  ;;  %v7169_v39 = vor.u32 %v6605_v55, %v5448_v7 }
  0x38   :  { %9346 = vst [vmem:[#allocation47_spill] sm:$0xff] %v7152_v5  ;;  %v6626_v13 = vld [vmem:[#allocation2 + $0x12c] sm:$0xf0]  ;;  %v5520_v21 = vld [vmem:[#allocation2 + $0x130] sm:$0xf0] }
  0x39   :  { %683 = vmatpush.bf16.msra.mxu3 %v7132_v32  ;;  %9347 = vst [vmem:[#allocation48_spill] sm:$0xff] %v7155_v9  ;;  %660 = vmatpush.bf16.msrb.mxu1 %v7143_v48  ;;  %v6597_v28 = vld [vmem:[#allocation2 + $0x4c] sm:$0xf]  ;;  %v7166_v38 = vor.u32 %v6622_v11, %v5520_v21  ;;  %v7172_v42 = vor.u32 %v6626_v13, %v5518_v10  ;;  %v6614_v53 = vld [vmem:[#allocation2 + $0xd4] sm:$0xf] }
  0x3a   :  { %9348 = vst [vmem:[#allocation49_spill] sm:$0xff] %v7160_v22  ;;  %v6661_v33 = vld [vmem:[#allocation2 + $0x24c] sm:$0xf]  ;;  %734 = vmatpush.bf16.msrb.mxu0 %v7147_v61  ;;  %v5488_v54 = vld [vmem:[#allocation2 + $0xf0] sm:$0xf0] }
  0x3b   :  { %9349 = vst [vmem:[#allocation50_spill] sm:$0xff] %v7163_v29  ;;  %708 = vmatpush.bf16.msrb.mxu2 %v7155_v9  ;;  %v5672_v51 = vld [vmem:[#allocation2 + $0x268] sm:$0xf0]  ;;  %v5486_v41 = vld [vmem:[#allocation2 + $0xd0] sm:$0xf]  ;;  %v7180_v7 = vor.u32 %v6614_v53, %v5488_v54  ;;  %v489_v9 = vpack.c.b16 %v401_v52, %v401_v52 }
  0x3c   :  { %9350 = vst [vmem:[#allocation51_spill] sm:$0xff] %v7166_v38  ;;  %v5416_v60 = vld [vmem:[#allocation2 + $0x68] sm:$0xf0]  ;;  %v6618_v40 = vld [vmem:[#allocation2 + $0xec] sm:$0xf0]  ;;  %v7177_v21 = vor.u32 %v6661_v33, %v5672_v51 }
  0x3d   :  { %684 = vmatpush.bf16.msra.mxu3 %v7152_v5  ;;  %9351 = vst [vmem:[#allocation52_spill] sm:$0xff] %v7169_v39  ;;  %661 = vmatpush.bf16.msrb.mxu1 %v7160_v22  ;;  %v6589_v11 = vld [vmem:[#allocation2 + $0xc] sm:$0xf]  ;;  %v7183_v10 = vor.u32 %v6597_v28, %v5416_v60  ;;  %v7186_v13 = vor.u32 %v6618_v40, %v5486_v41  ;;  %v6606_v5 = vld [vmem:[#allocation2 + $0x94] sm:$0xf] }
  0x3e   :  { %9352 = vst [vmem:[#allocation53_spill] sm:$0xff] %v7172_v42  ;;  %v6653_v55 = vld [vmem:[#allocation2 + $0x20c] sm:$0xf]  ;;  %735 = vmatpush.bf16.msrb.mxu0 %v7166_v38  ;;  %v5456_v32 = vld [vmem:[#allocation2 + $0xb0] sm:$0xf0] }
  0x3f   :  { %9353 = vst [vmem:[#allocation54_spill] sm:$0xff] %v7177_v21  ;;  %709 = vmatpush.bf16.msrb.mxu2 %v7172_v42  ;;  %v5640_v61 = vld [vmem:[#allocation2 + $0x228] sm:$0xf0]  ;;  %v5454_v51 = vld [vmem:[#allocation2 + $0x90] sm:$0xf]  ;;  %v7195_v40 = vor.u32 %v6606_v5, %v5456_v32  ;;  %v7204_v42 = vsel %vm577_vm0, %v489_v9, 0 }
  0x40   :  { %9354 = vst [vmem:[#allocation55_spill] sm:$0xff] %v7180_v7  ;;  %662 = vmatmul.bf16.vlgmr.msrb.gmra.mxu1 %v7004_v3  ;;  %v5384_v33 = vld [vmem:[#allocation2 + $0x28] sm:$0xf0]  ;;  %v6610_v14 = vld [vmem:[#allocation2 + $0xac] sm:$0xf0]  ;;  %v7192_v28 = vor.u32 %v6653_v55, %v5640_v61 }
  0x41   :  { %698 = vmatpush.bf16.msra.mxu1 %v7163_v29  ;;  %685 = vmatpush.bf16.msra.mxu3 %v7169_v39  ;;  %9355 = vst [vmem:[#allocation56_spill] sm:$0xff] %v7183_v10  ;;  %v5622_v53 = vld [vmem:[#allocation2 + $0x1d8] sm:$0xf]  ;;  %v7198_v41 = vor.u32 %v6589_v11, %v5384_v33  ;;  %v7201_v52 = vor.u32 %v6610_v14, %v5454_v51  ;;  %v6598_v61 = vld [vmem:[#allocation2 + $0x54] sm:$0xf]  ;;  %v402_v51 = vunpack.c.h.b16 %v7157_v20 }
  0x42   :  { %9356 = vst [vmem:[#allocation57_spill] sm:$0xff] %v7186_v13  ;;  %v6651_v54 = vld [vmem:[#allocation2 + $0x1f4] sm:$0xf0]  ;;  %736 = vmatpush.bf16.msrb.mxu0 %v7180_v7  ;;  %v5424_v55 = vld [vmem:[#allocation2 + $0x70] sm:$0xf0] }
  0x43   :  { %9357 = vst [vmem:[#allocation58_spill] sm:$0xff] %v7192_v28  ;;  %710 = vmatpush.bf16.msrb.mxu2 %v7186_v13  ;;  %v5590_v60 = vld [vmem:[#allocation2 + $0x198] sm:$0xf]  ;;  %v7206_v6 = vor.u32 %v6651_v54, %v5622_v53  ;;  %v5422_v32 = vld [vmem:[#allocation2 + $0x50] sm:$0xf]  ;;  %v7210_v33 = vor.u32 %v6598_v61, %v5424_v55 }
  0x44   :  { %9358 = vst [vmem:[#allocation59_spill] sm:$0xff] %v7195_v40  ;;  %v6643_v38 = vld [vmem:[#allocation2 + $0x1b4] sm:$0xf0]  ;;  %v6602_v5 = vld [vmem:[#allocation2 + $0x6c] sm:$0xf0] }
  0x45   :  { %699 = vmatpush.bf16.msra.mxu1 %v7177_v21  ;;  %686 = vmatpush.bf16.msra.mxu3 %v7183_v10  ;;  %9359 = vst [vmem:[#allocation60_spill] sm:$0xff] %v7198_v41  ;;  %v142_v39 = vld [vmem:[#allocation2 + $0x298] sm:$0xff]  ;;  %v5678_v10 = vld [vmem:[#allocation2 + $0x250] sm:$0xf]  ;;  %v7214_v9 = vor.u32 %v6602_v5, %v5422_v32  ;;  %v6590_v53 = vld [vmem:[#allocation2 + $0x14] sm:$0xf]  ;;  %v7218_v13 = vor.u32 %v6643_v38, %v5590_v60 }
  0x46   :  { %9360 = vst [vmem:[#allocation61_spill] sm:$0xff] %v7201_v52  ;;  %v404_v7 = vunpack.c.h.b16 %v142_v39  ;;  %v6666_v11 = vld [vmem:[#allocation2 + $0x26c] sm:$0xf0]  ;;  %737 = vmatpush.bf16.msrb.mxu0 %v7195_v40  ;;  %v403_v14 = vunpack.c.l.b16 %v142_v39  ;;  %v5392_v54 = vld [vmem:[#allocation2 + $0x30] sm:$0xf0] }
  0x47   :  { %9361 = vst [vmem:[#allocation62_spill] sm:$0xff] %v7204_v42  ;;  %711 = vmatpush.bf16.msrb.mxu2 %v7201_v52  ;;  %v7221_v40 = vor.u32 %v6666_v11, %v5678_v10  ;;  %v5390_v39 = vld [vmem:[#allocation2 + $0x10] sm:$0xf]  ;;  %v6635_v1 = vld [vmem:[#allocation2 + $0x174] sm:$0xf0]  ;;  %v7225_v52 = vor.u32 %v6590_v53, %v5392_v54  ;;  %v490_v10 = vpack.c.b16 %v402_v51, %v402_v51 }
  0x48   :  { %9362 = vst [vmem:[#allocation63_spill] sm:$0xff] %v7206_v6  ;;  %v6594_v61 = vld [vmem:[#allocation2 + $0x2c] sm:$0xf0]  ;;  %v492_v55 = vpack.c.b16 %v404_v7, %v404_v7  ;;  %v491_v20 = vpack.c.b16 %v403_v14, %v403_v14  ;;  %v6663_v11 = vld [vmem:[#allocation2 + $0x25c] sm:$0xf] }
  0x49   :  { %700 = vmatpush.bf16.msra.mxu1 %v7192_v28  ;;  %9363 = vst [vmem:[#allocation64_spill] sm:$0xff] %v7210_v33  ;;  %687 = vmatpush.bf16.msra.mxu3 %v7198_v41  ;;  %v5558_v41 = vld [vmem:[#allocation2 + $0x158] sm:$0xf]  ;;  %v5646_v32 = vld [vmem:[#allocation2 + $0x210] sm:$0xf]  ;;  %v7228_v38 = vor.u32 %v6594_v61, %v5390_v39 }
  0x4a   :  { %9364 = vst [vmem:[#allocation65_spill] sm:$0xff] %v7214_v9  ;;  %v6658_v5 = vld [vmem:[#allocation2 + $0x22c] sm:$0xf0]  ;;  %738 = vmatpush.bf16.msrb.mxu0 %v7210_v33  ;;  %v7231_v60 = vor.u32 %v6635_v1, %v5558_v41  ;;  %v7235_v7 = vsel %vm577_vm0, %v492_v55, 0  ;;  %v5688_v14 = vld [vmem:[#allocation2 + $0x278] sm:$0xf0] }
  0x4b   :  { %9365 = vst [vmem:[#allocation66_spill] sm:$0xff] %v7218_v13  ;;  %712 = vmatpush.bf16.msrb.mxu2 %v7214_v9  ;;  %v6627_v33 = vld [vmem:[#allocation2 + $0x134] sm:$0xf0]  ;;  %v7237_v53 = vor.u32 %v6658_v5, %v5646_v32  ;;  %v7240_v54 = vsel %vm577_vm0, %v491_v20, 0  ;;  %v7245_v1 = vsel %vm577_vm0, %v490_v10, 0  ;;  %v7248_v55 = vor.u32 %v6663_v11, %v5688_v14 }
  0x4c   :  { %9366 = vst [vmem:[#allocation67_spill] sm:$0xff] %v7221_v40  ;;  %688 = vmatmul.bf16.vlgmr.msra.gmra.mxu3 %v7004_v3  ;;  %v5686_v39 = vld [vmem:[#allocation2 + $0x258] sm:$0xf]  ;;  %v6662_v41 = vld [vmem:[#allocation2 + $0x254] sm:$0xf] }
  0x4d   :  { %758 = vmatpush.bf16.msrb.mxu3 %v7206_v6  ;;  %724 = vmatpush.bf16.msrb.mxu1 %v7204_v42  ;;  %9367 = vst [vmem:[#allocation68_spill] sm:$0xff] %v7225_v52  ;;  %v5526_v6 = vld [vmem:[#allocation2 + $0x118] sm:$0xf]  ;;  %v5680_v61 = vld [vmem:[#allocation2 + $0x270] sm:$0xf0] }
  0x4e   :  { %9368 = vst [vmem:[#allocation69_spill] sm:$0xff] %v7228_v38  ;;  %v6667_v51 = vld [vmem:[#allocation2 + $0x274] sm:$0xf0]  ;;  %739 = vmatpush.bf16.msrb.mxu0 %v7225_v52  ;;  %v7253_v32 = vor.u32 %v6627_v33, %v5526_v6  ;;  %v6655_v5 = vld [vmem:[#allocation2 + $0x21c] sm:$0xf]  ;;  %v7261_v11 = vor.u32 %v6662_v41, %v5680_v61 }
  0x4f   :  { %9369 = vst [vmem:[#allocation70_spill] sm:$0xff] %v7231_v60  ;;  %713 = vmatpush.bf16.msrb.mxu2 %v7228_v38  ;;  %v5656_v20 = vld [vmem:[#allocation2 + $0x238] sm:$0xf0]  ;;  %v5494_v52 = vld [vmem:[#allocation2 + $0xd8] sm:$0xf]  ;;  %v7257_v38 = vor.u32 %v6667_v51, %v5686_v39 }
  0x50   :  { %9370 = vst [vmem:[#allocation71_spill] sm:$0xff] %v7235_v7  ;;  %5695 = vmatmul.msk.bf16.vlgmr.msra.gmra.mxu1 %vm573_vm1, %v7034_v35  ;;  %v6619_v10 = vld [vmem:[#allocation2 + $0xf4] sm:$0xf0]  ;;  %v6654_v6 = vld [vmem:[#allocation2 + $0x214] sm:$0xf]  ;;  %v7264_v9 = vor.u32 %v6655_v5, %v5656_v20 }
  0x51   :  { %759 = vmatpush.bf16.msrb.mxu3 %v7218_v13  ;;  %725 = vmatpush.bf16.msrb.mxu1 %v7221_v40  ;;  %9371 = vst [vmem:[#allocation72_spill] sm:$0xff] %v7237_v53  ;;  %v5654_v14 = vld [vmem:[#allocation2 + $0x218] sm:$0xf]  ;;  %v5648_v33 = vld [vmem:[#allocation2 + $0x230] sm:$0xf0] }
  0x52   :  { %9372 = vst [vmem:[#allocation73_spill] sm:$0xff] %v7240_v54  ;;  %802 = vmatpush.bf16.msra.mxu0 %v7235_v7  ;;  %714 = vmatmul.bf16.vlgmr.msrb.gmra.mxu2 %v7004_v3  ;;  %v6659_v7 = vld [vmem:[#allocation2 + $0x234] sm:$0xf0]  ;;  %v7274_v61 = vor.u32 %v6654_v6, %v5648_v33 }
  0x53   :  { %9373 = vst [vmem:[#allocation74_spill] sm:$0xff] %v7245_v1  ;;  %776 = vmatpush.bf16.msra.mxu2 %v7240_v54  ;;  %740 = vmatmul.bf16.vlgmr.msrb.gmra.mxu0 %v7004_v3  ;;  %v5462_v39 = vld [vmem:[#allocation2 + $0x98] sm:$0xf]  ;;  %v7271_v41 = vor.u32 %v6659_v7, %v5654_v14  ;;  %v6647_v7 = vld [vmem:[#allocation2 + $0x1dc] sm:$0xf] }
  0x54   :  { %9374 = vst [vmem:[#allocation75_spill] sm:$0xff] %v7248_v55  ;;  %v6611_v51 = vld [vmem:[#allocation2 + $0xb4] sm:$0xf0] }
  0x55   :  { %760 = vmatpush.bf16.msrb.mxu3 %v7231_v60  ;;  %9375 = vst [vmem:[#allocation76_spill] sm:$0xff] %v7253_v32  ;;  %726 = vmatpush.bf16.msrb.mxu1 %v7237_v53  ;;  %v7267_v60 = vor.u32 %v6619_v10, %v5494_v52  ;;  %v7278_v5 = vor.u32 %v6611_v51, %v5462_v39  ;;  %v5430_v52 = vld [vmem:[#allocation2 + $0x58] sm:$0xf]  ;;  %v5624_v10 = vld [vmem:[#allocation2 + $0x1f8] sm:$0xf0] }
  0x56   :  { %9376 = vst [vmem:[#allocation77_spill] sm:$0xff] %v7257_v38  ;;  %803 = vmatpush.bf16.msra.mxu0 %v7248_v55  ;;  %v6603_v20 = vld [vmem:[#allocation2 + $0x74] sm:$0xf0]  ;;  %v7288_v6 = vor.u32 %v6647_v7, %v5624_v10  ;;  %v6639_v51 = vld [vmem:[#allocation2 + $0x19c] sm:$0xf] }
  0x57   :  { %9377 = vst [vmem:[#allocation78_spill] sm:$0xff] %v7261_v11  ;;  %777 = vmatpush.bf16.msra.mxu2 %v7257_v38  ;;  %v7285_v14 = vor.u32 %v6603_v20, %v5430_v52  ;;  %v5398_v33 = vld [vmem:[#allocation2 + $0x18] sm:$0xf]  ;;  %v6631_v20 = vld [vmem:[#allocation2 + $0x15c] sm:$0xf] }
  0x58   :  { %9378 = vst [vmem:[#allocation79_spill] sm:$0xff] %v7264_v9  ;;  %v6595_v39 = vld [vmem:[#allocation2 + $0x34] sm:$0xf0]  ;;  %v5560_v7 = vld [vmem:[#allocation2 + $0x178] sm:$0xf0] }
  0x59   :  { %750 = vmatpush.bf16.msra.mxu1 %v7245_v1  ;;  %761 = vmatpush.bf16.msrb.mxu3 %v7253_v32  ;;  %9379 = vst [vmem:[#allocation80_spill] sm:$0xff] %v7267_v60  ;;  %v7307_v10 = vor.u32 %v6631_v20, %v5560_v7  ;;  %v6607_v7 = vld [vmem:[#allocation2 + $0x9c] sm:$0xf] }
  0x5a   :  { %9380 = vst [vmem:[#allocation81_spill] sm:$0xff] %v7271_v41  ;;  %804 = vmatpush.bf16.msra.mxu0 %v7264_v9 }
  0x5b   :  { %9381 = vst [vmem:[#allocation82_spill] sm:$0xff] %v7274_v61  ;;  %778 = vmatpush.bf16.msra.mxu2 %v7271_v41 }
  0x5c   :  { %9382 = vst [vmem:[#allocation83_spill] sm:$0xff] %v7278_v5 }
  0x5d   :  { %751 = vmatpush.bf16.msra.mxu1 %v7261_v11  ;;  %762 = vmatpush.bf16.msrb.mxu3 %v7267_v60  ;;  %9383 = vst [vmem:[#allocation84_spill] sm:$0xff] %v7285_v14 }
  0x5e   :  { %892 = vmatpush.bf16.msrb.mxu0 %v7011_v12  ;;  %9384 = vst [vmem:[#allocation85_spill] sm:$0xff] %v7288_v6  ;;  %v5592_v12 = vld [vmem:[#allocation2 + $0x1b8] sm:$0xf0] }
  0x5f   :  { %866 = vmatpush.bf16.msrb.mxu2 %v7006_v4  ;;  %v7294_v4 = vor.u32 %v6595_v39, %v5398_v33  ;;  %v7297_v52 = vor.u32 %v6639_v51, %v5592_v12  ;;  %9387 = vst [vmem:[#allocation88_spill] sm:$0xff] %v7307_v10  ;;  %v6623_v12 = vld [vmem:[#allocation2 + $0x11c] sm:$0xf] }
  0x60   :  { %5696 = vmatmul.msk.bf16.vlgmr.msrb.gmra.mxu1 %vm573_vm1, %v7034_v35  ;;  %v5528_v33 = vld [vmem:[#allocation2 + $0x138] sm:$0xf0] }
  0x61   :  { %752 = vmatpush.bf16.msra.mxu1 %v7274_v61  ;;  %763 = vmatpush.bf16.msrb.mxu3 %v7278_v5  ;;  %9385 = vst [vmem:[#allocation86_spill] sm:$0xff] %v7294_v4  ;;  %v7314_v39 = vor.u32 %v6623_v12, %v5528_v33  ;;  %v6615_v51 = vld [vmem:[#allocation2 + $0xdc] sm:$0xf] }
  0x62   :  { %893 = vmatpush.bf16.msrb.mxu0 %v7025_v27  ;;  %9386 = vst [vmem:[#allocation87_spill] sm:$0xff] %v7297_v52  ;;  %5698 = vmatmul.msk.bf16.vlgmr.msra.gmra.mxu2 %vm573_vm1, %v7034_v35  ;;  %v6599_v33 = vld [vmem:[#allocation2 + $0x5c] sm:$0xf] }
  0x63   :  { %867 = vmatpush.bf16.msrb.mxu2 %v7013_v18  ;;  %5699 = vmatmul.msk.bf16.vlgmr.msra.gmra.mxu0 %vm573_vm1, %v7034_v35  ;;  %9388 = vst [vmem:[#allocation89_spill] sm:$0xff] %v7314_v39 }
  0x65   :  { %764 = vmatpush.bf16.msrb.mxu3 %v7285_v14  ;;  %784 = vmatpush.bf16.msrb.mxu1 %v7288_v6 }
  0x66   :  { %894 = vmatpush.bf16.msrb.mxu0 %v7042_v44 }
  0x67   :  { %868 = vmatpush.bf16.msrb.mxu2 %v7036_v36  ;;  %v5496_v36 = vld [vmem:[#allocation2 + $0xf8] sm:$0xf0] }
  0x68   :  { %v7320_v20 = vor.u32 %v6615_v51, %v5496_v36  ;;  %v5432_v36 = vld [vmem:[#allocation2 + $0x78] sm:$0xf0] }
  0x69   :  { %765 = vmatpush.bf16.msrb.mxu3 %v7294_v4  ;;  %785 = vmatpush.bf16.msrb.mxu1 %v7297_v52  ;;  %v7335_v51 = vor.u32 %v6599_v33, %v5432_v36  ;;  %v9394_v33 = vld [vmem:[#allocation39_spill] sm:$0xff]  ;;  %v9395_v36 = vld [vmem:[#allocation40_spill] sm:$0xff] }
  0x6a   :  { %895 = vmatpush.bf16.msrb.mxu0 %v7058_v57  ;;  %9389 = vst [vmem:[#allocation90_spill] sm:$0xff] %v7320_v20 }
  0x6b   :  { %869 = vmatpush.bf16.msrb.mxu2 %v7053_v49  ;;  %9391 = vst [vmem:[#allocation92_spill] sm:$0xff] %v7335_v51 }
  0x6c   :  { %766 = vmatmul.bf16.vlgmr.msrb.gmra.mxu3 %v7004_v3 }
  0x6d   :  { %884 = vmatpush.bf16.msra.mxu3 %v7020_v25  ;;  %786 = vmatpush.bf16.msrb.mxu1 %v7307_v10  ;;  %v5464_v25 = vld [vmem:[#allocation2 + $0xb8] sm:$0xf0] }
  0x6e   :  { %896 = vmatpush.bf16.msrb.mxu0 %v7075_v8  ;;  %v7329_v12 = vor.u32 %v6607_v7, %v5464_v25 }
  0x6f   :  { %870 = vmatpush.bf16.msrb.mxu2 %v7067_v62 }
  0x70   :  { %5697 = vmatmul.msk.bf16.vlgmr.msra.gmra.mxu1 %vm573_vm1, %v7034_v35  ;;  %9390 = vst [vmem:[#allocation91_spill] sm:$0xff] %v7329_v12 }
  0x71   :  { %885 = vmatpush.bf16.msra.mxu3 %v7029_v30  ;;  %787 = vmatpush.bf16.msrb.mxu1 %v7314_v39  ;;  %v9415_v30 = vld [vmem:[#allocation69_spill] sm:$0xff] }
  0x72   :  { %897 = vmatpush.bf16.msrb.mxu0 %v7091_v23 }
  0x73   :  { %871 = vmatpush.bf16.msrb.mxu2 %v7083_v15  ;;  %v9417_v15 = vld [vmem:[#allocation71_spill] sm:$0xff] }
  0x75   :  { %886 = vmatpush.bf16.msra.mxu3 %v7046_v45  ;;  %788 = vmatpush.bf16.msrb.mxu1 %v7320_v20  ;;  %v5400_v45 = vld [vmem:[#allocation2 + $0x38] sm:$0xf0] }
  0x76   :  { %898 = vmatpush.bf16.msrb.mxu0 %v7103_v43 }
  0x77   :  { %872 = vmatpush.bf16.msrb.mxu2 %v7097_v34  ;;  %v9414_v34 = vld [vmem:[#allocation64_spill] sm:$0xff] }
  0x79   :  { %918 = vmatpush.bf16.msrb.mxu3 %v7055_v50  ;;  %789 = vmatpush.bf16.msrb.mxu1 %v7329_v12  ;;  %v6591_v50 = vld [vmem:[#allocation2 + $0x1c] sm:$0xf] }
  0x7a   :  { %899 = vmatpush.bf16.msrb.mxu0 %v7115_v0  ;;  %v7343_v25 = vor.u32 %v6591_v50, %v5400_v45  ;;  %v9393_v50 = vld [vmem:[#allocation38_spill] sm:$0xff] }
  0x7b   :  { %873 = vmatpush.bf16.msrb.mxu2 %v7110_v56  ;;  %v9412_v56 = vld [vmem:[#allocation70_spill] sm:$0xff] }
  0x7c   :  { %9392 = vst [vmem:[#allocation93_spill] sm:$0xff] %v7343_v25 }
  0x7d   :  { %919 = vmatpush.bf16.msrb.mxu3 %v7069_v63  ;;  %790 = vmatpush.bf16.msrb.mxu1 %v7335_v51  ;;  %v9404_v63 = vld [vmem:[#allocation51_spill] sm:$0xff] }
  0x7e   :  { %962 = vmatpush.bf16.msra.mxu0 %v7163_v29 }
  0x7f   :  { %936 = vmatpush.bf16.msra.mxu2 %v7061_v58  ;;  %v9411_v58 = vld [vmem:[#allocation59_spill] sm:$0xff] }
  0x81   :  { %920 = vmatpush.bf16.msrb.mxu3 %v7085_v16  ;;  %791 = vmatpush.bf16.msrb.mxu1 %v7343_v25  ;;  %v857_v45 = vpop.permute.xlu0 %856  ;;  %v9402_v16 = vld [vmem:[#allocation52_spill] sm:$0xff] }
  0x82   :  { %963 = vmatpush.bf16.msra.mxu0 %v7177_v21 }
  0x83   :  { %937 = vmatpush.bf16.msra.mxu2 %v7072_v2  ;;  %v9410_v2 = vld [vmem:[#allocation61_spill] sm:$0xff] }
  0x84   :  { %792 = vmatmul.bf16.vlgmr.msrb.gmra.mxu1 %v7004_v3 }
  0x85   :  { %921 = vmatpush.bf16.msrb.mxu3 %v7099_v37  ;;  %910 = vmatpush.bf16.msra.mxu1 %v7023_v26  ;;  %v9401_v37 = vld [vmem:[#allocation46_spill] sm:$0xff] }
  0x86   :  { %964 = vmatpush.bf16.msra.mxu0 %v7192_v28 }
  0x87   :  { %938 = vmatpush.bf16.msra.mxu2 %v7088_v19 }
  0x89   :  { %922 = vmatpush.bf16.msrb.mxu3 %v7112_v59  ;;  %911 = vmatpush.bf16.msra.mxu1 %v7031_v31  ;;  %v7362_v3 = vpop.permute.xlu0 %858  ;;  %v9400_v59 = vld [vmem:[#allocation48_spill] sm:$0xff] }
  0x8a   :  { %5700 = vmatmul.msk.bf16.vlgmr.msra.gmra.mxu3 %vm573_vm1, %v7362_v3  ;;  %v7367_v7 = vsel %vm860_vm2, %v857_v45, %v7362_v3  ;;  %v9399_v45 = vld [vmem:[#allocation47_spill] sm:$0xff] }
  0x8b   :  { %874 = vmatmul.bf16.vlgmr.msrb.gmra.mxu2 %v7367_v7  ;;  %900 = vmatmul.bf16.vlgmr.msrb.gmra.mxu0 %v7367_v7 }
  0x8c   :  { %970 = vmatpush.bf16.msrb.mxu2 %v9394_v33  ;;  %996 = vmatpush.bf16.msrb.mxu0 %v9395_v36  ;;  %v9403_v33 = vld [vmem:[#allocation53_spill] sm:$0xff] }
  0x8d   :  { %923 = vmatpush.bf16.msrb.mxu3 %v7126_v17  ;;  %912 = vmatpush.bf16.msra.mxu1 %v7048_v46  ;;  %v9398_v17 = vld [vmem:[#allocation44_spill] sm:$0xff] }
  0x90   :  { %997 = vmatpush.bf16.msrb.mxu0 %v9398_v17 }
  0x91   :  { %924 = vmatpush.bf16.msrb.mxu3 %v7143_v48  ;;  %944 = vmatpush.bf16.msrb.mxu1 %v7093_v24  ;;  %v9397_v48 = vld [vmem:[#allocation43_spill] sm:$0xff] }
  0x92   :  { %971 = vmatpush.bf16.msrb.mxu2 %v9397_v48 }
  0x94   :  { %5701 = vmatmul.msk.bf16.vlgmr.msra.gmra.mxu1 %vm573_vm1, %v7362_v3  ;;  %998 = vmatpush.bf16.msrb.mxu0 %v9401_v37 }
  0x95   :  { %925 = vmatpush.bf16.msrb.mxu3 %v7160_v22  ;;  %945 = vmatpush.bf16.msrb.mxu1 %v7106_v47  ;;  %v9396_v22 = vld [vmem:[#allocation42_spill] sm:$0xff] }
  0x96   :  { %972 = vmatpush.bf16.msrb.mxu2 %v9400_v59  ;;  %v9407_v59 = vld [vmem:[#allocation57_spill] sm:$0xff] }
  0x98   :  { %999 = vmatpush.bf16.msrb.mxu0 %v9404_v63 }
  0x99   :  { %946 = vmatpush.bf16.msrb.mxu1 %v9393_v50  ;;  %988 = vmatpush.bf16.msra.mxu3 %v7204_v42  ;;  %v9405_v42 = vld [vmem:[#allocation56_spill] sm:$0xff] }
  0x9a   :  { %973 = vmatpush.bf16.msrb.mxu2 %v9403_v33  ;;  %926 = vmatmul.bf16.vlgmr.msrb.gmra.mxu3 %v7367_v7  ;;  %v9409_v33 = vld [vmem:[#allocation55_spill] sm:$0xff] }
  0x9b   :  { %5702 = vmatmul.msk.bf16.vlgmr.msra.gmra.mxu2 %vm573_vm1, %v7362_v3  ;;  %5703 = vmatmul.msk.bf16.vlgmr.msra.gmra.mxu0 %vm573_vm1, %v7362_v3 }
  0x9c   :  { %1000 = vmatpush.bf16.msrb.mxu0 %v9409_v33 }
  0x9d   :  { %947 = vmatpush.bf16.msrb.mxu1 %v9396_v22  ;;  %989 = vmatpush.bf16.msra.mxu3 %v7221_v40  ;;  %v7389_v48 = vpop.f32.mrf.mxu1  ;;  %v9406_v40 = vld [vmem:[#allocation63_spill] sm:$0xff] }
  0x9e   :  { %974 = vmatpush.bf16.msrb.mxu2 %v9407_v59  ;;  %v9413_v59 = vld [vmem:[#allocation65_spill] sm:$0xff] }
  0xa0   :  { %1001 = vmatpush.bf16.msrb.mxu0 %v9411_v58 }
  0xa1   :  { %948 = vmatpush.bf16.msrb.mxu1 %v9399_v45  ;;  %990 = vmatpush.bf16.msra.mxu3 %v7237_v53  ;;  %v9408_v53 = vld [vmem:[#allocation60_spill] sm:$0xff] }
  0xa2   :  { %975 = vmatpush.bf16.msrb.mxu2 %v9410_v2 }
  0xa3   :  { %v650_v19 = vpop.f32.mrf.mxu3 }
  0xa4   :  { %1002 = vmatpush.bf16.msrb.mxu0 %v9414_v34 }
  0xa5   :  { %949 = vmatpush.bf16.msrb.mxu1 %v9402_v16  ;;  %1022 = vmatpush.bf16.msrb.mxu3 %v9406_v40  ;;  %v626_v40 = vpop.f32.mrf.mxu1 }
  0xa6   :  { %976 = vmatpush.bf16.msrb.mxu2 %v9413_v59  ;;  %v9416_v40 = vld [vmem:[#allocation68_spill] sm:$0xff] }
  0xa8   :  { %1003 = vmatpush.bf16.msrb.mxu0 %v9416_v40 }
  0xa9   :  { %950 = vmatpush.bf16.msrb.mxu1 %v9405_v42  ;;  %1023 = vmatpush.bf16.msrb.mxu3 %v7218_v13  ;;  %v1365_v13 = vld [vmem:[%s9052_s0 + $0x10] sm:$0xff] }
  0xaa   :  { %977 = vmatpush.bf16.msrb.mxu2 %v9415_v30  ;;  %5704 = vmatmul.msk.bf16.vlgmr.msra.gmra.mxu3 %vm573_vm1, %v7362_v3 }
  0xab   :  { %v652_v2 = vpop.f32.mrf.mxu3  ;;  %1004 = vmatmul.bf16.vlgmr.msrb.gmra.mxu0 %v7367_v7 }
  0xac   :  { %1066 = vmatpush.bf16.msra.mxu0 %v9417_v15  ;;  %v6675_v2 = vld [vmem:[#allocation4 + $0x38] sm:$0xff] }
  0xad   :  { %951 = vmatpush.bf16.msrb.mxu1 %v9408_v53  ;;  %1024 = vmatpush.bf16.msrb.mxu3 %v9412_v56  ;;  %v7416_v56 = vpack.c.bf16 %v1365_v13, %v1365_v13 }
  0xae   :  { %1040 = vmatpush.bf16.msra.mxu2 %v7240_v54  ;;  %v6674_v54 = vld [vmem:[#allocation4 + $0x30] sm:$0xff] }
  0xaf   :  { %978 = vmatmul.bf16.vlgmr.msrb.gmra.mxu2 %v7367_v7  ;;  %1376 = vrot.lane.b32.xlu2 %v7416_v56, %s6944_s18 }
  0xb0   :  { %952 = vmatmul.bf16.vlgmr.msrb.gmra.mxu1 %v7367_v7  ;;  %v7422_v59 = vpop.f32.mrf.mxu0  ;;  %1067 = vmatpush.bf16.msra.mxu0 %v7248_v55 }
  0xb1   :  { %1014 = vmatpush.bf16.msra.mxu1 %v7245_v1  ;;  %1025 = vmatpush.bf16.msrb.mxu3 %v7253_v32 }
  0xb2   :  { %1041 = vmatpush.bf16.msra.mxu2 %v7257_v38  ;;  %1763 = vrot.lane.b32.xlu0 %v7416_v56, %s6945_s21 }
  0xb3   :  { %v7436_v13 = vpop.f32.mrf.mxu3 }
  0xb4   :  { %1068 = vmatpush.bf16.msra.mxu0 %v7264_v9 }
  0xb5   :  { %1015 = vmatpush.bf16.msra.mxu1 %v7261_v11  ;;  %1026 = vmatpush.bf16.msrb.mxu3 %v7267_v60  ;;  %v637_v60 = vpop.f32.mrf.mxu2 }
  0xb6   :  { %1042 = vmatpush.bf16.msra.mxu2 %v7271_v41  ;;  %v7441_v32 = vadd.f32 %v650_v19, %v637_v60  ;;  %v6672_v19 = vld [vmem:[#allocation4 + $0x20] sm:$0xff]  ;;  %v6671_v60 = vld [vmem:[#allocation4 + $0x18] sm:$0xff] }
  0xb7   :  { %1761 = vrot.lane.b32.xlu2 %v7034_v35, %s6945_s21 }
  0xb8   :  { %v613_v38 = vpop.f32.mrf.mxu0  ;;  %1337 = vmatpush.bf16.msrb.mxu0 %v6675_v2 }
  0xb9   :  { %1016 = vmatpush.bf16.msra.mxu1 %v7274_v61  ;;  %1027 = vmatpush.bf16.msrb.mxu3 %v7278_v5 }
  0xbb   :  { %v678_v5 = vpop.f32.mrf.mxu3  ;;  %5707 = vmatmul.msk.bf16.vlgmr.msra.gmra.mxu0 %vm573_vm1, %v7362_v3 }
  0xbc   :  { %1338 = vmatpush.bf16.msrb.mxu0 %v6674_v54  ;;  %v6683_v54 = vld [vmem:[#allocation4 + $0x78] sm:$0xff] }
  0xbd   :  { %1048 = vmatpush.bf16.msrb.mxu1 %v7288_v6  ;;  %1028 = vmatpush.bf16.msrb.mxu3 %v7285_v14  ;;  %v663_v30 = vpop.f32.mrf.mxu1  ;;  %v639_v41 = vpop.f32.mrf.mxu2 }
  0xbe   :  { %v6670_v41 = vld [vmem:[#allocation4 + $0x10] sm:$0xff]  ;;  %v677_v56 = vadd.f32 %v7436_v13, %v663_v30 }
  0xbf   :  { %5706 = vmatmul.msk.bf16.vlgmr.msra.gmra.mxu2 %vm573_vm1, %v7362_v3 }
  0xc0   :  { %5705 = vmatmul.msk.bf16.vlgmr.msra.gmra.mxu1 %vm573_vm1, %v7362_v3  ;;  %v6682_v3 = vld [vmem:[#allocation4 + $0x70] sm:$0xff] }
  0xc1   :  { %1049 = vmatpush.bf16.msrb.mxu1 %v7297_v52  ;;  %1029 = vmatpush.bf16.msrb.mxu3 %v7294_v4 }
  0xc4   :  { %1030 = vmatmul.bf16.vlgmr.msrb.gmra.mxu3 %v7367_v7 }
  0xc5   :  { %1050 = vmatpush.bf16.msrb.mxu1 %v7307_v10  ;;  %v6673_v10 = vld [vmem:[#allocation4 + $0x28] sm:$0xff]  ;;  %v665_v38 = vpop.f32.mrf.mxu1 }
  0xc6   :  { %1339 = vmatpush.bf16.msrb.mxu0 %v6673_v10  ;;  %v6669_v10 = vld [vmem:[#allocation4 + $0x8] sm:$0xff]  ;;  %v6668_v38 = vld [vmem:[#allocation4] sm:$0xff] }
  0xc9   :  { %1051 = vmatpush.bf16.msrb.mxu1 %v7314_v39 }
  0xca   :  { %1340 = vmatpush.bf16.msrb.mxu0 %v6672_v19  ;;  %v6681_v19 = vld [vmem:[#allocation4 + $0x68] sm:$0xff] }
  0xcd   :  { %1052 = vmatpush.bf16.msrb.mxu1 %v7320_v20  ;;  %v7455_v5 = vpop.f32.mrf.mxu1 }
  0xce   :  { %1341 = vmatpush.bf16.msrb.mxu0 %v6671_v60  ;;  %v6680_v60 = vld [vmem:[#allocation4 + $0x60] sm:$0xff] }
  0xcf   :  { %v7457_v2 = vpop.f32.mrf.mxu3 }
  0xd0   :  { %v7459_v4 = vpop.f32.mrf.mxu0 }
  0xd1   :  { %1053 = vmatpush.bf16.msrb.mxu1 %v7329_v12  ;;  %v9418_v12 = vld [vmem:[#allocation9_spill] sm:$0xff] }
  0xd2   :  { %1342 = vmatpush.bf16.msrb.mxu0 %v6670_v41 }
  0xd5   :  { %1054 = vmatpush.bf16.msrb.mxu1 %v7335_v51  ;;  %v704_v14 = vpop.f32.mrf.mxu1 }
  0xd6   :  { %1343 = vmatpush.bf16.msrb.mxu0 %v6669_v10  ;;  %v6678_v14 = vld [vmem:[#allocation4 + $0x50] sm:$0xff] }
  0xd8   :  { %v743_v51 = vpop.f32.mrf.mxu0 }
  0xd9   :  { %1055 = vmatpush.bf16.msrb.mxu1 %v7343_v25  ;;  %v715_v25 = vpop.f32.mrf.mxu2  ;;  %v6677_v51 = vld [vmem:[#allocation4 + $0x48] sm:$0xff] }
  0xda   :  { %1344 = vmatpush.bf16.msrb.mxu0 %v6668_v38 }
  0xdc   :  { %1056 = vmatmul.bf16.vlgmr.msrb.gmra.mxu1 %v7367_v7  ;;  %v691_v7 = vpop.f32.mrf.mxu3 }
  0xdd   :  { %1350 = vmatpush.bf16.msra.mxu1 %v6683_v54  ;;  %v6679_v54 = vld [vmem:[#allocation4 + $0x58] sm:$0xff]  ;;  %v728_v41 = vpop.f32.mrf.mxu1  ;;  %v6676_v7 = vld [vmem:[#allocation4 + $0x40] sm:$0xff] }
  0xde   :  { %1411 = vmatpush.bf16.msra.mxu0 %v9418_v12 }
  0xe0   :  { %v806_v10 = vpop.f32.mrf.mxu0 }
  0xe1   :  { %1351 = vmatpush.bf16.msra.mxu1 %v6682_v3  ;;  %v717_v3 = vpop.f32.mrf.mxu2 }
  0xe2   :  { %1412 = vmatpush.bf16.msra.mxu0 %v7025_v27  ;;  %v625_v3 = vadd.f32 %v7389_v48, %v7422_v59 }
  0xe5   :  { %1352 = vmatpush.bf16.msra.mxu1 %v6681_v19  ;;  %v730_v19 = vpop.f32.mrf.mxu1 }
  0xe6   :  { %1413 = vmatpush.bf16.msra.mxu0 %v7042_v44  ;;  %v810_v19 = vmax.f32 %v625_v3, %v677_v56  ;;  %v1373_v3 = vpop.permute.xlu1 %1372 }
  0xe8   :  { %v808_v35 = vpop.f32.mrf.mxu0 }
  0xe9   :  { %1353 = vmatpush.bf16.msra.mxu1 %v6680_v60  ;;  %v780_v38 = vpop.f32.mrf.mxu2 }
  0xea   :  { %1414 = vmatpush.bf16.msra.mxu0 %v7058_v57 }
  0xed   :  { %1354 = vmatpush.bf16.msra.mxu1 %v6679_v54  ;;  %v143_v54 = vld [vmem:[%s9054_s2] sm:$0x3]  ;;  %v754_v13 = vpop.f32.mrf.mxu1 }
  0xee   :  { %1415 = vmatpush.bf16.msra.mxu0 %v7075_v8  ;;  %v7475_v57 = vperm.slane %v143_v54, 0  ;;  %v755_v56 = vadd.f32 %v754_v13, %v7459_v4  ;;  %v1375_v4 = vpop.permute.xlu1 %1374 }
  0xef   :  { %v767_v60 = vpop.f32.mrf.mxu3  ;;  %v7494_v13 = vsel %vm1378_vm3, %v1373_v3, %v1375_v4 }
  0xf0   :  { %9419 = vst [vmem:[#allocation94_spill] sm:$0xff] %v7475_v57 }
  0xf1   :  { %1355 = vmatpush.bf16.msra.mxu1 %v6678_v14  ;;  %v729_v14 = vadd.f32 %v728_v41, %v715_v25  ;;  %v703_v41 = vadd.f32 %v7455_v5, %v7457_v2 }
  0xf2   :  { %1416 = vmatpush.bf16.msra.mxu0 %v7091_v23 }
  0xf5   :  { %1356 = vmatpush.bf16.msra.mxu1 %v6677_v51  ;;  %v781_v51 = vadd.f32 %v780_v38, %v767_v60  ;;  %v756_v48 = vpop.f32.mrf.mxu1 }
  0xf6   :  { %1417 = vmatpush.bf16.msra.mxu0 %v7103_v43  ;;  %v6687_v48 = vld [vmem:[#allocation4 + $0x98] sm:$0xff] }
  0xf7   :  { %v812_v30 = vmax.f32 %v729_v14, %v781_v51  ;;  %v769_v44 = vpop.f32.mrf.mxu3  ;;  %v7489_v14 = vperm.slane %v143_v54, 1  ;;  %v9429_v43 = vld [vmem:[#allocation35_spill] sm:$0xff] }
  0xf8   :  { %v6691_v44 = vld [vmem:[#allocation4 + $0xb8] sm:$0xff] }
  0xf9   :  { %1357 = vmatpush.bf16.msra.mxu1 %v6676_v7  ;;  %v782_v7 = vpop.f32.mrf.mxu2  ;;  %v814_v35 = vmax.f32 %v810_v19, %v812_v30  ;;  %9420 = vst [vmem:[#allocation95_spill] sm:$0xff] %v7489_v14  ;;  %1215 = vmatpush.bf16.msrb.mxu2 %v6691_v44  ;;  %v6690_v30 = vld [vmem:[#allocation4 + $0xb0] sm:$0xff] }
  0xfa   :  { %1418 = vmatpush.bf16.msra.mxu0 %v7115_v0  ;;  %v9428_v0 = vld [vmem:[#allocation88_spill] sm:$0xff] }
  0xfb   :  { %v816_v8 = vadd.f32 %v814_v35, %v7475_v57  ;;  %v6689_v35 = vld [vmem:[#allocation4 + $0xa8] sm:$0xff] }
  0xfd   :  { %1429 = vmatpush.bf16.msrb.mxu1 %v7023_v26  ;;  %v818_v59 = vmax.f32 %v816_v8, 0.0  ;;  %v811_v8 = vmax.f32 %v7441_v32, %v703_v41  ;;  %1216 = vmatpush.bf16.msrb.mxu2 %v6690_v30  ;;  %v6688_v32 = vld [vmem:[#allocation4 + $0xa0] sm:$0xff]  ;;  %v6697_v30 = vld [vmem:[#allocation4 + $0xe8] sm:$0xff] }
  0xff   :  { %v820_v25 = vpack.c.bf16 %v818_v59, %v818_v59 }
 0x101   :  { %1430 = vmatpush.bf16.msrb.mxu1 %v7031_v31  ;;  %1345 = vmatmul.bf16.vlgmr.msrb.gmra.mxu0 %v820_v25  ;;  %v793_v38 = vpop.f32.mrf.mxu1  ;;  %v6699_v25 = vld [vmem:[#allocation4 + $0xf8] sm:$0xff] }
 0x102   :  { %1481 = vmatpush.bf16.msrb.mxu0 %v7163_v29  ;;  %v807_v60 = vadd.f32 %v806_v10, %v793_v38  ;;  %1217 = vmatpush.bf16.msrb.mxu2 %v6689_v35  ;;  %v6686_v38 = vld [vmem:[#allocation4 + $0x90] sm:$0xff] }
 0x103   :  { %1228 = vmatpush.bf16.msra.mxu3 %v6699_v25 }
 0x104   :  { %v813_v51 = vmax.f32 %v755_v56, %v807_v60  ;;  %v6698_v56 = vld [vmem:[#allocation4 + $0xf0] sm:$0xff] }
 0x105   :  { %1431 = vmatpush.bf16.msrb.mxu1 %v7048_v46 }
 0x106   :  { %1482 = vmatpush.bf16.msrb.mxu0 %v7177_v21  ;;  %v815_v19 = vmax.f32 %v811_v8, %v813_v51  ;;  %1218 = vmatpush.bf16.msrb.mxu2 %v6688_v32  ;;  %v6695_v32 = vld [vmem:[#allocation4 + $0xd8] sm:$0xff] }
 0x107   :  { %1229 = vmatpush.bf16.msra.mxu3 %v6698_v56 }
 0x108   :  { %v817_v5 = vadd.f32 %v815_v19, %v7489_v14  ;;  %v7501_v59 = vpop.f32.mrf.mxu0  ;;  %v6685_v19 = vld [vmem:[#allocation4 + $0x88] sm:$0xff] }
 0x109   :  { %v795_v2 = vpop.f32.mrf.mxu1  ;;  %v1377_v44 = vpop.permute.xlu2 %1376 }
 0x10a   :  { %1483 = vmatpush.bf16.msrb.mxu0 %v7192_v28  ;;  %v819_v7 = vmax.f32 %v817_v5, 0.0  ;;  %1219 = vmatpush.bf16.msrb.mxu2 %v6687_v48  ;;  %v7514_v51 = vsel %vm1378_vm3, %v1375_v4, %v1377_v44  ;;  %v6684_v2 = vld [vmem:[#allocation4 + $0x80] sm:$0xff] }
 0x10b   :  { %1230 = vmatpush.bf16.msra.mxu3 %v6697_v30 }
 0x10c   :  { %v821_v10 = vpack.c.bf16 %v819_v7, %v819_v7  ;;  %v6696_v7 = vld [vmem:[#allocation4 + $0xe0] sm:$0xff] }
 0x10d   :  { %v7506_v41 = vpop.f32.mrf.mxu3 }
 0x10e   :  { %1358 = vmatmul.bf16.vlgmr.msra.gmra.mxu1 %v821_v10  ;;  %v7509_v60 = vpop.f32.mrf.mxu2  ;;  %1220 = vmatpush.bf16.msrb.mxu2 %v6686_v38  ;;  %v9421_v10 = vld [vmem:[#allocation8_spill] sm:$0xff]  ;;  %v6694_v38 = vld [vmem:[#allocation4 + $0xd0] sm:$0xff] }
 0x10f   :  { %1463 = vmatpush.bf16.msra.mxu1 %v7093_v24  ;;  %1231 = vmatpush.bf16.msra.mxu3 %v6696_v7  ;;  %v9423_v7 = vld [vmem:[#allocation11_spill] sm:$0xff] }
 0x110   :  { %v903_v8 = vpop.f32.mrf.mxu0 }
 0x111   :  { %1419 = vmatmul.bf16.vlgmr.msra.gmra.mxu0 %v7494_v13  ;;  %v7499_v54 = vpop.f32.mrf.mxu1  ;;  %v6693_v8 = vld [vmem:[#allocation4 + $0xc8] sm:$0xff] }
 0x112   :  { %1515 = vmatpush.bf16.msra.mxu0 %v9395_v36  ;;  %1221 = vmatpush.bf16.msrb.mxu2 %v6685_v19 }
 0x113   :  { %1464 = vmatpush.bf16.msra.mxu1 %v7106_v47  ;;  %1232 = vmatpush.bf16.msra.mxu3 %v6695_v32  ;;  %v9424_v32 = vld [vmem:[#allocation28_spill] sm:$0xff] }
 0x115   :  { %v890_v5 = vpop.f32.mrf.mxu3 }
 0x116   :  { %1516 = vmatpush.bf16.msra.mxu0 %v9398_v17  ;;  %v877_v35 = vpop.f32.mrf.mxu2  ;;  %1222 = vmatpush.bf16.msrb.mxu2 %v6684_v2  ;;  %v6692_v5 = vld [vmem:[#allocation4 + $0xc0] sm:$0xff] }
 0x117   :  { %1465 = vmatpush.bf16.msra.mxu1 %v9393_v50  ;;  %1233 = vmatpush.bf16.msra.mxu3 %v6694_v38  ;;  %v9425_v38 = vld [vmem:[#allocation14_spill] sm:$0xff] }
 0x118   :  { %v7522_v4 = vpop.f32.mrf.mxu0 }
 0x119   :  { %v916_v3 = vpop.f32.mrf.mxu1 }
 0x11a   :  { %1517 = vmatpush.bf16.msra.mxu0 %v9401_v37  ;;  %1385 = vmatpush.bf16.msra.mxu2 %v9421_v10  ;;  %v9422_v3 = vld [vmem:[#allocation16_spill] sm:$0xff] }
 0x11b   :  { %1466 = vmatpush.bf16.msra.mxu1 %v9396_v22  ;;  %1234 = vmatpush.bf16.msra.mxu3 %v6693_v8 }
 0x11d   :  { %v927_v25 = vpop.f32.mrf.mxu3 }
 0x11e   :  { %1518 = vmatpush.bf16.msra.mxu0 %v9404_v63  ;;  %5837 = vmatmul.msk.bf16.vlgmr.msrb.gmra.mxu1 %vm573_vm1, %v7514_v51  ;;  %v940_v56 = vpop.f32.mrf.mxu2 }
 0x11f   :  { %1467 = vmatpush.bf16.msra.mxu1 %v9399_v45  ;;  %1386 = vmatpush.bf16.msra.mxu2 %v7013_v18 }
 0x120   :  { %v968_v44 = vpop.f32.mrf.mxu0  ;;  %1235 = vmatpush.bf16.msra.mxu3 %v6692_v5  ;;  %v9427_v5 = vld [vmem:[#allocation18_spill] sm:$0xff] }
 0x121   :  { %5839 = vmatmul.msk.bf16.vlgmr.msrb.gmra.mxu0 %vm573_vm1, %v7514_v51 }
 0x122   :  { %1519 = vmatpush.bf16.msra.mxu0 %v9409_v33 }
 0x123   :  { %1468 = vmatpush.bf16.msra.mxu1 %v9402_v16  ;;  %1387 = vmatpush.bf16.msra.mxu2 %v9422_v3 }
 0x124   :  { %1403 = vmatpush.bf16.msrb.mxu3 %v9423_v7 }
 0x125   :  { %v929_v30 = vpop.f32.mrf.mxu3 }
 0x126   :  { %1520 = vmatpush.bf16.msra.mxu0 %v9411_v58  ;;  %v942_v2 = vpop.f32.mrf.mxu2  ;;  %v9426_v30 = vld [vmem:[#allocation32_spill] sm:$0xff] }
 0x127   :  { %1469 = vmatpush.bf16.msra.mxu1 %v9405_v42  ;;  %1388 = vmatpush.bf16.msra.mxu2 %v7053_v49 }
 0x128   :  { %v1005_v35 = vpop.f32.mrf.mxu0  ;;  %1404 = vmatpush.bf16.msrb.mxu3 %v9425_v38 }
 0x12a   :  { %1521 = vmatpush.bf16.msra.mxu0 %v9414_v34 }
 0x12b   :  { %1470 = vmatpush.bf16.msra.mxu1 %v9408_v53  ;;  %1389 = vmatpush.bf16.msra.mxu2 %v7067_v62 }
 0x12c   :  { %1405 = vmatpush.bf16.msrb.mxu3 %v9427_v5 }
 0x12d   :  { %v7528_v48 = vpop.f32.mrf.mxu1  ;;  %v992_v8 = vpop.f32.mrf.mxu3 }
 0x12e   :  { %1522 = vmatpush.bf16.msra.mxu0 %v9416_v40  ;;  %1471 = vmatmul.bf16.vlgmr.msra.gmra.mxu1 %v7494_v13 }
 0x12f   :  { %1533 = vmatpush.bf16.msrb.mxu1 %v7245_v1  ;;  %1390 = vmatpush.bf16.msra.mxu2 %v9424_v32 }
 0x130   :  { %v1007_v2 = vpop.f32.mrf.mxu0 }
 0x131   :  { %1523 = vmatmul.bf16.vlgmr.msra.gmra.mxu0 %v7494_v13 }
 0x132   :  { %1585 = vmatpush.bf16.msrb.mxu0 %v9417_v15 }
 0x133   :  { %1534 = vmatpush.bf16.msrb.mxu1 %v7261_v11  ;;  %1391 = vmatpush.bf16.msra.mxu2 %v9426_v30 }
 0x135   :  { %v955_v19 = vpop.f32.mrf.mxu1  ;;  %v994_v27 = vpop.f32.mrf.mxu3 }
 0x136   :  { %1586 = vmatpush.bf16.msrb.mxu0 %v7248_v55  ;;  %v979_v19 = vpop.f32.mrf.mxu2  ;;  %v889_v27 = vadd.f32 %v7506_v41, %v7509_v60 }
 0x137   :  { %1535 = vmatpush.bf16.msrb.mxu1 %v7274_v61  ;;  %1392 = vmatpush.bf16.msra.mxu2 %v9429_v43 }
 0x138   :  { %v1070_v2 = vpop.f32.mrf.mxu0 }
 0x13a   :  { %1587 = vmatpush.bf16.msrb.mxu0 %v7264_v9  ;;  %v9430_v9 = vld [vmem:[#allocation91_spill] sm:$0xff] }
 0x13b   :  { %1567 = vmatpush.bf16.msra.mxu1 %v7288_v6 }
 0x13d   :  { %v1018_v44 = vpop.f32.mrf.mxu1 }
 0x13e   :  { %1771 = vmatpush.bf16.msra.mxu0 %v9421_v10  ;;  %5841 = vmatmul.msk.bf16.vlgmr.msrb.gmra.mxu1 %vm573_vm1, %v7514_v51  ;;  %v981_v12 = vpop.f32.mrf.mxu2 }
 0x13f   :  { %1568 = vmatpush.bf16.msra.mxu1 %v7297_v52 }
 0x141   :  { %5843 = vmatmul.msk.bf16.vlgmr.msrb.gmra.mxu0 %vm573_vm1, %v7514_v51 }
 0x142   :  { %1772 = vmatpush.bf16.msra.mxu0 %v7013_v18 }
 0x143   :  { %1569 = vmatpush.bf16.msra.mxu1 %v9428_v0 }
 0x145   :  { %v1020_v23 = vpop.f32.mrf.mxu1 }
 0x146   :  { %1773 = vmatpush.bf16.msra.mxu0 %v9422_v3  ;;  %v941_v3 = vadd.f32 %v940_v56, %v927_v25  ;;  %v1044_v10 = vpop.f32.mrf.mxu2  ;;  %v993_v23 = vadd.f32 %v992_v8, %v979_v19  ;;  %v915_v25 = vadd.f32 %v7499_v54, %v7501_v59  ;;  %v1019_v56 = vadd.f32 %v1018_v44, %v1005_v35  ;;  %v9433_v8 = vld [vmem:[#allocation23_spill] sm:$0xff]  ;;  %v9435_v59 = vld [vmem:[#allocation21_spill] sm:$0xff]  ;;  %v9436_v35 = vld [vmem:[#allocation30_spill] sm:$0xff] }
 0x147   :  { %1570 = vmatpush.bf16.msra.mxu1 %v7314_v39  ;;  %v1031_v18 = vpop.f32.mrf.mxu3  ;;  %v9438_v44 = vld [vmem:[#allocation29_spill] sm:$0xff] }
 0x148   :  { %v1045_v12 = vadd.f32 %v1044_v10, %v1031_v18  ;;  %v1074_v55 = vmax.f32 %v889_v27, %v941_v3  ;;  %v9439_v19 = vld [vmem:[#allocation33_spill] sm:$0xff]  ;;  %v9441_v27 = vld [vmem:[#allocation36_spill] sm:$0xff] }
 0x14a   :  { %1774 = vmatpush.bf16.msra.mxu0 %v7053_v49  ;;  %v967_v49 = vadd.f32 %v7522_v4, %v7528_v48  ;;  %v1076_v15 = vmax.f32 %v993_v23, %v1045_v12  ;;  %v9432_v48 = vld [vmem:[#allocation93_spill] sm:$0xff]  ;;  %v9442_v23 = vld [vmem:[#allocation43_spill] sm:$0xff] }
 0x14b   :  { %1571 = vmatpush.bf16.msra.mxu1 %v7320_v20  ;;  %v1072_v20 = vpop.f32.mrf.mxu0  ;;  %v9443_v12 = vld [vmem:[#allocation41_spill] sm:$0xff] }
 0x14c   :  { %v1075_v41 = vmax.f32 %v915_v25, %v967_v49  ;;  %v9444_v25 = vld [vmem:[#allocation48_spill] sm:$0xff] }
 0x14e   :  { %1775 = vmatpush.bf16.msra.mxu0 %v7067_v62  ;;  %v9431_v62 = vld [vmem:[#allocation92_spill] sm:$0xff]  ;;  %v1046_v4 = vpop.f32.mrf.mxu2 }
 0x14f   :  { %1572 = vmatpush.bf16.msra.mxu1 %v9430_v9  ;;  %v1033_v10 = vpop.f32.mrf.mxu3 }
 0x150   :  { %v9449_v10 = vld [vmem:[#allocation62_spill] sm:$0xff] }
 0x152   :  { %1776 = vmatpush.bf16.msra.mxu0 %v9424_v32  ;;  %v1078_v32 = vmax.f32 %v1074_v55, %v1076_v15 }
 0x153   :  { %1573 = vmatpush.bf16.msra.mxu1 %v9431_v62 }
 0x154   :  { %v1080_v18 = vadd.f32 %v1078_v32, %v7475_v57  ;;  %v9437_v32 = vld [vmem:[#allocation25_spill] sm:$0xff]  ;;  %v9465_v57 = vld [vmem:[#allocation83_spill] sm:$0xff] }
 0x156   :  { %1777 = vmatpush.bf16.msra.mxu0 %v9426_v30  ;;  %v1082_v20 = vmax.f32 %v1080_v18, 0.0  ;;  %v9447_v18 = vld [vmem:[#allocation49_spill] sm:$0xff] }
 0x157   :  { %1574 = vmatpush.bf16.msra.mxu1 %v9432_v48 }
 0x158   :  { %v1084_v15 = vpack.c.bf16 %v1082_v20, %v1082_v20  ;;  %v9451_v20 = vld [vmem:[#allocation61_spill] sm:$0xff] }
 0x159   :  { %v1057_v40 = vpop.f32.mrf.mxu1 }
 0x15a   :  { %v1071_v9 = vadd.f32 %v1070_v2, %v1057_v40  ;;  %1778 = vmatpush.bf16.msra.mxu0 %v9429_v43  ;;  %1575 = vmatmul.bf16.vlgmr.msra.gmra.mxu1 %v7494_v13  ;;  %v9440_v2 = vld [vmem:[#allocation39_spill] sm:$0xff] }
 0x15b   :  { %1789 = vmatpush.bf16.msrb.mxu1 %v9423_v7  ;;  %1223 = vmatmul.bf16.vlgmr.msrb.gmra.mxu2 %v1084_v15  ;;  %v9454_v15 = vld [vmem:[#allocation72_spill] sm:$0xff] }
 0x15c   :  { %v1077_v60 = vmax.f32 %v1019_v56, %v1071_v9  ;;  %1455 = vmatpush.bf16.msrb.mxu2 %v9433_v8  ;;  %v9434_v9 = vld [vmem:[#allocation26_spill] sm:$0xff]  ;;  %v9445_v56 = vld [vmem:[#allocation45_spill] sm:$0xff] }
 0x15e   :  { %v1079_v3 = vmax.f32 %v1075_v41, %v1077_v60  ;;  %1841 = vmatpush.bf16.msrb.mxu0 %v9433_v8  ;;  %v9446_v41 = vld [vmem:[#allocation53_spill] sm:$0xff] }
 0x15f   :  { %1790 = vmatpush.bf16.msrb.mxu1 %v9425_v38  ;;  %v9448_v60 = vld [vmem:[#allocation57_spill] sm:$0xff] }
 0x160   :  { %v1081_v54 = vadd.f32 %v1079_v3, %v7489_v14  ;;  %1456 = vmatpush.bf16.msrb.mxu2 %v9434_v9  ;;  %v9452_v3 = vld [vmem:[#allocation67_spill] sm:$0xff] }
 0x161   :  { %v1059_v49 = vpop.f32.mrf.mxu1 }
 0x162   :  { %v1083_v55 = vmax.f32 %v1081_v54, 0.0  ;;  %1842 = vmatpush.bf16.msrb.mxu0 %v9434_v9  ;;  %v9453_v54 = vld [vmem:[#allocation65_spill] sm:$0xff] }
 0x163   :  { %1791 = vmatpush.bf16.msrb.mxu1 %v9427_v5 }
 0x164   :  { %v1085_v40 = vpack.c.bf16 %v1083_v55, %v1083_v55  ;;  %1457 = vmatpush.bf16.msrb.mxu2 %v9436_v35  ;;  %v9455_v55 = vld [vmem:[#allocation63_spill] sm:$0xff] }
 0x166   :  { %1236 = vmatmul.bf16.vlgmr.msra.gmra.mxu3 %v1085_v40  ;;  %1843 = vmatpush.bf16.msrb.mxu0 %v9436_v35  ;;  %v9456_v40 = vld [vmem:[#allocation69_spill] sm:$0xff]  ;;  %v6715_v35 = vld [vmem:[#allocation4 + $0x178] sm:$0xff] }
 0x167   :  { %1437 = vmatpush.bf16.msra.mxu3 %v9435_v59  ;;  %1815 = vmatpush.bf16.msra.mxu1 %v7023_v26 }
 0x16b   :  { %1438 = vmatpush.bf16.msra.mxu3 %v9437_v32  ;;  %1816 = vmatpush.bf16.msra.mxu1 %v7031_v31 }
 0x16c   :  { %1393 = vmatmul.bf16.vlgmr.msra.gmra.mxu2 %v7494_v13 }
 0x16d   :  { %1489 = vmatpush.bf16.msra.mxu2 %v9440_v2 }
 0x16f   :  { %1439 = vmatpush.bf16.msra.mxu3 %v9438_v44  ;;  %1817 = vmatpush.bf16.msra.mxu1 %v7048_v46 }
 0x171   :  { %1490 = vmatpush.bf16.msra.mxu2 %v9442_v23 }
 0x173   :  { %1440 = vmatpush.bf16.msra.mxu3 %v9439_v19 }
 0x175   :  { %1491 = vmatpush.bf16.msra.mxu2 %v9444_v25  ;;  %v9462_v25 = vld [vmem:[#allocation81_spill] sm:$0xff] }
 0x176   :  { %5836 = vmatmul.msk.bf16.vlgmr.msrb.gmra.mxu3 %vm573_vm1, %v7514_v51 }
 0x177   :  { %1441 = vmatpush.bf16.msra.mxu3 %v9441_v27 }
 0x179   :  { %1492 = vmatpush.bf16.msra.mxu2 %v9446_v41  ;;  %v9458_v41 = vld [vmem:[#allocation66_spill] sm:$0xff] }
 0x17b   :  { %1442 = vmatpush.bf16.msra.mxu3 %v9443_v12 }
 0x17c   :  { %5838 = vmatmul.msk.bf16.vlgmr.msrb.gmra.mxu2 %vm573_vm1, %v7514_v51 }
 0x17d   :  { %1493 = vmatpush.bf16.msra.mxu2 %v9448_v60  ;;  %v9457_v60 = vld [vmem:[#allocation73_spill] sm:$0xff] }
 0x17e   :  { %v7611_v4 = vpop.f32.mrf.mxu0 }
 0x17f   :  { %1443 = vmatpush.bf16.msra.mxu3 %v9445_v56  ;;  %9450 = vst [vmem:[#allocation96_spill] sm:$0xff] %v7611_v4  ;;  %v9459_v4 = vld [vmem:[#allocation77_spill] sm:$0xff] }
 0x181   :  { %1494 = vmatpush.bf16.msra.mxu2 %v9451_v20  ;;  %v9460_v20 = vld [vmem:[#allocation70_spill] sm:$0xff] }
 0x183   :  { %1444 = vmatpush.bf16.msra.mxu3 %v9447_v18 }
 0x185   :  { %1495 = vmatpush.bf16.msra.mxu2 %v9453_v54 }
 0x186   :  { %1445 = vmatmul.bf16.vlgmr.msra.gmra.mxu3 %v7494_v13  ;;  %v1348_v49 = vpop.f32.mrf.mxu0 }
 0x187   :  { %1507 = vmatpush.bf16.msrb.mxu3 %v9449_v10 }
 0x189   :  { %1496 = vmatpush.bf16.msra.mxu2 %v9456_v40  ;;  %v9463_v40 = vld [vmem:[#allocation76_spill] sm:$0xff] }
 0x18b   :  { %1508 = vmatpush.bf16.msrb.mxu3 %v9452_v3  ;;  %v7629_v49 = vpop.f32.mrf.mxu1 }
 0x18c   :  { %1497 = vmatmul.bf16.vlgmr.msra.gmra.mxu2 %v7494_v13  ;;  %9461 = vst [vmem:[#allocation97_spill] sm:$0xff] %v7629_v49  ;;  %v7642_v49 = vpop.permute.xlu0 %1763 }
 0x18d   :  { %1559 = vmatpush.bf16.msrb.mxu2 %v9457_v60  ;;  %v9464_v60 = vld [vmem:[#allocation80_spill] sm:$0xff]  ;;  %5908 = vmatmul.msk.bf16.vlgmr.msrb.gmra.mxu1 %vm573_vm1, %v7642_v49 }
 0x18e   :  { %v7627_v54 = vpop.f32.mrf.mxu0  ;;  %1849 = vmatpush.bf16.msrb.mxu1 %v7093_v24 }
 0x18f   :  { %1509 = vmatpush.bf16.msrb.mxu3 %v9454_v15 }
 0x191   :  { %1560 = vmatpush.bf16.msrb.mxu2 %v9459_v4  ;;  %v9466_v4 = vld [vmem:[#allocation84_spill] sm:$0xff] }
 0x192   :  { %1850 = vmatpush.bf16.msrb.mxu1 %v7106_v47 }
 0x193   :  { %1541 = vmatpush.bf16.msra.mxu3 %v9455_v55  ;;  %v1361_v2 = vpop.f32.mrf.mxu1 }
 0x194   :  { %v6714_v2 = vld [vmem:[#allocation4 + $0x170] sm:$0xff] }
 0x195   :  { %1561 = vmatpush.bf16.msrb.mxu2 %v9462_v25  ;;  %v9467_v25 = vld [vmem:[#allocation86_spill] sm:$0xff] }
 0x196   :  { %5840 = vmatmul.msk.bf16.vlgmr.msrb.gmra.mxu3 %vm573_vm1, %v7514_v51  ;;  %v1422_v23 = vpop.f32.mrf.mxu0  ;;  %1851 = vmatpush.bf16.msrb.mxu1 %v9393_v50 }
 0x197   :  { %1542 = vmatpush.bf16.msra.mxu3 %v9458_v41 }
 0x19a   :  { %1852 = vmatpush.bf16.msrb.mxu1 %v9396_v22 }
 0x19b   :  { %1543 = vmatpush.bf16.msra.mxu3 %v9460_v20  ;;  %v7638_v9 = vpop.f32.mrf.mxu1 }
 0x19c   :  { %5842 = vmatmul.msk.bf16.vlgmr.msrb.gmra.mxu2 %vm573_vm1, %v7514_v51  ;;  %v6713_v51 = vld [vmem:[#allocation4 + $0x168] sm:$0xff] }
 0x19d   :  { %5909 = vmatmul.msk.bf16.vlgmr.msra.gmra.mxu1 %vm573_vm1, %v7642_v49 }
 0x19e   :  { %v7640_v8 = vpop.f32.mrf.mxu0  ;;  %1853 = vmatpush.bf16.msrb.mxu1 %v9399_v45 }
 0x19f   :  { %1544 = vmatpush.bf16.msra.mxu3 %v9463_v40 }
 0x1a2   :  { %1854 = vmatpush.bf16.msrb.mxu1 %v9402_v16 }
 0x1a3   :  { %1545 = vmatpush.bf16.msra.mxu3 %v9464_v60  ;;  %v1435_v23 = vpop.f32.mrf.mxu1 }
 0x1a4   :  { %v6708_v23 = vld [vmem:[#allocation4 + $0x140] sm:$0xff] }
 0x1a6   :  { %1855 = vmatpush.bf16.msrb.mxu1 %v9405_v42 }
 0x1a7   :  { %1546 = vmatpush.bf16.msra.mxu3 %v9465_v57  ;;  %v1762_v57 = vpop.permute.xlu2 %1761 }
 0x1a8   :  { %v7651_v60 = vsel %vm1765_vm4, %v1762_v57, %v7642_v49  ;;  %v6710_v57 = vld [vmem:[#allocation4 + $0x150] sm:$0xff] }
 0x1a9   :  { %1779 = vmatmul.bf16.vlgmr.msra.gmra.mxu0 %v7651_v60 }
 0x1aa   :  { %1867 = vmatpush.bf16.msra.mxu0 %v7163_v29  ;;  %1856 = vmatpush.bf16.msrb.mxu1 %v9408_v53 }
 0x1ab   :  { %1547 = vmatpush.bf16.msra.mxu3 %v9466_v4  ;;  %v1487_v4 = vpop.f32.mrf.mxu0 }
 0x1ad   :  { %1857 = vmatmul.bf16.vlgmr.msrb.gmra.mxu1 %v7651_v60 }
 0x1ae   :  { %1868 = vmatpush.bf16.msra.mxu0 %v7177_v21  ;;  %1919 = vmatpush.bf16.msra.mxu1 %v7245_v1 }
 0x1af   :  { %1548 = vmatpush.bf16.msra.mxu3 %v9467_v25  ;;  %v6712_v25 = vld [vmem:[#allocation4 + $0x160] sm:$0xff] }
 0x1b2   :  { %1549 = vmatmul.bf16.vlgmr.msra.gmra.mxu3 %v7494_v13  ;;  %v6711_v13 = vld [vmem:[#allocation4 + $0x158] sm:$0xff]  ;;  %1869 = vmatpush.bf16.msra.mxu0 %v7192_v28 }
 0x1b3   :  { %1747 = vmatpush.bf16.msrb.mxu3 %v6715_v35  ;;  %v1472_v35 = vpop.f32.mrf.mxu1  ;;  %v1524_v4 = vpop.f32.mrf.mxu0  ;;  %1920 = vmatpush.bf16.msra.mxu1 %v7261_v11 }
 0x1b7   :  { %1748 = vmatpush.bf16.msrb.mxu3 %v6714_v2  ;;  %v6709_v2 = vld [vmem:[#allocation4 + $0x148] sm:$0xff]  ;;  %1921 = vmatpush.bf16.msra.mxu1 %v7274_v61 }
 0x1b9   :  { %5910 = vmatmul.msk.bf16.vlgmr.msrb.gmra.mxu0 %vm573_vm1, %v7642_v49 }
 0x1ba   :  { %1901 = vmatpush.bf16.msrb.mxu0 %v9395_v36 }
 0x1bb   :  { %1749 = vmatpush.bf16.msrb.mxu3 %v6713_v51  ;;  %v1474_v51 = vpop.f32.mrf.mxu1  ;;  %1953 = vmatpush.bf16.msrb.mxu1 %v7288_v6 }
 0x1bd   :  { %5913 = vmatmul.msk.bf16.vlgmr.msra.gmra.mxu1 %vm573_vm1, %v7642_v49 }
 0x1be   :  { %1902 = vmatpush.bf16.msrb.mxu0 %v9398_v17 }
 0x1bf   :  { %1750 = vmatpush.bf16.msrb.mxu3 %v6712_v25  ;;  %v1526_v25 = vpop.f32.mrf.mxu0  ;;  %1954 = vmatpush.bf16.msrb.mxu1 %v7297_v52 }
 0x1c0   :  { %v1434_v25 = vadd.f32 %v7638_v9, %v7627_v54  ;;  %v9468_v9 = vld [vmem:[#allocation68_spill] sm:$0xff]  ;;  %v9469_v54 = vld [vmem:[#allocation71_spill] sm:$0xff] }
 0x1c2   :  { %1903 = vmatpush.bf16.msrb.mxu0 %v9401_v37 }
 0x1c3   :  { %1751 = vmatpush.bf16.msrb.mxu3 %v6711_v13  ;;  %v1537_v13 = vpop.f32.mrf.mxu1  ;;  %1955 = vmatpush.bf16.msrb.mxu1 %v9428_v0 }
 0x1c6   :  { %1904 = vmatpush.bf16.msrb.mxu0 %v9404_v63 }
 0x1c7   :  { %1752 = vmatpush.bf16.msrb.mxu3 %v6710_v57  ;;  %v1589_v57 = vpop.f32.mrf.mxu0  ;;  %1956 = vmatpush.bf16.msrb.mxu1 %v7314_v39 }
 0x1c9   :  { %5911 = vmatmul.msk.bf16.vlgmr.msra.gmra.mxu0 %vm573_vm1, %v7642_v49 }
 0x1ca   :  { %1905 = vmatpush.bf16.msrb.mxu0 %v9409_v33 }
 0x1cb   :  { %1753 = vmatpush.bf16.msrb.mxu3 %v6709_v2  ;;  %v1539_v2 = vpop.f32.mrf.mxu1 }
 0x1cc   :  { %v1538_v2 = vadd.f32 %v1537_v13, %v1524_v4  ;;  %v9470_v4 = vld [vmem:[#allocation90_spill] sm:$0xff] }
 0x1cd   :  { %1957 = vmatpush.bf16.msrb.mxu1 %v9470_v4  ;;  %v9474_v4 = vld [vmem:[#allocation8_spill] sm:$0xff] }
 0x1ce   :  { %1906 = vmatpush.bf16.msrb.mxu0 %v9411_v58 }
 0x1cf   :  { %1754 = vmatpush.bf16.msrb.mxu3 %v6708_v23  ;;  %v1591_v51 = vpop.f32.mrf.mxu0  ;;  %v1486_v23 = vadd.f32 %v7640_v8, %v1472_v35  ;;  %v6707_v35 = vld [vmem:[#allocation4 + $0x138] sm:$0xff] }
 0x1d0   :  { %1734 = vmatpush.bf16.msra.mxu2 %v6707_v35  ;;  %v6704_v35 = vld [vmem:[#allocation4 + $0x120] sm:$0xff] }
 0x1d2   :  { %1907 = vmatpush.bf16.msrb.mxu0 %v9414_v34 }
 0x1d3   :  { %1823 = vmatpush.bf16.msra.mxu3 %v9435_v59 }
 0x1d6   :  { %1908 = vmatpush.bf16.msrb.mxu0 %v9468_v9 }
 0x1d7   :  { %1824 = vmatpush.bf16.msra.mxu3 %v9437_v32  ;;  %v1576_v51 = vpop.f32.mrf.mxu1 }
 0x1d9   :  { %1909 = vmatmul.bf16.vlgmr.msrb.gmra.mxu0 %v7651_v60 }
 0x1da   :  { %1971 = vmatpush.bf16.msra.mxu0 %v9469_v54  ;;  %v6705_v54 = vld [vmem:[#allocation4 + $0x128] sm:$0xff] }
 0x1db   :  { %1825 = vmatpush.bf16.msra.mxu3 %v9438_v44 }
 0x1df   :  { %1826 = vmatpush.bf16.msra.mxu3 %v9439_v19  ;;  %v1594_v19 = vmax.f32 %v1434_v25, %v1486_v23  ;;  %v1224_v25 = vpop.f32.mrf.mxu2  ;;  %v1578_v23 = vpop.f32.mrf.mxu1 }
 0x1e0   :  { %v9476_v23 = vld [vmem:[#allocation16_spill] sm:$0xff] }
 0x1e3   :  { %1827 = vmatpush.bf16.msra.mxu3 %v9441_v27  ;;  %v1590_v27 = vadd.f32 %v1589_v57, %v1576_v51  ;;  %v9471_v57 = vld [vmem:[#allocation75_spill] sm:$0xff]  ;;  %v6706_v51 = vld [vmem:[#allocation4 + $0x130] sm:$0xff] }
 0x1e4   :  { %1972 = vmatpush.bf16.msra.mxu0 %v9471_v57  ;;  %1735 = vmatpush.bf16.msra.mxu2 %v6706_v51  ;;  %v6702_v51 = vld [vmem:[#allocation4 + $0x110] sm:$0xff] }
 0x1e5   :  { %v1596_v8 = vmax.f32 %v1538_v2, %v1590_v27  ;;  %v9472_v27 = vld [vmem:[#allocation91_spill] sm:$0xff] }
 0x1e6   :  { %1958 = vmatpush.bf16.msrb.mxu1 %v9472_v27 }
 0x1e7   :  { %1828 = vmatpush.bf16.msra.mxu3 %v9443_v12  ;;  %v1598_v12 = vmax.f32 %v1594_v19, %v1596_v8  ;;  %v9473_v19 = vld [vmem:[#allocation79_spill] sm:$0xff] }
 0x1e8   :  { %1973 = vmatpush.bf16.msra.mxu0 %v9473_v19  ;;  %1736 = vmatpush.bf16.msra.mxu2 %v6705_v54 }
 0x1e9   :  { %v1600_v13 = vadd.f32 %v1598_v12, %v7489_v14  ;;  %v1237_v8 = vpop.f32.mrf.mxu3  ;;  %v1226_v12 = vpop.f32.mrf.mxu2  ;;  %v9488_v14 = vld [vmem:[#allocation83_spill] sm:$0xff] }
 0x1ea   :  { %1959 = vmatpush.bf16.msrb.mxu1 %v9431_v62  ;;  %v6701_v12 = vld [vmem:[#allocation4 + $0x108] sm:$0xff] }
 0x1eb   :  { %1829 = vmatpush.bf16.msra.mxu3 %v9445_v56  ;;  %v1602_v56 = vmax.f32 %v1600_v13, 0.0  ;;  %v9475_v13 = vld [vmem:[#allocation10_spill] sm:$0xff]  ;;  %5915 = vmatmul.msk.bf16.vlgmr.msra.gmra.mxu0 %vm573_vm1, %v7642_v49 }
 0x1ec   :  { %2169 = vmatpush.bf16.msrb.mxu0 %v9474_v4  ;;  %1737 = vmatpush.bf16.msra.mxu2 %v6704_v35  ;;  %v9478_v35 = vld [vmem:[#allocation24_spill] sm:$0xff] }
 0x1ed   :  { %v1604_v2 = vpack.c.bf16 %v1602_v56, %v1602_v56 }
 0x1ee   :  { %1960 = vmatpush.bf16.msrb.mxu1 %v9432_v48  ;;  %v9497_v48 = vld [vmem:[#allocation39_spill] sm:$0xff] }
 0x1ef   :  { %1830 = vmatpush.bf16.msra.mxu3 %v9447_v18  ;;  %v7706_v18 = vadd.f32 %v1237_v8, %v1224_v25  ;;  %v6703_v25 = vld [vmem:[#allocation4 + $0x118] sm:$0xff] }
 0x1f0   :  { %1755 = vmatmul.bf16.vlgmr.msrb.gmra.mxu3 %v1604_v2  ;;  %2170 = vmatpush.bf16.msrb.mxu0 %v9475_v13  ;;  %v9477_v2 = vld [vmem:[#allocation20_spill] sm:$0xff] }
 0x1f1   :  { %v1239_v56 = vpop.f32.mrf.mxu3  ;;  %1961 = vmatmul.bf16.vlgmr.msrb.gmra.mxu1 %v7651_v60  ;;  %1738 = vmatpush.bf16.msra.mxu2 %v6703_v25  ;;  %v1394_v54 = vpop.f32.mrf.mxu2  ;;  %v6700_v25 = vld [vmem:[#allocation4 + $0x100] sm:$0xff] }
 0x1f2   :  { %2187 = vmatpush.bf16.msra.mxu1 %v9423_v7 }
 0x1f3   :  { %1893 = vmatpush.bf16.msrb.mxu3 %v9449_v10  ;;  %v9484_v10 = vld [vmem:[#allocation26_spill] sm:$0xff] }
 0x1f4   :  { %2171 = vmatpush.bf16.msrb.mxu0 %v9476_v23 }
 0x1f5   :  { %1739 = vmatpush.bf16.msra.mxu2 %v6702_v51  ;;  %v9480_v51 = vld [vmem:[#allocation9_spill] sm:$0xff] }
 0x1f6   :  { %2188 = vmatpush.bf16.msra.mxu1 %v9425_v38 }
 0x1f7   :  { %1894 = vmatpush.bf16.msrb.mxu3 %v9452_v3 }
 0x1f8   :  { %2172 = vmatpush.bf16.msrb.mxu0 %v9477_v2 }
 0x1f9   :  { %v1407_v8 = vpop.f32.mrf.mxu3  ;;  %1740 = vmatpush.bf16.msra.mxu2 %v6701_v12  ;;  %v1396_v56 = vpop.f32.mrf.mxu2 }
 0x1fa   :  { %2189 = vmatpush.bf16.msra.mxu1 %v9427_v5  ;;  %v2149_v56 = vld [vmem:[%s9052_s0 + $0x18] sm:$0xff] }
 0x1fb   :  { %1895 = vmatpush.bf16.msrb.mxu3 %v9454_v15  ;;  %v9479_v15 = vld [vmem:[#allocation28_spill] sm:$0xff] }
 0x1fc   :  { %2173 = vmatpush.bf16.msrb.mxu0 %v9478_v35 }
 0x1fd   :  { %1741 = vmatpush.bf16.msra.mxu2 %v6700_v25  ;;  %v9482_v25 = vld [vmem:[#allocation23_spill] sm:$0xff] }
 0x1fe   :  { %2213 = vmatpush.bf16.msrb.mxu1 %v7023_v26  ;;  %v9493_v26 = vld [vmem:[#allocation34_spill] sm:$0xff] }
 0x200   :  { %1831 = vmatmul.bf16.vlgmr.msra.gmra.mxu3 %v7651_v60  ;;  %2174 = vmatpush.bf16.msrb.mxu0 %v9479_v15  ;;  %v9489_v15 = vld [vmem:[#allocation27_spill] sm:$0xff] }
 0x201   :  { %1927 = vmatpush.bf16.msra.mxu3 %v9455_v55  ;;  %1797 = vmatpush.bf16.msrb.mxu2 %v9480_v51  ;;  %v1409_v3 = vpop.f32.mrf.mxu3  ;;  %v9481_v55 = vld [vmem:[#allocation13_spill] sm:$0xff]  ;;  %v1459_v12 = vpop.f32.mrf.mxu2 }
 0x202   :  { %2214 = vmatpush.bf16.msrb.mxu1 %v7031_v31  ;;  %v9483_v3 = vld [vmem:[#allocation17_spill] sm:$0xff] }
 0x204   :  { %2175 = vmatpush.bf16.msrb.mxu0 %v9426_v30  ;;  %v9485_v30 = vld [vmem:[#allocation80_spill] sm:$0xff] }
 0x205   :  { %1928 = vmatpush.bf16.msra.mxu3 %v9458_v41  ;;  %1798 = vmatpush.bf16.msrb.mxu2 %v9481_v55  ;;  %v7738_v41 = vpack.c.bf16 %v2149_v56, %v2149_v56 }
 0x206   :  { %2215 = vmatpush.bf16.msrb.mxu1 %v7048_v46 }
 0x207   :  { %2160 = vrot.lane.b32.xlu0 %v7738_v41, %s6939_s10 }
 0x208   :  { %2176 = vmatpush.bf16.msrb.mxu0 %v9429_v43  ;;  %v9486_v43 = vld [vmem:[#allocation22_spill] sm:$0xff] }
 0x209   :  { %1929 = vmatpush.bf16.msra.mxu3 %v9460_v20  ;;  %1799 = vmatpush.bf16.msrb.mxu2 %v9483_v3  ;;  %v1446_v20 = vpop.f32.mrf.mxu3  ;;  %v1461_v56 = vpop.f32.mrf.mxu2 }
 0x20a   :  { %v9492_v56 = vld [vmem:[#allocation86_spill] sm:$0xff]  ;;  %v1793_v13 = vpop.f32.mrf.mxu1 }
 0x20c   :  { %2239 = vmatpush.bf16.msra.mxu0 %v9482_v25  ;;  %v9487_v25 = vld [vmem:[#allocation30_spill] sm:$0xff] }
 0x20d   :  { %1930 = vmatpush.bf16.msra.mxu3 %v9463_v40  ;;  %1800 = vmatpush.bf16.msrb.mxu2 %v9486_v43  ;;  %v2147_v40 = vld [vmem:[%s9052_s0 + $0x8] sm:$0xff] }
 0x20e   :  { %v2150_v46 = vpack.c.bf16 %v2147_v40, %v2147_v40 }
 0x210   :  { %5912 = vmatmul.msk.bf16.vlgmr.msrb.gmra.mxu3 %vm573_vm1, %v7642_v49  ;;  %2240 = vmatpush.bf16.msra.mxu0 %v9484_v10  ;;  %v9490_v10 = vld [vmem:[#allocation84_spill] sm:$0xff] }
 0x211   :  { %1931 = vmatpush.bf16.msra.mxu3 %v9485_v30  ;;  %1801 = vmatpush.bf16.msrb.mxu2 %v9489_v15  ;;  %v1448_v31 = vpop.f32.mrf.mxu3  ;;  %v9491_v30 = vld [vmem:[#allocation31_spill] sm:$0xff]  ;;  %v1498_v35 = vpop.f32.mrf.mxu2  ;;  %v1408_v15 = vadd.f32 %v1407_v8, %v1394_v54 }
 0x212   :  { %2156 = vrot.lane.b32.xlu1 %v2150_v46, %s6939_s10  ;;  %v2148_v31 = vld [vmem:[%s9052_s0 + $0x10] sm:$0xff] }
 0x213   :  { %v7766_v46 = vpack.c.bf16 %v2148_v31, %v2148_v31 }
 0x214   :  { %2241 = vmatpush.bf16.msra.mxu0 %v9487_v25  ;;  %v9494_v25 = vld [vmem:[#allocation37_spill] sm:$0xff] }
 0x215   :  { %1932 = vmatpush.bf16.msra.mxu3 %v9488_v14  ;;  %1802 = vmatpush.bf16.msrb.mxu2 %v9491_v30  ;;  %9495 = vst [vmem:[#allocation98_spill] sm:$0xff] %v7766_v46  ;;  %v1460_v30 = vadd.f32 %v1459_v12, %v1446_v20  ;;  %v9498_v20 = vld [vmem:[#allocation43_spill] sm:$0xff] }
 0x216   :  { %2158 = vrot.lane.b32.xlu2 %v7766_v46, %s6939_s10  ;;  %s6948_s10 = smov 120  }
 0x217   :  { %v1593_v3 = vmax.f32 %v1408_v15, %v1460_v30  ;;  %v9500_v30 = vld [vmem:[#allocation53_spill] sm:$0xff] }
 0x219   :  { %1933 = vmatpush.bf16.msra.mxu3 %v9490_v10  ;;  %1803 = vmatpush.bf16.msrb.mxu2 %v9493_v26  ;;  %v1511_v43 = vpop.f32.mrf.mxu3  ;;  %v1500_v40 = vpop.f32.mrf.mxu2 }
 0x21a   :  { %v1512_v5 = vadd.f32 %v1511_v43, %v1498_v35  ;;  %v9499_v43 = vld [vmem:[#allocation48_spill] sm:$0xff]  ;;  %v9506_v35 = vld [vmem:[#allocation77_spill] sm:$0xff]  ;;  %2545 = vrot.lane.b32.xlu1 %v7766_v46, %s6946_s29  ;;  %v6730_v46 = vld [vmem:[#allocation4 + $0x1f0] sm:$0xff] }
 0x21d   :  { %1934 = vmatpush.bf16.msra.mxu3 %v9492_v56  ;;  %1804 = vmatpush.bf16.msrb.mxu2 %v9494_v25 }
 0x21e   :  { %2547 = vrot.lane.b32.xlu2 %v7738_v41, %s6946_s29 }
 0x220   :  { %1935 = vmatmul.bf16.vlgmr.msra.gmra.mxu3 %v7651_v60 }
 0x221   :  { %v1513_v14 = vpop.f32.mrf.mxu3  ;;  %v1563_v10 = vpop.f32.mrf.mxu2 }
 0x222   :  { %v9496_v14 = vld [vmem:[#allocation94_spill] sm:$0xff]  ;;  %2933 = vrot.lane.b32.xlu1 %v7738_v41, %s6947_s30 }
 0x226   :  { %v1780_v31 = vpop.f32.mrf.mxu0 }
 0x227   :  { %v7772_v51 = vadd.f32 %v1793_v13, %v1780_v31 }
 0x229   :  { %v1565_v56 = vpop.f32.mrf.mxu2 }
 0x22e   :  { %v1782_v54 = vpop.f32.mrf.mxu0 }
 0x235   :  { %v1550_v26 = vpop.f32.mrf.mxu3 }
 0x236   :  { %v1564_v2 = vadd.f32 %v1563_v10, %v1550_v26  ;;  %v1795_v26 = vpop.f32.mrf.mxu1  ;;  %v9502_v10 = vld [vmem:[#allocation61_spill] sm:$0xff] }
 0x238   :  { %v1595_v25 = vmax.f32 %v1512_v5, %v1564_v2  ;;  %v1845_v5 = vpop.f32.mrf.mxu0  ;;  %v9505_v2 = vld [vmem:[#allocation73_spill] sm:$0xff] }
 0x23a   :  { %v1597_v40 = vmax.f32 %v1593_v3, %v1595_v25  ;;  %v9507_v3 = vld [vmem:[#allocation81_spill] sm:$0xff] }
 0x23c   :  { %v1599_v38 = vadd.f32 %v1597_v40, %v9496_v14 }
 0x23d   :  { %v1552_v23 = vpop.f32.mrf.mxu3 }
 0x23e   :  { %v1601_v55 = vmax.f32 %v1599_v38, 0.0  ;;  %v9501_v38 = vld [vmem:[#allocation57_spill] sm:$0xff] }
 0x23f   :  { %v9504_v23 = vld [vmem:[#allocation69_spill] sm:$0xff] }
 0x240   :  { %v1603_v7 = vpack.c.bf16 %v1601_v55, %v1601_v55  ;;  %v1847_v15 = vpop.f32.mrf.mxu0  ;;  %v9503_v55 = vld [vmem:[#allocation65_spill] sm:$0xff] }
 0x242   :  { %1742 = vmatmul.bf16.vlgmr.msra.gmra.mxu2 %v1603_v7  ;;  %v7779_v7 = vpop.f32.mrf.mxu1 }
 0x243   :  { %1875 = vmatpush.bf16.msra.mxu2 %v9497_v48 }
 0x247   :  { %1876 = vmatpush.bf16.msra.mxu2 %v9498_v20 }
 0x248   :  { %v1871_v8 = vpop.f32.mrf.mxu0 }
 0x24a   :  { %v1821_v13 = vpop.f32.mrf.mxu1 }
 0x24b   :  { %1877 = vmatpush.bf16.msra.mxu2 %v9499_v43 }
 0x24f   :  { %1878 = vmatpush.bf16.msra.mxu2 %v9500_v30 }
 0x250   :  { %v1873_v56 = vpop.f32.mrf.mxu0 }
 0x252   :  { %1805 = vmatmul.bf16.vlgmr.msrb.gmra.mxu2 %v7651_v60  ;;  %v1858_v12 = vpop.f32.mrf.mxu1 }
 0x253   :  { %1879 = vmatpush.bf16.msra.mxu2 %v9501_v38  ;;  %v7787_v25 = vadd.f32 %v1871_v8, %v1858_v12 }
 0x257   :  { %1880 = vmatpush.bf16.msra.mxu2 %v9502_v10 }
 0x258   :  { %v1910_v31 = vpop.f32.mrf.mxu0 }
 0x25a   :  { %v1860_v40 = vpop.f32.mrf.mxu1 }
 0x25b   :  { %1881 = vmatpush.bf16.msra.mxu2 %v9503_v55 }
 0x25f   :  { %1882 = vmatpush.bf16.msra.mxu2 %v9504_v23 }
 0x262   :  { %1883 = vmatmul.bf16.vlgmr.msra.gmra.mxu2 %v7651_v60  ;;  %v1923_v26 = vpop.f32.mrf.mxu1  ;;  %v1912_v60 = vpop.f32.mrf.mxu0 }
 0x263   :  { %1945 = vmatpush.bf16.msrb.mxu2 %v9505_v2  ;;  %v7794_v15 = vadd.f32 %v1923_v26, %v1910_v31  ;;  %v6717_v60 = vld [vmem:[#allocation4 + $0x188] sm:$0xff] }
 0x267   :  { %1946 = vmatpush.bf16.msrb.mxu2 %v9506_v35 }
 0x26a   :  { %v1925_v8 = vpop.f32.mrf.mxu1  ;;  %v1975_v56 = vpop.f32.mrf.mxu0 }
 0x26b   :  { %1947 = vmatpush.bf16.msrb.mxu2 %v9507_v3  ;;  %v6731_v3 = vld [vmem:[#allocation4 + $0x1f8] sm:$0xff] }
 0x26c   :  { %2133 = vmatpush.bf16.msrb.mxu3 %v6731_v3  ;;  %v6729_v3 = vld [vmem:[#allocation4 + $0x1e8] sm:$0xff] }
 0x270   :  { %v2159_v35 = vpop.permute.xlu2 %2158  ;;  %2134 = vmatpush.bf16.msrb.mxu3 %v6730_v46  ;;  %v6727_v46 = vld [vmem:[#allocation4 + $0x1d8] sm:$0xff] }
 0x272   :  { %5914 = vmatmul.msk.bf16.vlgmr.msrb.gmra.mxu2 %vm573_vm1, %v7642_v49  ;;  %v1962_v2 = vpop.f32.mrf.mxu1 }
 0x273   :  { %v7792_v54 = vpop.f32.mrf.mxu3  ;;  %v7803_v26 = vadd.f32 %v1975_v56, %v1962_v2  ;;  %v1977_v2 = vpop.f32.mrf.mxu0 }
 0x274   :  { %2135 = vmatpush.bf16.msrb.mxu3 %v6729_v3  ;;  %v6725_v3 = vld [vmem:[#allocation4 + $0x1c8] sm:$0xff] }
 0x279   :  { %v2161_v12 = vpop.permute.xlu0 %2160 }
 0x27a   :  { %v7801_v31 = vsel %vm2162_vm5, %v2159_v35, %v2161_v12  ;;  %v1964_v56 = vpop.f32.mrf.mxu1 }
 0x27b   :  { %v1758_v13 = vpop.f32.mrf.mxu3  ;;  %5980 = vmatmul.msk.bf16.vlgmr.msra.gmra.mxu1 %vm573_vm1, %v7801_v31  ;;  %v6723_v56 = vld [vmem:[#allocation4 + $0x1b8] sm:$0xff] }
 0x27c   :  { %2247 = vmatpush.bf16.msra.mxu1 %v7093_v24  ;;  %2120 = vmatpush.bf16.msra.mxu2 %v6723_v56  ;;  %v6719_v56 = vld [vmem:[#allocation4 + $0x198] sm:$0xff] }
 0x280   :  { %2248 = vmatpush.bf16.msra.mxu1 %v7106_v47 }
 0x283   :  { %v1832_v40 = vpop.f32.mrf.mxu3 }
 0x284   :  { %v7798_v49 = vadd.f32 %v1845_v5, %v1832_v40  ;;  %v2157_v13 = vpop.permute.xlu1 %2156  ;;  %v6728_v40 = vld [vmem:[#allocation4 + $0x1e0] sm:$0xff]  ;;  %2249 = vmatpush.bf16.msra.mxu1 %v9393_v50 }
 0x285   :  { %v7813_v8 = vsel %vm2162_vm5, %v2157_v13, %v2159_v35  ;;  %2136 = vmatpush.bf16.msrb.mxu3 %v6728_v40  ;;  %v6726_v13 = vld [vmem:[#allocation4 + $0x1d0] sm:$0xff]  ;;  %v6724_v40 = vld [vmem:[#allocation4 + $0x1c0] sm:$0xff] }
 0x286   :  { %2177 = vmatmul.bf16.vlgmr.msrb.gmra.mxu0 %v7813_v8  ;;  %v9512_v5 = vld [vmem:[#allocation96_spill] sm:$0xff] }
 0x287   :  { %2265 = vmatpush.bf16.msrb.mxu0 %v7163_v29 }
 0x288   :  { %2250 = vmatpush.bf16.msra.mxu1 %v9396_v22 }
 0x289   :  { %2137 = vmatpush.bf16.msrb.mxu3 %v6727_v46 }
 0x28b   :  { %v1834_v12 = vpop.f32.mrf.mxu3  ;;  %2266 = vmatpush.bf16.msrb.mxu0 %v7177_v21  ;;  %5981 = vmatmul.msk.bf16.vlgmr.msrb.gmra.mxu1 %vm573_vm1, %v7801_v31 }
 0x28c   :  { %2251 = vmatpush.bf16.msra.mxu1 %v9399_v45 }
 0x28d   :  { %2138 = vmatpush.bf16.msrb.mxu3 %v6726_v13  ;;  %v6722_v13 = vld [vmem:[#allocation4 + $0x1b0] sm:$0xff] }
 0x28e   :  { %2121 = vmatpush.bf16.msra.mxu2 %v6722_v13  ;;  %v9509_v13 = vld [vmem:[#allocation71_spill] sm:$0xff] }
 0x28f   :  { %2267 = vmatpush.bf16.msrb.mxu0 %v7192_v28 }
 0x290   :  { %2252 = vmatpush.bf16.msra.mxu1 %v9402_v16 }
 0x291   :  { %2139 = vmatpush.bf16.msrb.mxu3 %v6725_v3  ;;  %v6720_v3 = vld [vmem:[#allocation4 + $0x1a0] sm:$0xff] }
 0x293   :  { %v7820_v35 = vpop.f32.mrf.mxu3 }
 0x294   :  { %2253 = vmatpush.bf16.msra.mxu1 %v9405_v42 }
 0x295   :  { %2140 = vmatpush.bf16.msrb.mxu3 %v6724_v40  ;;  %v9508_v40 = vld [vmem:[#allocation33_spill] sm:$0xff] }
 0x296   :  { %5982 = vmatmul.msk.bf16.vlgmr.msra.gmra.mxu0 %vm573_vm1, %v7801_v31 }
 0x297   :  { %2299 = vmatpush.bf16.msra.mxu0 %v9395_v36 }
 0x298   :  { %2254 = vmatpush.bf16.msra.mxu1 %v9408_v53 }
 0x299   :  { %2221 = vmatpush.bf16.msra.mxu3 %v9435_v59 }
 0x29b   :  { %v1899_v2 = vpop.f32.mrf.mxu3  ;;  %2300 = vmatpush.bf16.msra.mxu0 %v9398_v17  ;;  %2255 = vmatmul.bf16.vlgmr.msra.gmra.mxu1 %v7813_v8 }
 0x29c   :  { %2317 = vmatpush.bf16.msrb.mxu1 %v7245_v1  ;;  %v6721_v2 = vld [vmem:[#allocation4 + $0x1a8] sm:$0xff] }
 0x29d   :  { %2122 = vmatpush.bf16.msra.mxu2 %v6721_v2  ;;  %2222 = vmatpush.bf16.msra.mxu3 %v9437_v32  ;;  %v9510_v2 = vld [vmem:[#allocation90_spill] sm:$0xff] }
 0x29f   :  { %2301 = vmatpush.bf16.msra.mxu0 %v9401_v37 }
 0x2a0   :  { %2318 = vmatpush.bf16.msrb.mxu1 %v7261_v11 }
 0x2a1   :  { %2123 = vmatpush.bf16.msra.mxu2 %v6720_v3  ;;  %2223 = vmatpush.bf16.msra.mxu3 %v9438_v44  ;;  %v9511_v3 = vld [vmem:[#allocation36_spill] sm:$0xff] }
 0x2a3   :  { %v7833_v12 = vpop.f32.mrf.mxu3  ;;  %2302 = vmatpush.bf16.msra.mxu0 %v9404_v63 }
 0x2a4   :  { %2319 = vmatpush.bf16.msrb.mxu1 %v7274_v61 }
 0x2a5   :  { %2124 = vmatpush.bf16.msra.mxu2 %v6719_v56  ;;  %2224 = vmatpush.bf16.msra.mxu3 %v9508_v40  ;;  %v1347_v56 = vadd.f32 %v9512_v5, %v7706_v18  ;;  %v6716_v40 = vld [vmem:[#allocation4 + $0x180] sm:$0xff]  ;;  %v9519_v5 = vld [vmem:[#allocation93_spill] sm:$0xff] }
 0x2a6   :  { %5983 = vmatmul.msk.bf16.vlgmr.msrb.gmra.mxu0 %vm573_vm1, %v7801_v31 }
 0x2a7   :  { %2303 = vmatpush.bf16.msra.mxu0 %v9409_v33 }
 0x2a8   :  { %2351 = vmatpush.bf16.msra.mxu1 %v7288_v6 }
 0x2a9   :  { %2225 = vmatpush.bf16.msra.mxu3 %v9511_v3 }
 0x2ab   :  { %v1938_v46 = vpop.f32.mrf.mxu3  ;;  %2304 = vmatpush.bf16.msra.mxu0 %v9411_v58  ;;  %5985 = vmatmul.msk.bf16.vlgmr.msrb.gmra.mxu1 %vm573_vm1, %v7801_v31 }
 0x2ac   :  { %2352 = vmatpush.bf16.msra.mxu1 %v7297_v52  ;;  %v6718_v46 = vld [vmem:[#allocation4 + $0x190] sm:$0xff] }
 0x2ad   :  { %2125 = vmatpush.bf16.msra.mxu2 %v6718_v46  ;;  %v9514_v46 = vld [vmem:[#allocation97_spill] sm:$0xff] }
 0x2ae   :  { %v1360_v3 = vadd.f32 %v9514_v46, %v1347_v56  ;;  %v9527_v56 = vld [vmem:[#allocation18_spill] sm:$0xff] }
 0x2af   :  { %2305 = vmatpush.bf16.msra.mxu0 %v9414_v34  ;;  %v9528_v46 = vld [vmem:[#allocation22_spill] sm:$0xff] }
 0x2b0   :  { %2353 = vmatpush.bf16.msra.mxu1 %v9428_v0 }
 0x2b1   :  { %2126 = vmatpush.bf16.msra.mxu2 %v6717_v60  ;;  %v9518_v60 = vld [vmem:[#allocation10_spill] sm:$0xff] }
 0x2b3   :  { %2306 = vmatpush.bf16.msra.mxu0 %v9468_v9 }
 0x2b4   :  { %2354 = vmatpush.bf16.msra.mxu1 %v7314_v39  ;;  %v9513_v39 = vld [vmem:[#allocation41_spill] sm:$0xff] }
 0x2b5   :  { %2226 = vmatpush.bf16.msra.mxu3 %v9513_v39  ;;  %2127 = vmatpush.bf16.msra.mxu2 %v6716_v40  ;;  %v9520_v39 = vld [vmem:[#allocation49_spill] sm:$0xff]  ;;  %v9523_v40 = vld [vmem:[#allocation16_spill] sm:$0xff] }
 0x2b6   :  { %2307 = vmatmul.bf16.vlgmr.msra.gmra.mxu0 %v7813_v8 }
 0x2b7   :  { %2369 = vmatpush.bf16.msrb.mxu0 %v9509_v13  ;;  %v9516_v13 = vld [vmem:[#allocation9_spill] sm:$0xff] }
 0x2b8   :  { %2355 = vmatpush.bf16.msra.mxu1 %v9510_v2 }
 0x2b9   :  { %2195 = vmatpush.bf16.msrb.mxu2 %v9516_v13 }
 0x2bb   :  { %2370 = vmatpush.bf16.msrb.mxu0 %v9471_v57 }
 0x2bc   :  { %2356 = vmatpush.bf16.msra.mxu1 %v9472_v27  ;;  %v9515_v27 = vld [vmem:[#allocation45_spill] sm:$0xff] }
 0x2bd   :  { %2227 = vmatpush.bf16.msra.mxu3 %v9515_v27 }
 0x2bf   :  { %2371 = vmatpush.bf16.msrb.mxu0 %v9473_v19 }
 0x2c0   :  { %2357 = vmatpush.bf16.msra.mxu1 %v9431_v62  ;;  %v9522_v62 = vld [vmem:[#allocation13_spill] sm:$0xff] }
 0x2c1   :  { %2228 = vmatpush.bf16.msra.mxu3 %v9520_v39  ;;  %2196 = vmatpush.bf16.msrb.mxu2 %v9522_v62 }
 0x2c3   :  { %2555 = vmatpush.bf16.msra.mxu0 %v9474_v4  ;;  %v9521_v4 = vld [vmem:[#allocation11_spill] sm:$0xff] }
 0x2c4   :  { %2358 = vmatpush.bf16.msra.mxu1 %v9519_v5  ;;  %v9530_v5 = vld [vmem:[#allocation24_spill] sm:$0xff] }
 0x2c5   :  { %v1743_v2 = vpop.f32.mrf.mxu2 }
 0x2c6   :  { %v1757_v57 = vadd.f32 %v7792_v54, %v1743_v2  ;;  %5987 = vmatmul.msk.bf16.vlgmr.msrb.gmra.mxu0 %vm573_vm1, %v7801_v31  ;;  %v9525_v2 = vld [vmem:[#allocation17_spill] sm:$0xff] }
 0x2c7   :  { %2556 = vmatpush.bf16.msra.mxu0 %v9518_v60  ;;  %2359 = vmatmul.bf16.vlgmr.msra.gmra.mxu1 %v7813_v8 }
 0x2c8   :  { %v7874_v18 = vadd.f32 %v1757_v57, %v1360_v3  ;;  %2573 = vmatpush.bf16.msrb.mxu1 %v9521_v4  ;;  %v9524_v57 = vld [vmem:[#allocation14_spill] sm:$0xff]  ;;  %2197 = vmatpush.bf16.msrb.mxu2 %v9525_v2  ;;  %v9526_v3 = vld [vmem:[#allocation20_spill] sm:$0xff] }
 0x2c9   :  { %v9529_v4 = vld [vmem:[#allocation12_spill] sm:$0xff] }
 0x2ca   :  { %9517 = vst [vmem:[#allocation94_spill] sm:$0xff] %v7874_v18  ;;  %v9533_v2 = vld [vmem:[#allocation28_spill] sm:$0xff]  ;;  %v9537_v18 = vld [vmem:[#allocation95_spill] sm:$0xff] }
 0x2cb   :  { %2557 = vmatpush.bf16.msra.mxu0 %v9523_v40  ;;  %v9532_v40 = vld [vmem:[#allocation15_spill] sm:$0xff] }
 0x2cc   :  { %2574 = vmatpush.bf16.msrb.mxu1 %v9524_v57  ;;  %2198 = vmatpush.bf16.msrb.mxu2 %v9528_v46  ;;  %v9535_v46 = vld [vmem:[#allocation31_spill] sm:$0xff] }
 0x2cd   :  { %v1745_v54 = vpop.f32.mrf.mxu2 }
 0x2ce   :  { %v9531_v54 = vld [vmem:[#allocation27_spill] sm:$0xff] }
 0x2cf   :  { %2558 = vmatpush.bf16.msra.mxu0 %v9526_v3 }
 0x2d0   :  { %2575 = vmatpush.bf16.msrb.mxu1 %v9527_v56  ;;  %2199 = vmatpush.bf16.msrb.mxu2 %v9531_v54  ;;  %v9534_v56 = vmax.f32 %v7794_v15, %v7803_v26  ;;  %v9539_v54 = vld [vmem:[#allocation34_spill] sm:$0xff]  ;;  %v9543_v26 = vld [vmem:[#allocation37_spill] sm:$0xff] }
 0x2d1   :  { %v9542_v15 = vld [vmem:[#allocation62_spill] sm:$0xff] }
 0x2d3   :  { %2559 = vmatpush.bf16.msra.mxu0 %v9530_v5 }
 0x2d4   :  { %2599 = vmatpush.bf16.msra.mxu1 %v9529_v4  ;;  %2200 = vmatpush.bf16.msrb.mxu2 %v9535_v46  ;;  %v9536_v4 = vld [vmem:[#allocation19_spill] sm:$0xff] }
 0x2d5   :  { %v1806_v62 = vpop.f32.mrf.mxu2 }
 0x2d6   :  { %v1820_v39 = vadd.f32 %v7779_v7, %v1806_v62  ;;  %v9538_v62 = vld [vmem:[#allocation32_spill] sm:$0xff] }
 0x2d7   :  { %2560 = vmatpush.bf16.msra.mxu0 %v9533_v2 }
 0x2d8   :  { %2600 = vmatpush.bf16.msra.mxu1 %v9532_v40  ;;  %v1980_v57 = vmax.f32 %v1820_v39, %v7787_v25  ;;  %2201 = vmatpush.bf16.msrb.mxu2 %v9539_v54  ;;  %v9540_v39 = vld [vmem:[#allocation35_spill] sm:$0xff] }
 0x2d9   :  { %v9541_v25 = vld [vmem:[#allocation23_spill] sm:$0xff] }
 0x2da   :  { %v1984_v3 = vmax.f32 %v1980_v57, %v9534_v56  ;;  %v9544_v56 = vld [vmem:[#allocation26_spill] sm:$0xff] }
 0x2db   :  { %2561 = vmatpush.bf16.msra.mxu0 %v9538_v62 }
 0x2dc   :  { %2601 = vmatpush.bf16.msra.mxu1 %v9536_v4  ;;  %v1986_v5 = vadd.f32 %v1984_v3, %v9537_v18  ;;  %2202 = vmatpush.bf16.msrb.mxu2 %v9543_v26  ;;  %v9545_v3 = vld [vmem:[#allocation67_spill] sm:$0xff]  ;;  %v9549_v26 = vld [vmem:[#allocation66_spill] sm:$0xff]  ;;  %v9552_v18 = vld [vmem:[#allocation76_spill] sm:$0xff] }
 0x2dd   :  { %v1808_v13 = vpop.f32.mrf.mxu2 }
 0x2de   :  { %v1988_v7 = vmax.f32 %v1986_v5, 0.0  ;;  %v9546_v13 = vld [vmem:[#allocation30_spill] sm:$0xff]  ;;  %v9547_v5 = vld [vmem:[#allocation72_spill] sm:$0xff] }
 0x2df   :  { %2562 = vmatpush.bf16.msra.mxu0 %v9540_v39 }
 0x2e0   :  { %v1990_v40 = vpack.c.bf16 %v1988_v7, %v1988_v7  ;;  %v9548_v7 = vld [vmem:[#allocation63_spill] sm:$0xff] }
 0x2e2   :  { %2141 = vmatmul.bf16.vlgmr.msrb.gmra.mxu3 %v1990_v40 }
 0x2e3   :  { %2625 = vmatpush.bf16.msrb.mxu0 %v9541_v25  ;;  %2291 = vmatpush.bf16.msrb.mxu3 %v9542_v15 }
 0x2e5   :  { %v1884_v57 = vpop.f32.mrf.mxu2 }
 0x2e6   :  { %v1898_v25 = vadd.f32 %v7820_v35, %v1884_v57  ;;  %v9553_v35 = vld [vmem:[#allocation80_spill] sm:$0xff] }
 0x2e7   :  { %2626 = vmatpush.bf16.msrb.mxu0 %v9544_v56  ;;  %2292 = vmatpush.bf16.msrb.mxu3 %v9545_v3  ;;  %v9550_v3 = vmax.f32 %v7772_v51, %v7798_v49  ;;  %v9554_v51 = vld [vmem:[#allocation83_spill] sm:$0xff] }
 0x2eb   :  { %2627 = vmatpush.bf16.msrb.mxu0 %v9546_v13  ;;  %2293 = vmatpush.bf16.msrb.mxu3 %v9547_v5  ;;  %v9551_v13 = vld [vmem:[#allocation70_spill] sm:$0xff] }
 0x2ed   :  { %v1886_v54 = vpop.f32.mrf.mxu2 }
 0x2f2   :  { %2229 = vmatmul.bf16.vlgmr.msra.gmra.mxu3 %v7813_v8 }
 0x2f3   :  { %2325 = vmatpush.bf16.msra.mxu3 %v9548_v7 }
 0x2f5   :  { %v1949_v40 = vpop.f32.mrf.mxu2 }
 0x2f6   :  { %v1950_v15 = vadd.f32 %v1949_v40, %v7833_v12 }
 0x2f7   :  { %2326 = vmatpush.bf16.msra.mxu3 %v9549_v26 }
 0x2f8   :  { %v1981_v39 = vmax.f32 %v1898_v25, %v1950_v15  ;;  %v2191_v12 = vpop.f32.mrf.mxu1  ;;  %v9555_v25 = vld [vmem:[#allocation84_spill] sm:$0xff]  ;;  %v9556_v15 = vld [vmem:[#allocation86_spill] sm:$0xff] }
 0x2fa   :  { %v1983_v56 = vmax.f32 %v9550_v3, %v1981_v39 }
 0x2fb   :  { %2327 = vmatpush.bf16.msra.mxu3 %v9551_v13 }
 0x2fc   :  { %v1985_v54 = vadd.f32 %v1983_v56, %v9496_v14 }
 0x2fd   :  { %v1951_v5 = vpop.f32.mrf.mxu2 }
 0x2fe   :  { %v1987_v4 = vmax.f32 %v1985_v54, 0.0 }
 0x2ff   :  { %2328 = vmatpush.bf16.msra.mxu3 %v9552_v18 }
 0x300   :  { %v1989_v7 = vpack.c.bf16 %v1987_v4, %v1987_v4  ;;  %v2193_v4 = vpop.f32.mrf.mxu1 }
 0x302   :  { %2128 = vmatmul.bf16.vlgmr.msra.gmra.mxu2 %v1989_v7  ;;  %5984 = vmatmul.msk.bf16.vlgmr.msrb.gmra.mxu3 %vm573_vm1, %v7801_v31  ;;  %v9557_v7 = vld [vmem:[#allocation73_spill] sm:$0xff] }
 0x303   :  { %2273 = vmatpush.bf16.msra.mxu2 %v9497_v48  ;;  %2329 = vmatpush.bf16.msra.mxu3 %v9553_v35  ;;  %v2178_v49 = vpop.f32.mrf.mxu0 }
 0x304   :  { %v7930_v39 = vadd.f32 %v2191_v12, %v2178_v49  ;;  %v9558_v12 = vld [vmem:[#allocation77_spill] sm:$0xff] }
 0x305   :  { %v9559_v49 = vld [vmem:[#allocation81_spill] sm:$0xff] }
 0x307   :  { %2274 = vmatpush.bf16.msra.mxu2 %v9498_v20  ;;  %2330 = vmatpush.bf16.msra.mxu3 %v9554_v51 }
 0x308   :  { %v7939_v56 = vpop.f32.mrf.mxu1 }
 0x30b   :  { %2275 = vmatpush.bf16.msra.mxu2 %v9499_v43  ;;  %2331 = vmatpush.bf16.msra.mxu3 %v9555_v25  ;;  %v2180_v57 = vpop.f32.mrf.mxu0 }
 0x30f   :  { %2276 = vmatpush.bf16.msra.mxu2 %v9500_v30  ;;  %2332 = vmatpush.bf16.msra.mxu3 %v9556_v15 }
 0x310   :  { %v2219_v5 = vpop.f32.mrf.mxu1 }
 0x312   :  { %2203 = vmatmul.bf16.vlgmr.msrb.gmra.mxu2 %v7813_v8  ;;  %2333 = vmatmul.bf16.vlgmr.msra.gmra.mxu3 %v7813_v8 }
 0x313   :  { %2277 = vmatpush.bf16.msra.mxu2 %v9501_v38  ;;  %v7942_v3 = vpop.f32.mrf.mxu0 }
 0x317   :  { %2278 = vmatpush.bf16.msra.mxu2 %v9502_v10 }
 0x318   :  { %v2256_v54 = vpop.f32.mrf.mxu1 }
 0x31b   :  { %2279 = vmatpush.bf16.msra.mxu2 %v9503_v55  ;;  %v2245_v40 = vpop.f32.mrf.mxu0 }
 0x31c   :  { %v9560_v40 = vld [vmem:[#allocation98_spill] sm:$0xff] }
 0x31d   :  { %2931 = vrot.lane.b32.xlu0 %v9560_v40, %s6947_s30 }
 0x31f   :  { %2280 = vmatpush.bf16.msra.mxu2 %v9504_v23 }
 0x320   :  { %v2258_v10 = vpop.f32.mrf.mxu1 }
 0x322   :  { %2281 = vmatmul.bf16.vlgmr.msra.gmra.mxu2 %v7813_v8 }
 0x323   :  { %2343 = vmatpush.bf16.msrb.mxu2 %v9557_v7  ;;  %v2269_v4 = vpop.f32.mrf.mxu0 }
 0x324   :  { %v7950_v57 = vadd.f32 %v2269_v4, %v2256_v54  ;;  %v2546_v54 = vpop.permute.xlu1 %2545  ;;  %v6746_v4 = vld [vmem:[#allocation4 + $0x270] sm:$0xff] }
 0x327   :  { %2344 = vmatpush.bf16.msrb.mxu2 %v9558_v12 }
 0x328   :  { %v2321_v5 = vpop.f32.mrf.mxu1 }
 0x32b   :  { %2345 = vmatpush.bf16.msrb.mxu2 %v9559_v49  ;;  %v2271_v38 = vpop.f32.mrf.mxu0  ;;  %v7958_v49 = vpop.permute.xlu2 %2547 }
 0x32c   :  { %6052 = vmatmul.msk.bf16.vlgmr.msrb.gmra.mxu1 %vm573_vm1, %v7958_v49  ;;  %v7963_v38 = vsel %vm2549_vm6, %v2546_v54, %v7958_v49  ;;  %v6744_v54 = vld [vmem:[#allocation4 + $0x260] sm:$0xff] }
 0x32d   :  { %2633 = vmatpush.bf16.msrb.mxu1 %v7093_v24  ;;  %2563 = vmatmul.bf16.vlgmr.msra.gmra.mxu0 %v7963_v38 }
 0x32e   :  { %2651 = vmatpush.bf16.msra.mxu0 %v7163_v29 }
 0x330   :  { %v2323_v12 = vpop.f32.mrf.mxu1 }
 0x331   :  { %2634 = vmatpush.bf16.msrb.mxu1 %v7106_v47  ;;  %v6747_v12 = vld [vmem:[#allocation4 + $0x278] sm:$0xff] }
 0x332   :  { %5986 = vmatmul.msk.bf16.vlgmr.msrb.gmra.mxu2 %vm573_vm1, %v7801_v31  ;;  %2652 = vmatpush.bf16.msra.mxu0 %v7177_v21 }
 0x333   :  { %v2308_v8 = vpop.f32.mrf.mxu0  ;;  %2531 = vmatpush.bf16.msrb.mxu3 %v6747_v12 }
 0x334   :  { %v7956_v7 = vadd.f32 %v2321_v5, %v2308_v8  ;;  %v6745_v8 = vld [vmem:[#allocation4 + $0x268] sm:$0xff] }
 0x335   :  { %2635 = vmatpush.bf16.msrb.mxu1 %v9393_v50 }
 0x336   :  { %2653 = vmatpush.bf16.msra.mxu0 %v7192_v28 }
 0x337   :  { %2532 = vmatpush.bf16.msrb.mxu3 %v6746_v4  ;;  %v6741_v4 = vld [vmem:[#allocation4 + $0x248] sm:$0xff] }
 0x339   :  { %2636 = vmatpush.bf16.msrb.mxu1 %v9396_v22 }
 0x33b   :  { %v2310_v23 = vpop.f32.mrf.mxu0  ;;  %2533 = vmatpush.bf16.msrb.mxu3 %v6745_v8  ;;  %v6738_v8 = vld [vmem:[#allocation4 + $0x230] sm:$0xff] }
 0x33c   :  { %6053 = vmatmul.msk.bf16.vlgmr.msra.gmra.mxu1 %vm573_vm1, %v7958_v49 }
 0x33d   :  { %2637 = vmatpush.bf16.msrb.mxu1 %v9399_v45  ;;  %6054 = vmatmul.msk.bf16.vlgmr.msrb.gmra.mxu0 %vm573_vm1, %v7958_v49 }
 0x33e   :  { %2685 = vmatpush.bf16.msrb.mxu0 %v9395_v36 }
 0x33f   :  { %2534 = vmatpush.bf16.msrb.mxu3 %v6744_v54 }
 0x341   :  { %2638 = vmatpush.bf16.msrb.mxu1 %v9402_v16 }
 0x342   :  { %2686 = vmatpush.bf16.msrb.mxu0 %v9398_v17 }
 0x343   :  { %v2373_v10 = vpop.f32.mrf.mxu0 }
 0x344   :  { %v2360_v41 = vpop.f32.mrf.mxu1 }
 0x345   :  { %v7968_v31 = vadd.f32 %v2373_v10, %v2360_v41  ;;  %v6743_v41 = vld [vmem:[#allocation4 + $0x258] sm:$0xff]  ;;  %2639 = vmatpush.bf16.msrb.mxu1 %v9405_v42  ;;  %v6742_v10 = vld [vmem:[#allocation4 + $0x250] sm:$0xff] }
 0x346   :  { %2535 = vmatpush.bf16.msrb.mxu3 %v6743_v41  ;;  %2687 = vmatpush.bf16.msrb.mxu0 %v9401_v37  ;;  %v6737_v41 = vld [vmem:[#allocation4 + $0x228] sm:$0xff] }
 0x349   :  { %2640 = vmatpush.bf16.msrb.mxu1 %v9408_v53 }
 0x34a   :  { %2536 = vmatpush.bf16.msrb.mxu3 %v6742_v10  ;;  %2688 = vmatpush.bf16.msrb.mxu0 %v9404_v63  ;;  %v6736_v10 = vld [vmem:[#allocation4 + $0x220] sm:$0xff] }
 0x34b   :  { %v2375_v40 = vpop.f32.mrf.mxu0 }
 0x34c   :  { %v2362_v5 = vpop.f32.mrf.mxu1  ;;  %2641 = vmatmul.bf16.vlgmr.msrb.gmra.mxu1 %v7963_v38  ;;  %v6740_v40 = vld [vmem:[#allocation4 + $0x240] sm:$0xff] }
 0x34d   :  { %2703 = vmatpush.bf16.msra.mxu1 %v7245_v1  ;;  %v6739_v5 = vld [vmem:[#allocation4 + $0x238] sm:$0xff]  ;;  %6055 = vmatmul.msk.bf16.vlgmr.msra.gmra.mxu0 %vm573_vm1, %v7958_v49 }
 0x34e   :  { %2537 = vmatpush.bf16.msrb.mxu3 %v6741_v4  ;;  %2518 = vmatpush.bf16.msra.mxu2 %v6739_v5 }
 0x34f   :  { %2689 = vmatpush.bf16.msrb.mxu0 %v9409_v33 }
 0x351   :  { %2704 = vmatpush.bf16.msra.mxu1 %v7261_v11 }
 0x352   :  { %2538 = vmatpush.bf16.msrb.mxu3 %v6740_v40  ;;  %2519 = vmatpush.bf16.msra.mxu2 %v6738_v8  ;;  %v6735_v40 = vld [vmem:[#allocation4 + $0x218] sm:$0xff] }
 0x353   :  { %2690 = vmatpush.bf16.msrb.mxu0 %v9411_v58  ;;  %v9561_v8 = vld [vmem:[#allocation71_spill] sm:$0xff] }
 0x355   :  { %2705 = vmatpush.bf16.msra.mxu1 %v7274_v61 }
 0x356   :  { %2607 = vmatpush.bf16.msra.mxu3 %v9435_v59  ;;  %2520 = vmatpush.bf16.msra.mxu2 %v6737_v41  ;;  %v9562_v41 = vld [vmem:[#allocation33_spill] sm:$0xff] }
 0x357   :  { %2691 = vmatpush.bf16.msrb.mxu0 %v9414_v34 }
 0x359   :  { %2737 = vmatpush.bf16.msrb.mxu1 %v7288_v6 }
 0x35a   :  { %2608 = vmatpush.bf16.msra.mxu3 %v9437_v32  ;;  %2521 = vmatpush.bf16.msra.mxu2 %v6736_v10  ;;  %v9563_v10 = vld [vmem:[#allocation89_spill] sm:$0xff] }
 0x35b   :  { %2692 = vmatpush.bf16.msrb.mxu0 %v9468_v9  ;;  %v9565_v9 = vld [vmem:[#allocation36_spill] sm:$0xff] }
 0x35c   :  { %6057 = vmatmul.msk.bf16.vlgmr.msra.gmra.mxu1 %vm573_vm1, %v7958_v49 }
 0x35d   :  { %2738 = vmatpush.bf16.msrb.mxu1 %v7297_v52 }
 0x35e   :  { %2609 = vmatpush.bf16.msra.mxu3 %v9438_v44  ;;  %2522 = vmatpush.bf16.msra.mxu2 %v6735_v40  ;;  %v9568_v40 = vld [vmem:[#allocation41_spill] sm:$0xff] }
 0x35f   :  { %2755 = vmatpush.bf16.msra.mxu0 %v9561_v8  ;;  %v6733_v8 = vld [vmem:[#allocation4 + $0x208] sm:$0xff] }
 0x360   :  { %2693 = vmatmul.bf16.vlgmr.msrb.gmra.mxu0 %v7963_v38 }
 0x361   :  { %2739 = vmatpush.bf16.msrb.mxu1 %v9428_v0  ;;  %v9566_v0 = vld [vmem:[#allocation90_spill] sm:$0xff] }
 0x362   :  { %2610 = vmatpush.bf16.msra.mxu3 %v9562_v41  ;;  %v6732_v41 = vld [vmem:[#allocation4 + $0x200] sm:$0xff] }
 0x365   :  { %v2142_v12 = vpop.f32.mrf.mxu3  ;;  %2740 = vmatpush.bf16.msrb.mxu1 %v9563_v10  ;;  %v9569_v10 = vld [vmem:[#allocation91_spill] sm:$0xff] }
 0x366   :  { %2611 = vmatpush.bf16.msra.mxu3 %v9565_v9  ;;  %v9571_v9 = vld [vmem:[#allocation9_spill] sm:$0xff] }
 0x369   :  { %2741 = vmatpush.bf16.msrb.mxu1 %v9566_v0  ;;  %v9570_v0 = vld [vmem:[#allocation92_spill] sm:$0xff] }
 0x36a   :  { %2612 = vmatpush.bf16.msra.mxu3 %v9568_v40  ;;  %v9575_v40 = vld [vmem:[#allocation49_spill] sm:$0xff] }
 0x36d   :  { %v2144_v54 = vpop.f32.mrf.mxu3  ;;  %2742 = vmatpush.bf16.msrb.mxu1 %v9569_v10  ;;  %v9576_v10 = vld [vmem:[#allocation93_spill] sm:$0xff] }
 0x36e   :  { %v9567_v54 = vld [vmem:[#allocation8_spill] sm:$0xff]  ;;  %2613 = vmatpush.bf16.msra.mxu3 %v9515_v27 }
 0x371   :  { %2743 = vmatpush.bf16.msrb.mxu1 %v9570_v0 }
 0x372   :  { %2614 = vmatpush.bf16.msra.mxu3 %v9575_v40  ;;  %v9582_v40 = vld [vmem:[#allocation24_spill] sm:$0xff] }
 0x375   :  { %v2230_v4 = vpop.f32.mrf.mxu3  ;;  %2744 = vmatpush.bf16.msrb.mxu1 %v9576_v10  ;;  %v9583_v10 = vld [vmem:[#allocation22_spill] sm:$0xff] }
 0x376   :  { %v8004_v5 = vadd.f32 %v7942_v3, %v2230_v4  ;;  %v6734_v3 = vld [vmem:[#allocation4 + $0x210] sm:$0xff]  ;;  %v9564_v4 = vld [vmem:[#allocation75_spill] sm:$0xff] }
 0x377   :  { %2756 = vmatpush.bf16.msra.mxu0 %v9564_v4  ;;  %2523 = vmatpush.bf16.msra.mxu2 %v6734_v3 }
 0x378   :  { %2745 = vmatmul.bf16.vlgmr.msrb.gmra.mxu1 %v7963_v38 }
 0x37b   :  { %2757 = vmatpush.bf16.msra.mxu0 %v9473_v19  ;;  %2524 = vmatpush.bf16.msra.mxu2 %v6733_v8  ;;  %v9572_v19 = vld [vmem:[#allocation94_spill] sm:$0xff]  ;;  %v9574_v8 = vld [vmem:[#allocation16_spill] sm:$0xff] }
 0x37d   :  { %v2232_v23 = vpop.f32.mrf.mxu3 }
 0x37e   :  { %6059 = vmatmul.msk.bf16.vlgmr.msra.gmra.mxu0 %vm573_vm1, %v7958_v49 }
 0x37f   :  { %2941 = vmatpush.bf16.msrb.mxu0 %v9567_v54  ;;  %2525 = vmatpush.bf16.msra.mxu2 %v6732_v41  ;;  %v9578_v41 = vld [vmem:[#allocation11_spill] sm:$0xff] }
 0x380   :  { %2959 = vmatpush.bf16.msra.mxu1 %v9578_v41 }
 0x383   :  { %2942 = vmatpush.bf16.msrb.mxu0 %v9518_v60  ;;  %2581 = vmatpush.bf16.msrb.mxu2 %v9571_v9  ;;  %v9577_v60 = vld [vmem:[#allocation13_spill] sm:$0xff] }
 0x385   :  { %v2129_v4 = vpop.f32.mrf.mxu2  ;;  %v2295_v23 = vpop.f32.mrf.mxu3 }
 0x386   :  { %v2143_v3 = vadd.f32 %v2142_v12, %v2129_v4  ;;  %v9579_v12 = vld [vmem:[#allocation20_spill] sm:$0xff] }
 0x387   :  { %2943 = vmatpush.bf16.msrb.mxu0 %v9574_v8  ;;  %2582 = vmatpush.bf16.msrb.mxu2 %v9577_v60  ;;  %v9584_v60 = vld [vmem:[#allocation18_spill] sm:$0xff]  ;;  %v9585_v8 = vld [vmem:[#allocation12_spill] sm:$0xff] }
 0x388   :  { %v8028_v54 = vadd.f32 %v2143_v3, %v9572_v19  ;;  %v9580_v19 = vld [vmem:[#allocation17_spill] sm:$0xff]  ;;  %v9581_v3 = vld [vmem:[#allocation14_spill] sm:$0xff] }
 0x389   :  { %2960 = vmatpush.bf16.msra.mxu1 %v9581_v3  ;;  %v9591_v3 = vld [vmem:[#allocation35_spill] sm:$0xff] }
 0x38a   :  { %9573 = vst [vmem:[#allocation39_spill] sm:$0xff] %v8028_v54  ;;  %v9587_v54 = vld [vmem:[#allocation15_spill] sm:$0xff] }
 0x38b   :  { %2944 = vmatpush.bf16.msrb.mxu0 %v9579_v12  ;;  %2583 = vmatpush.bf16.msrb.mxu2 %v9580_v19 }
 0x38d   :  { %v2131_v4 = vpop.f32.mrf.mxu2  ;;  %v2297_v9 = vpop.f32.mrf.mxu3  ;;  %2961 = vmatpush.bf16.msra.mxu1 %v9584_v60 }
 0x38e   :  { %v9586_v4 = vld [vmem:[#allocation27_spill] sm:$0xff] }
 0x38f   :  { %2945 = vmatpush.bf16.msrb.mxu0 %v9582_v40  ;;  %2584 = vmatpush.bf16.msrb.mxu2 %v9583_v10  ;;  %v9588_v10 = vmax.f32 %v7956_v7, %v7968_v31  ;;  %v9590_v40 = vld [vmem:[#allocation19_spill] sm:$0xff]  ;;  %v9595_v7 = vld [vmem:[#allocation37_spill] sm:$0xff]  ;;  %v9596_v31 = vld [vmem:[#allocation62_spill] sm:$0xff] }
 0x391   :  { %2985 = vmatpush.bf16.msrb.mxu1 %v9585_v8  ;;  %v9589_v8 = vld [vmem:[#allocation95_spill] sm:$0xff] }
 0x393   :  { %2946 = vmatpush.bf16.msrb.mxu0 %v9533_v2  ;;  %2585 = vmatpush.bf16.msrb.mxu2 %v9586_v4  ;;  %v9592_v4 = vld [vmem:[#allocation23_spill] sm:$0xff] }
 0x395   :  { %v2204_v41 = vpop.f32.mrf.mxu2  ;;  %v2334_v12 = vpop.f32.mrf.mxu3  ;;  %2986 = vmatpush.bf16.msrb.mxu1 %v9587_v54  ;;  %v9594_v54 = vld [vmem:[#allocation26_spill] sm:$0xff] }
 0x396   :  { %v2218_v9 = vadd.f32 %v7939_v56, %v2204_v41 }
 0x397   :  { %2947 = vmatpush.bf16.msrb.mxu0 %v9538_v62  ;;  %2586 = vmatpush.bf16.msrb.mxu2 %v9535_v46 }
 0x398   :  { %v2378_v19 = vmax.f32 %v2218_v9, %v7950_v57  ;;  %v9593_v9 = vld [vmem:[#allocation34_spill] sm:$0xff] }
 0x399   :  { %2987 = vmatpush.bf16.msrb.mxu1 %v9590_v40 }
 0x39a   :  { %v2382_v60 = vmax.f32 %v2378_v19, %v9588_v10  ;;  %v9597_v10 = vld [vmem:[#allocation30_spill] sm:$0xff]  ;;  %v9598_v19 = vld [vmem:[#allocation67_spill] sm:$0xff] }
 0x39b   :  { %2948 = vmatpush.bf16.msrb.mxu0 %v9591_v3  ;;  %2587 = vmatpush.bf16.msrb.mxu2 %v9593_v9 }
 0x39c   :  { %v2384_v2 = vadd.f32 %v2382_v60, %v9589_v8 }
 0x39d   :  { %v2206_v56 = vpop.f32.mrf.mxu2  ;;  %v2336_v41 = vpop.f32.mrf.mxu3 }
 0x39e   :  { %v2386_v57 = vmax.f32 %v2384_v2, 0.0  ;;  %v9599_v56 = vld [vmem:[#allocation72_spill] sm:$0xff]  ;;  %v9600_v2 = vld [vmem:[#allocation63_spill] sm:$0xff] }
 0x39f   :  { %3011 = vmatpush.bf16.msra.mxu0 %v9592_v4  ;;  %2588 = vmatpush.bf16.msrb.mxu2 %v9595_v7 }
 0x3a0   :  { %v2388_v62 = vpack.c.bf16 %v2386_v57, %v2386_v57 }
 0x3a2   :  { %2539 = vmatmul.bf16.vlgmr.msrb.gmra.mxu3 %v2388_v62 }
 0x3a3   :  { %3012 = vmatpush.bf16.msra.mxu0 %v9594_v54  ;;  %2677 = vmatpush.bf16.msrb.mxu3 %v9596_v31  ;;  %v9601_v31 = vmax.f32 %v7930_v39, %v8004_v5 }
 0x3a5   :  { %v2282_v60 = vpop.f32.mrf.mxu2 }
 0x3a6   :  { %v2296_v4 = vadd.f32 %v2295_v23, %v2282_v60  ;;  %v9603_v60 = vld [vmem:[#allocation61_spill] sm:$0xff] }
 0x3a7   :  { %3013 = vmatpush.bf16.msra.mxu0 %v9597_v10  ;;  %2678 = vmatpush.bf16.msrb.mxu3 %v9598_v19 }
 0x3a9   :  { %v2577_v39 = vpop.f32.mrf.mxu1 }
 0x3ab   :  { %2679 = vmatpush.bf16.msrb.mxu3 %v9599_v56 }
 0x3ad   :  { %v2284_v41 = vpop.f32.mrf.mxu2 }
 0x3b2   :  { %2615 = vmatmul.bf16.vlgmr.msra.gmra.mxu3 %v7963_v38 }
 0x3b3   :  { %2711 = vmatpush.bf16.msra.mxu3 %v9600_v2 }
 0x3b5   :  { %v2347_v57 = vpop.f32.mrf.mxu2 }
 0x3b6   :  { %v2348_v54 = vadd.f32 %v2347_v57, %v2334_v12  ;;  %v2579_v12 = vpop.f32.mrf.mxu1  ;;  %v9605_v57 = vld [vmem:[#allocation73_spill] sm:$0xff] }
 0x3b7   :  { %2712 = vmatpush.bf16.msra.mxu3 %v9549_v26 }
 0x3b8   :  { %v2379_v62 = vmax.f32 %v2296_v4, %v2348_v54  ;;  %v2564_v54 = vpop.f32.mrf.mxu0  ;;  %v9602_v4 = vld [vmem:[#allocation57_spill] sm:$0xff] }
 0x3b9   :  { %v8079_v5 = vadd.f32 %v2577_v39, %v2564_v54 }
 0x3ba   :  { %v2381_v7 = vmax.f32 %v9601_v31, %v2379_v62  ;;  %v9606_v62 = vld [vmem:[#allocation77_spill] sm:$0xff] }
 0x3bb   :  { %2713 = vmatpush.bf16.msra.mxu3 %v9551_v13 }
 0x3bc   :  { %v2383_v10 = vadd.f32 %v2381_v7, %v9496_v14 }
 0x3bd   :  { %v2349_v56 = vpop.f32.mrf.mxu2 }
 0x3be   :  { %v2385_v41 = vmax.f32 %v2383_v10, 0.0  ;;  %v8092_v31 = vpop.f32.mrf.mxu1  ;;  %v9604_v56 = vld [vmem:[#allocation69_spill] sm:$0xff] }
 0x3bf   :  { %2714 = vmatpush.bf16.msra.mxu3 %v9552_v18 }
 0x3c0   :  { %v2387_v19 = vpack.c.bf16 %v2385_v41, %v2385_v41  ;;  %v2566_v23 = vpop.f32.mrf.mxu0 }
 0x3c1   :  { %v9607_v23 = vld [vmem:[#allocation81_spill] sm:$0xff] }
 0x3c2   :  { %2526 = vmatmul.bf16.vlgmr.msra.gmra.mxu2 %v2387_v19  ;;  %6056 = vmatmul.msk.bf16.vlgmr.msrb.gmra.mxu3 %vm573_vm1, %v7958_v49 }
 0x3c3   :  { %2659 = vmatpush.bf16.msra.mxu2 %v9497_v48  ;;  %2715 = vmatpush.bf16.msra.mxu3 %v9553_v35 }
 0x3c6   :  { %v2605_v19 = vpop.f32.mrf.mxu1 }
 0x3c7   :  { %2660 = vmatpush.bf16.msra.mxu2 %v9498_v20  ;;  %2716 = vmatpush.bf16.msra.mxu3 %v9554_v51 }
 0x3c8   :  { %v8090_v7 = vpop.f32.mrf.mxu0 }
 0x3cb   :  { %2661 = vmatpush.bf16.msra.mxu2 %v9499_v43  ;;  %2717 = vmatpush.bf16.msra.mxu3 %v9555_v25 }
 0x3ce   :  { %v2642_v54 = vpop.f32.mrf.mxu1 }
 0x3cf   :  { %2662 = vmatpush.bf16.msra.mxu2 %v9500_v30  ;;  %2718 = vmatpush.bf16.msra.mxu3 %v9556_v15 }
 0x3d0   :  { %v2631_v10 = vpop.f32.mrf.mxu0 }
 0x3d2   :  { %2589 = vmatmul.bf16.vlgmr.msrb.gmra.mxu2 %v7963_v38  ;;  %2719 = vmatmul.bf16.vlgmr.msra.gmra.mxu3 %v7963_v38 }
 0x3d3   :  { %2663 = vmatpush.bf16.msra.mxu2 %v9602_v4 }
 0x3d7   :  { %2664 = vmatpush.bf16.msra.mxu2 %v9603_v60  ;;  %v2644_v60 = vpop.f32.mrf.mxu1 }
 0x3d8   :  { %v2655_v41 = vpop.f32.mrf.mxu0 }
 0x3d9   :  { %v8100_v39 = vadd.f32 %v2655_v41, %v2642_v54  ;;  %v6763_v54 = vld [vmem:[#allocation4 + $0x2f8] sm:$0xff] }
 0x3da   :  { %2917 = vmatpush.bf16.msrb.mxu3 %v6763_v54  ;;  %v6758_v54 = vld [vmem:[#allocation4 + $0x2d0] sm:$0xff] }
 0x3db   :  { %2665 = vmatpush.bf16.msra.mxu2 %v9503_v55 }
 0x3df   :  { %2666 = vmatpush.bf16.msra.mxu2 %v9604_v56  ;;  %v2707_v10 = vpop.f32.mrf.mxu1 }
 0x3e0   :  { %v2657_v12 = vpop.f32.mrf.mxu0 }
 0x3e2   :  { %2667 = vmatmul.bf16.vlgmr.msra.gmra.mxu2 %v7963_v38  ;;  %v8107_v38 = vpop.permute.xlu1 %2933 }
 0x3e3   :  { %2729 = vmatpush.bf16.msrb.mxu2 %v9605_v57  ;;  %6124 = vmatmul.msk.bf16.vlgmr.msra.gmra.mxu1 %vm573_vm1, %v8107_v38 }
 0x3e4   :  { %3019 = vmatpush.bf16.msra.mxu1 %v7093_v24 }
 0x3e7   :  { %2730 = vmatpush.bf16.msrb.mxu2 %v9606_v62  ;;  %v2709_v57 = vpop.f32.mrf.mxu1  ;;  %v2932_v62 = vpop.permute.xlu0 %2931 }
 0x3e8   :  { %v2694_v19 = vpop.f32.mrf.mxu0  ;;  %v8112_v41 = vsel %vm2935_vm7, %v2932_v62, %v8107_v38  ;;  %3020 = vmatpush.bf16.msra.mxu1 %v7106_v47  ;;  %v6762_v62 = vld [vmem:[#allocation4 + $0x2f0] sm:$0xff] }
 0x3e9   :  { %v8105_v56 = vadd.f32 %v2707_v10, %v2694_v19  ;;  %2949 = vmatmul.bf16.vlgmr.msrb.gmra.mxu0 %v8112_v41  ;;  %2918 = vmatpush.bf16.msrb.mxu3 %v6762_v62  ;;  %v6761_v19 = vld [vmem:[#allocation4 + $0x2e8] sm:$0xff] }
 0x3ea   :  { %3037 = vmatpush.bf16.msrb.mxu0 %v7163_v29 }
 0x3eb   :  { %2731 = vmatpush.bf16.msrb.mxu2 %v9607_v23 }
 0x3ec   :  { %3021 = vmatpush.bf16.msra.mxu1 %v9393_v50 }
 0x3ed   :  { %2919 = vmatpush.bf16.msrb.mxu3 %v6761_v19  ;;  %v6756_v19 = vld [vmem:[#allocation4 + $0x2c0] sm:$0xff] }
 0x3ee   :  { %3038 = vmatpush.bf16.msrb.mxu0 %v7177_v21 }
 0x3f0   :  { %v2696_v55 = vpop.f32.mrf.mxu0  ;;  %3022 = vmatpush.bf16.msra.mxu1 %v9396_v22 }
 0x3f1   :  { %v6751_v55 = vld [vmem:[#allocation4 + $0x298] sm:$0xff] }
 0x3f2   :  { %6058 = vmatmul.msk.bf16.vlgmr.msrb.gmra.mxu2 %vm573_vm1, %v7958_v49  ;;  %3039 = vmatpush.bf16.msrb.mxu0 %v7192_v28 }
 0x3f3   :  { %6125 = vmatmul.msk.bf16.vlgmr.msrb.gmra.mxu1 %vm573_vm1, %v8107_v38 }
 0x3f4   :  { %3023 = vmatpush.bf16.msra.mxu1 %v9399_v45 }
 0x3f5   :  { %v2746_v60 = vpop.f32.mrf.mxu1 }
 0x3f8   :  { %3024 = vmatpush.bf16.msra.mxu1 %v9402_v16 }
 0x3f9   :  { %6126 = vmatmul.msk.bf16.vlgmr.msra.gmra.mxu0 %vm573_vm1, %v8107_v38 }
 0x3fa   :  { %3071 = vmatpush.bf16.msra.mxu0 %v9395_v36 }
 0x3fb   :  { %v2759_v49 = vpop.f32.mrf.mxu0 }
 0x3fc   :  { %v8117_v57 = vadd.f32 %v2759_v49, %v2746_v60  ;;  %v6760_v49 = vld [vmem:[#allocation4 + $0x2e0] sm:$0xff]  ;;  %v6759_v60 = vld [vmem:[#allocation4 + $0x2d8] sm:$0xff]  ;;  %3025 = vmatpush.bf16.msra.mxu1 %v9405_v42 }
 0x3fd   :  { %v2748_v10 = vpop.f32.mrf.mxu1  ;;  %2920 = vmatpush.bf16.msrb.mxu3 %v6760_v49  ;;  %v6754_v49 = vld [vmem:[#allocation4 + $0x2b0] sm:$0xff] }
 0x3fe   :  { %3072 = vmatpush.bf16.msra.mxu0 %v9398_v17  ;;  %v6755_v10 = vld [vmem:[#allocation4 + $0x2b8] sm:$0xff] }
 0x3ff   :  { %2904 = vmatpush.bf16.msra.mxu2 %v6755_v10 }
 0x400   :  { %3026 = vmatpush.bf16.msra.mxu1 %v9408_v53 }
 0x401   :  { %2921 = vmatpush.bf16.msrb.mxu3 %v6759_v60 }
 0x402   :  { %3073 = vmatpush.bf16.msra.mxu0 %v9401_v37 }
 0x403   :  { %v2761_v12 = vpop.f32.mrf.mxu0  ;;  %3027 = vmatmul.bf16.vlgmr.msra.gmra.mxu1 %v8112_v41  ;;  %2905 = vmatpush.bf16.msra.mxu2 %v6754_v49  ;;  %v9608_v49 = vld [vmem:[#allocation88_spill] sm:$0xff] }
 0x404   :  { %3089 = vmatpush.bf16.msrb.mxu1 %v7245_v1  ;;  %v6757_v12 = vld [vmem:[#allocation4 + $0x2c8] sm:$0xff] }
 0x405   :  { %2922 = vmatpush.bf16.msrb.mxu3 %v6758_v54  ;;  %v6753_v54 = vld [vmem:[#allocation4 + $0x2a8] sm:$0xff] }
 0x406   :  { %3074 = vmatpush.bf16.msra.mxu0 %v9404_v63 }
 0x407   :  { %2906 = vmatpush.bf16.msra.mxu2 %v6753_v54  ;;  %v9610_v54 = vld [vmem:[#allocation71_spill] sm:$0xff] }
 0x408   :  { %3090 = vmatpush.bf16.msrb.mxu1 %v7261_v11 }
 0x409   :  { %6127 = vmatmul.msk.bf16.vlgmr.msrb.gmra.mxu0 %vm573_vm1, %v8107_v38  ;;  %2923 = vmatpush.bf16.msrb.mxu3 %v6757_v12  ;;  %v6752_v12 = vld [vmem:[#allocation4 + $0x2a0] sm:$0xff] }
 0x40a   :  { %3075 = vmatpush.bf16.msra.mxu0 %v9409_v33 }
 0x40b   :  { %2907 = vmatpush.bf16.msra.mxu2 %v6752_v12  ;;  %v9611_v12 = vld [vmem:[#allocation33_spill] sm:$0xff] }
 0x40c   :  { %3091 = vmatpush.bf16.msrb.mxu1 %v7274_v61 }
 0x40d   :  { %2924 = vmatpush.bf16.msrb.mxu3 %v6756_v19 }
 0x40e   :  { %3076 = vmatpush.bf16.msra.mxu0 %v9411_v58  ;;  %v9620_v58 = vld [vmem:[#allocation10_spill] sm:$0xff] }
 0x40f   :  { %2908 = vmatpush.bf16.msra.mxu2 %v6751_v55  ;;  %v9618_v55 = vld [vmem:[#allocation41_spill] sm:$0xff] }
 0x410   :  { %3123 = vmatpush.bf16.msra.mxu1 %v7288_v6 }
 0x411   :  { %2993 = vmatpush.bf16.msra.mxu3 %v9435_v59 }
 0x412   :  { %3077 = vmatpush.bf16.msra.mxu0 %v9414_v34  ;;  %v9617_v34 = vld [vmem:[#allocation8_spill] sm:$0xff] }
 0x413   :  { %6129 = vmatmul.msk.bf16.vlgmr.msrb.gmra.mxu1 %vm573_vm1, %v8107_v38 }
 0x414   :  { %3124 = vmatpush.bf16.msra.mxu1 %v7297_v52  ;;  %v9615_v52 = vld [vmem:[#allocation90_spill] sm:$0xff] }
 0x415   :  { %2994 = vmatpush.bf16.msra.mxu3 %v9437_v32  ;;  %v9616_v32 = vld [vmem:[#allocation79_spill] sm:$0xff] }
 0x418   :  { %3125 = vmatpush.bf16.msra.mxu1 %v9608_v49  ;;  %v9614_v49 = vld [vmem:[#allocation36_spill] sm:$0xff] }
 0x419   :  { %2995 = vmatpush.bf16.msra.mxu3 %v9438_v44  ;;  %v9612_v44 = vld [vmem:[#allocation89_spill] sm:$0xff] }
 0x41c   :  { %3126 = vmatpush.bf16.msra.mxu1 %v9612_v44  ;;  %v9619_v44 = vld [vmem:[#allocation91_spill] sm:$0xff] }
 0x41d   :  { %2996 = vmatpush.bf16.msra.mxu3 %v9611_v12  ;;  %v6748_v12 = vld [vmem:[#allocation4 + $0x280] sm:$0xff] }
 0x420   :  { %3127 = vmatpush.bf16.msra.mxu1 %v9615_v52  ;;  %v9621_v52 = vld [vmem:[#allocation9_spill] sm:$0xff] }
 0x421   :  { %2997 = vmatpush.bf16.msra.mxu3 %v9614_v49 }
 0x424   :  { %3128 = vmatpush.bf16.msra.mxu1 %v9619_v44  ;;  %v9626_v44 = vld [vmem:[#allocation93_spill] sm:$0xff] }
 0x425   :  { %v2540_v62 = vpop.f32.mrf.mxu3  ;;  %2998 = vmatpush.bf16.msra.mxu3 %v9618_v55  ;;  %v9625_v55 = vld [vmem:[#allocation49_spill] sm:$0xff] }
 0x428   :  { %3129 = vmatpush.bf16.msra.mxu1 %v9570_v0 }
 0x429   :  { %2999 = vmatpush.bf16.msra.mxu3 %v9515_v27 }
 0x42c   :  { %3130 = vmatpush.bf16.msra.mxu1 %v9626_v44  ;;  %v9633_v44 = vld [vmem:[#allocation22_spill] sm:$0xff] }
 0x42d   :  { %v2542_v60 = vpop.f32.mrf.mxu3  ;;  %3000 = vmatpush.bf16.msra.mxu3 %v9625_v55  ;;  %v9632_v55 = vld [vmem:[#allocation24_spill] sm:$0xff] }
 0x42e   :  { %v9609_v60 = vld [vmem:[#allocation68_spill] sm:$0xff] }
 0x42f   :  { %3078 = vmatpush.bf16.msra.mxu0 %v9609_v60  ;;  %3131 = vmatmul.bf16.vlgmr.msra.gmra.mxu1 %v8112_v41 }
 0x432   :  { %3079 = vmatmul.bf16.vlgmr.msra.gmra.mxu0 %v8112_v41 }
 0x433   :  { %3141 = vmatpush.bf16.msrb.mxu0 %v9610_v54  ;;  %v6749_v54 = vld [vmem:[#allocation4 + $0x288] sm:$0xff] }
 0x435   :  { %v2616_v10 = vpop.f32.mrf.mxu3 }
 0x436   :  { %v8153_v19 = vadd.f32 %v8090_v7, %v2616_v10  ;;  %v6750_v7 = vld [vmem:[#allocation4 + $0x290] sm:$0xff]  ;;  %v9613_v10 = vld [vmem:[#allocation75_spill] sm:$0xff] }
 0x437   :  { %3142 = vmatpush.bf16.msrb.mxu0 %v9613_v10  ;;  %2909 = vmatpush.bf16.msra.mxu2 %v6750_v7 }
 0x43b   :  { %3143 = vmatpush.bf16.msrb.mxu0 %v9616_v32  ;;  %2910 = vmatpush.bf16.msra.mxu2 %v6749_v54  ;;  %v9622_v32 = vld [vmem:[#allocation39_spill] sm:$0xff]  ;;  %v9624_v54 = vld [vmem:[#allocation16_spill] sm:$0xff] }
 0x43d   :  { %v2618_v60 = vpop.f32.mrf.mxu3 }
 0x43f   :  { %3333 = vmatpush.bf16.msra.mxu0 %v9617_v34  ;;  %2911 = vmatpush.bf16.msra.mxu2 %v6748_v12  ;;  %v9628_v12 = vld [vmem:[#allocation11_spill] sm:$0xff] }
 0x440   :  { %3351 = vmatpush.bf16.msrb.mxu1 %v9628_v12  ;;  %v9635_v12 = vld [vmem:[#allocation18_spill] sm:$0xff] }
 0x442   :  { %6131 = vmatmul.msk.bf16.vlgmr.msrb.gmra.mxu0 %vm573_vm1, %v8107_v38 }
 0x443   :  { %3334 = vmatpush.bf16.msra.mxu0 %v9620_v58  ;;  %2967 = vmatpush.bf16.msrb.mxu2 %v9621_v52  ;;  %v9627_v58 = vld [vmem:[#allocation13_spill] sm:$0xff] }
 0x445   :  { %v2527_v10 = vpop.f32.mrf.mxu2  ;;  %v2681_v60 = vpop.f32.mrf.mxu3 }
 0x446   :  { %v2541_v7 = vadd.f32 %v2540_v62, %v2527_v10  ;;  %v9629_v62 = vld [vmem:[#allocation20_spill] sm:$0xff] }
 0x447   :  { %3335 = vmatpush.bf16.msra.mxu0 %v9624_v54  ;;  %2968 = vmatpush.bf16.msrb.mxu2 %v9627_v58  ;;  %v3318_v58 = vld [vmem:[%s9052_s0 + $0x20] sm:$0xff] }
 0x448   :  { %v8177_v34 = vadd.f32 %v2541_v7, %v9622_v32  ;;  %v9630_v32 = vld [vmem:[#allocation17_spill] sm:$0xff]  ;;  %v9631_v7 = vld [vmem:[#allocation14_spill] sm:$0xff]  ;;  %v8195_v54 = vpack.c.bf16 %v3318_v58, %v3318_v58  ;;  %v9639_v58 = vld [vmem:[#allocation15_spill] sm:$0xff] }
 0x449   :  { %3352 = vmatpush.bf16.msrb.mxu1 %v9631_v7 }
 0x44a   :  { %9623 = vst [vmem:[#allocation43_spill] sm:$0xff] %v8177_v34  ;;  %3325 = vrot.lane.b32.xlu0 %v8195_v54, %s6948_s10  ;;  %v9640_v34 = vld [vmem:[#allocation32_spill] sm:$0xff] }
 0x44b   :  { %3336 = vmatpush.bf16.msra.mxu0 %v9629_v62  ;;  %2969 = vmatpush.bf16.msrb.mxu2 %v9630_v32  ;;  %9634 = vst [vmem:[#allocation48_spill] sm:$0xff] %v8195_v54  ;;  %v9637_v32 = vld [vmem:[#allocation28_spill] sm:$0xff]  ;;  %v9638_v62 = vld [vmem:[#allocation27_spill] sm:$0xff] }
 0x44d   :  { %v2529_v10 = vpop.f32.mrf.mxu2  ;;  %v2683_v52 = vpop.f32.mrf.mxu3  ;;  %3353 = vmatpush.bf16.msrb.mxu1 %v9635_v12  ;;  %v9641_v12 = vmax.f32 %v8105_v56, %v8117_v57  ;;  %v9645_v56 = vld [vmem:[#allocation26_spill] sm:$0xff]  ;;  %v9646_v57 = vld [vmem:[#allocation67_spill] sm:$0xff] }
 0x44e   :  { %v9636_v52 = vld [vmem:[#allocation12_spill] sm:$0xff] }
 0x44f   :  { %3337 = vmatpush.bf16.msra.mxu0 %v9632_v55  ;;  %2970 = vmatpush.bf16.msrb.mxu2 %v9633_v44 }
 0x451   :  { %3377 = vmatpush.bf16.msra.mxu1 %v9636_v52 }
 0x453   :  { %3338 = vmatpush.bf16.msra.mxu0 %v9637_v32  ;;  %2971 = vmatpush.bf16.msrb.mxu2 %v9638_v62 }
 0x455   :  { %v2590_v10 = vpop.f32.mrf.mxu2  ;;  %v2720_v7 = vpop.f32.mrf.mxu3  ;;  %3378 = vmatpush.bf16.msra.mxu1 %v9639_v58 }
 0x456   :  { %v2604_v55 = vadd.f32 %v8092_v31, %v2590_v10 }
 0x457   :  { %3339 = vmatpush.bf16.msra.mxu0 %v9640_v34  ;;  %2972 = vmatpush.bf16.msrb.mxu2 %v9535_v46  ;;  %v9643_v34 = vld [vmem:[#allocation37_spill] sm:$0xff] }
 0x458   :  { %v2764_v44 = vmax.f32 %v2604_v55, %v8100_v39  ;;  %v9642_v39 = vld [vmem:[#allocation23_spill] sm:$0xff] }
 0x459   :  { %3379 = vmatpush.bf16.msra.mxu1 %v9590_v40 }
 0x45a   :  { %v2768_v0 = vmax.f32 %v2764_v44, %v9641_v12  ;;  %v9644_v44 = vld [vmem:[#allocation62_spill] sm:$0xff] }
 0x45b   :  { %3340 = vmatpush.bf16.msra.mxu0 %v9591_v3  ;;  %2973 = vmatpush.bf16.msrb.mxu2 %v9593_v9  ;;  %v9647_v12 = vld [vmem:[#allocation30_spill] sm:$0xff] }
 0x45c   :  { %v2770_v52 = vadd.f32 %v2768_v0, %v9589_v8 }
 0x45d   :  { %v2592_v32 = vpop.f32.mrf.mxu2  ;;  %v2722_v31 = vpop.f32.mrf.mxu3 }
 0x45e   :  { %v2772_v10 = vmax.f32 %v2770_v52, 0.0  ;;  %v9648_v32 = vld [vmem:[#allocation72_spill] sm:$0xff]  ;;  %v3317_v52 = vld [vmem:[%s9052_s0 + $0x18] sm:$0xff] }
 0x45f   :  { %3403 = vmatpush.bf16.msrb.mxu0 %v9642_v39  ;;  %2974 = vmatpush.bf16.msrb.mxu2 %v9643_v34  ;;  %v8225_v31 = vpack.c.bf16 %v3317_v52, %v3317_v52 }
 0x460   :  { %v2774_v55 = vpack.c.bf16 %v2772_v10, %v2772_v10 }
 0x461   :  { %9649 = vst [vmem:[#allocation53_spill] sm:$0xff] %v8225_v31  ;;  %3323 = vrot.lane.b32.xlu2 %v8225_v31, %s6948_s10  ;;  %3709 = vrot.lane.b32.xlu1 %v8225_v31, %s6941_s13 }
 0x462   :  { %2925 = vmatmul.bf16.vlgmr.msrb.gmra.mxu3 %v2774_v55 }
 0x463   :  { %3063 = vmatpush.bf16.msrb.mxu3 %v9644_v44  ;;  %3404 = vmatpush.bf16.msrb.mxu0 %v9645_v56 }
 0x465   :  { %v2668_v0 = vpop.f32.mrf.mxu2 }
 0x467   :  { %3064 = vmatpush.bf16.msrb.mxu3 %v9646_v57  ;;  %3405 = vmatpush.bf16.msrb.mxu0 %v9647_v12  ;;  %v2682_v57 = vadd.f32 %v2681_v60, %v2668_v0 }
 0x469   :  { %3711 = vrot.lane.b32.xlu2 %v8195_v54, %s6941_s13  ;;  %s6949_s13 = smov 8  }
 0x46b   :  { %3065 = vmatpush.bf16.msrb.mxu3 %v9648_v32 }
 0x46d   :  { %v2670_v10 = vpop.f32.mrf.mxu2 }
 0x46e   :  { %v9650_v10 = vmax.f32 %v8079_v5, %v8153_v19  ;;  %v2963_v5 = vpop.f32.mrf.mxu1 }
 0x472   :  { %3001 = vmatmul.bf16.vlgmr.msra.gmra.mxu3 %v8112_v41 }
 0x473   :  { %3097 = vmatpush.bf16.msra.mxu3 %v9600_v2 }
 0x475   :  { %v2733_v55 = vpop.f32.mrf.mxu2 }
 0x476   :  { %v2734_v32 = vadd.f32 %v2733_v55, %v2720_v7  ;;  %v2950_v7 = vpop.f32.mrf.mxu0 }
 0x477   :  { %3098 = vmatpush.bf16.msra.mxu3 %v9549_v26  ;;  %v8246_v19 = vadd.f32 %v2963_v5, %v2950_v7 }
 0x478   :  { %v2765_v52 = vmax.f32 %v2682_v57, %v2734_v32  ;;  %v9652_v32 = vld [vmem:[#allocation65_spill] sm:$0xff] }
 0x47a   :  { %v2767_v12 = vmax.f32 %v9650_v10, %v2765_v52  ;;  %v9653_v52 = vld [vmem:[#allocation69_spill] sm:$0xff] }
 0x47b   :  { %3099 = vmatpush.bf16.msra.mxu3 %v9551_v13  ;;  %v9654_v10 = vld [vmem:[#allocation73_spill] sm:$0xff] }
 0x47c   :  { %v2769_v31 = vadd.f32 %v2767_v12, %v9496_v14  ;;  %v9651_v12 = vld [vmem:[#allocation61_spill] sm:$0xff] }
 0x47d   :  { %v2735_v34 = vpop.f32.mrf.mxu2 }
 0x47e   :  { %v2771_v44 = vmax.f32 %v2769_v31, 0.0  ;;  %v2952_v34 = vpop.f32.mrf.mxu0 }
 0x47f   :  { %3100 = vmatpush.bf16.msra.mxu3 %v9552_v18 }
 0x480   :  { %v2773_v60 = vpack.c.bf16 %v2771_v44, %v2771_v44  ;;  %v2965_v44 = vpop.f32.mrf.mxu1 }
 0x482   :  { %2912 = vmatmul.bf16.vlgmr.msra.gmra.mxu2 %v2773_v60  ;;  %6128 = vmatmul.msk.bf16.vlgmr.msrb.gmra.mxu3 %vm573_vm1, %v8107_v38  ;;  %v9655_v60 = vld [vmem:[#allocation77_spill] sm:$0xff] }
 0x483   :  { %3045 = vmatpush.bf16.msra.mxu2 %v9497_v48  ;;  %3101 = vmatpush.bf16.msra.mxu3 %v9553_v35 }
 0x486   :  { %v8257_v0 = vpop.f32.mrf.mxu0 }
 0x487   :  { %3046 = vmatpush.bf16.msra.mxu2 %v9498_v20  ;;  %3102 = vmatpush.bf16.msra.mxu3 %v9554_v51 }
 0x488   :  { %v8259_v57 = vpop.f32.mrf.mxu1 }
 0x48b   :  { %3047 = vmatpush.bf16.msra.mxu2 %v9499_v43  ;;  %3103 = vmatpush.bf16.msra.mxu3 %v9555_v25 }
 0x48e   :  { %v3017_v31 = vpop.f32.mrf.mxu0 }
 0x48f   :  { %3048 = vmatpush.bf16.msra.mxu2 %v9500_v30  ;;  %3104 = vmatpush.bf16.msra.mxu3 %v9556_v15 }
 0x490   :  { %v2991_v55 = vpop.f32.mrf.mxu1 }
 0x492   :  { %2975 = vmatmul.bf16.vlgmr.msrb.gmra.mxu2 %v8112_v41  ;;  %3105 = vmatmul.bf16.vlgmr.msra.gmra.mxu3 %v8112_v41 }
 0x493   :  { %3049 = vmatpush.bf16.msra.mxu2 %v9602_v4 }
 0x496   :  { %v3041_v7 = vpop.f32.mrf.mxu0 }
 0x497   :  { %3050 = vmatpush.bf16.msra.mxu2 %v9651_v12 }
 0x498   :  { %v3028_v5 = vpop.f32.mrf.mxu1 }
 0x499   :  { %v8267_v34 = vadd.f32 %v3041_v7, %v3028_v5 }
 0x49b   :  { %3051 = vmatpush.bf16.msra.mxu2 %v9652_v32 }
 0x49e   :  { %v3043_v44 = vpop.f32.mrf.mxu0 }
 0x49f   :  { %3052 = vmatpush.bf16.msra.mxu2 %v9653_v52 }
 0x4a0   :  { %v3030_v54 = vpop.f32.mrf.mxu1 }
 0x4a2   :  { %3053 = vmatmul.bf16.vlgmr.msra.gmra.mxu2 %v8112_v41 }
 0x4a3   :  { %3115 = vmatpush.bf16.msrb.mxu2 %v9654_v10 }
 0x4a7   :  { %3116 = vmatpush.bf16.msrb.mxu2 %v9655_v60 }
 0x4a8   :  { %v3093_v31 = vpop.f32.mrf.mxu1 }
 0x4ab   :  { %3117 = vmatpush.bf16.msrb.mxu2 %v9607_v23 }
 0x4af   :  { %v3080_v55 = vpop.f32.mrf.mxu0 }
 0x4b0   :  { %v8272_v52 = vadd.f32 %v3093_v31, %v3080_v55  ;;  %v3095_v10 = vpop.f32.mrf.mxu1  ;;  %v6778_v31 = vld [vmem:[#allocation4 + $0x370] sm:$0xff] }
 0x4b1   :  { %v6779_v10 = vld [vmem:[#allocation4 + $0x378] sm:$0xff] }
 0x4b2   :  { %6130 = vmatmul.msk.bf16.vlgmr.msrb.gmra.mxu2 %vm573_vm1, %v8107_v38  ;;  %3303 = vmatpush.bf16.msrb.mxu3 %v6779_v10  ;;  %v6775_v10 = vld [vmem:[#allocation4 + $0x358] sm:$0xff] }
 0x4b6   :  { %3304 = vmatpush.bf16.msrb.mxu3 %v6778_v31  ;;  %v6774_v31 = vld [vmem:[#allocation4 + $0x350] sm:$0xff] }
 0x4b7   :  { %v3082_v32 = vpop.f32.mrf.mxu0 }
 0x4b8   :  { %v3132_v38 = vpop.f32.mrf.mxu1  ;;  %v6769_v32 = vld [vmem:[#allocation4 + $0x328] sm:$0xff] }
 0x4bb   :  { %v3324_v5 = vpop.permute.xlu2 %3323 }
 0x4bc   :  { %v8274_v41 = vpop.permute.xlu0 %3325 }
 0x4bd   :  { %6196 = vmatmul.msk.bf16.vlgmr.msrb.gmra.mxu1 %vm573_vm1, %v8274_v41  ;;  %v8280_v54 = vsel %vm3327_vm8, %v3324_v5, %v8274_v41 }
 0x4be   :  { %3411 = vmatpush.bf16.msrb.mxu1 %v7093_v24  ;;  %3341 = vmatmul.bf16.vlgmr.msra.gmra.mxu0 %v8280_v54 }
 0x4bf   :  { %v3145_v7 = vpop.f32.mrf.mxu0  ;;  %3429 = vmatpush.bf16.msra.mxu0 %v7163_v29 }
 0x4c0   :  { %v8283_v44 = vadd.f32 %v3145_v7, %v3132_v38  ;;  %v3134_v5 = vpop.f32.mrf.mxu1  ;;  %v6777_v7 = vld [vmem:[#allocation4 + $0x368] sm:$0xff]  ;;  %v6776_v38 = vld [vmem:[#allocation4 + $0x360] sm:$0xff] }
 0x4c1   :  { %3305 = vmatpush.bf16.msrb.mxu3 %v6777_v7  ;;  %v6773_v5 = vld [vmem:[#allocation4 + $0x348] sm:$0xff]  ;;  %v6771_v7 = vld [vmem:[#allocation4 + $0x338] sm:$0xff] }
 0x4c2   :  { %3412 = vmatpush.bf16.msrb.mxu1 %v7106_v47  ;;  %3290 = vmatpush.bf16.msra.mxu2 %v6771_v7  ;;  %v9657_v7 = vld [vmem:[#allocation25_spill] sm:$0xff] }
 0x4c3   :  { %3430 = vmatpush.bf16.msra.mxu0 %v7177_v21 }
 0x4c5   :  { %3306 = vmatpush.bf16.msrb.mxu3 %v6776_v38  ;;  %v6772_v38 = vld [vmem:[#allocation4 + $0x340] sm:$0xff] }
 0x4c6   :  { %3413 = vmatpush.bf16.msrb.mxu1 %v9393_v50 }
 0x4c7   :  { %v3147_v55 = vpop.f32.mrf.mxu0  ;;  %3431 = vmatpush.bf16.msra.mxu0 %v7192_v28 }
 0x4c9   :  { %3307 = vmatpush.bf16.msrb.mxu3 %v6775_v10  ;;  %v6770_v10 = vld [vmem:[#allocation4 + $0x330] sm:$0xff] }
 0x4ca   :  { %3414 = vmatpush.bf16.msrb.mxu1 %v9396_v22  ;;  %3291 = vmatpush.bf16.msra.mxu2 %v6770_v10  ;;  %v9660_v10 = vld [vmem:[#allocation29_spill] sm:$0xff] }
 0x4cd   :  { %6197 = vmatmul.msk.bf16.vlgmr.msra.gmra.mxu1 %vm573_vm1, %v8274_v41  ;;  %3308 = vmatpush.bf16.msrb.mxu3 %v6774_v31 }
 0x4ce   :  { %3415 = vmatpush.bf16.msrb.mxu1 %v9399_v45  ;;  %6198 = vmatmul.msk.bf16.vlgmr.msrb.gmra.mxu0 %vm573_vm1, %v8274_v41 }
 0x4cf   :  { %3463 = vmatpush.bf16.msrb.mxu0 %v9395_v36  ;;  %3292 = vmatpush.bf16.msra.mxu2 %v6769_v32  ;;  %v9668_v32 = vld [vmem:[#allocation79_spill] sm:$0xff] }
 0x4d1   :  { %3309 = vmatpush.bf16.msrb.mxu3 %v6773_v5  ;;  %v9656_v5 = vld [vmem:[#allocation59_spill] sm:$0xff] }
 0x4d2   :  { %3416 = vmatpush.bf16.msrb.mxu1 %v9402_v16 }
 0x4d3   :  { %3464 = vmatpush.bf16.msrb.mxu0 %v9398_v17 }
 0x4d5   :  { %3310 = vmatpush.bf16.msrb.mxu3 %v6772_v38 }
 0x4d6   :  { %3417 = vmatpush.bf16.msrb.mxu1 %v9405_v42 }
 0x4d7   :  { %3465 = vmatpush.bf16.msrb.mxu0 %v9401_v37 }
 0x4d9   :  { %3385 = vmatpush.bf16.msra.mxu3 %v9435_v59  ;;  %v9661_v59 = vld [vmem:[#allocation88_spill] sm:$0xff] }
 0x4da   :  { %3418 = vmatpush.bf16.msrb.mxu1 %v9408_v53 }
 0x4db   :  { %3466 = vmatpush.bf16.msrb.mxu0 %v9404_v63  ;;  %v9659_v63 = vld [vmem:[#allocation64_spill] sm:$0xff] }
 0x4dd   :  { %3419 = vmatmul.bf16.vlgmr.msrb.gmra.mxu1 %v8280_v54  ;;  %3386 = vmatpush.bf16.msra.mxu3 %v9657_v7 }
 0x4de   :  { %3481 = vmatpush.bf16.msra.mxu1 %v7245_v1  ;;  %6199 = vmatmul.msk.bf16.vlgmr.msra.gmra.mxu0 %vm573_vm1, %v8274_v41 }
 0x4df   :  { %3467 = vmatpush.bf16.msrb.mxu0 %v9409_v33  ;;  %v6768_v33 = vld [vmem:[#allocation4 + $0x320] sm:$0xff] }
 0x4e0   :  { %3293 = vmatpush.bf16.msra.mxu2 %v6768_v33  ;;  %v9664_v33 = vld [vmem:[#allocation33_spill] sm:$0xff] }
 0x4e1   :  { %3387 = vmatpush.bf16.msra.mxu3 %v9660_v10  ;;  %v9667_v10 = vld [vmem:[#allocation90_spill] sm:$0xff] }
 0x4e2   :  { %3482 = vmatpush.bf16.msra.mxu1 %v7261_v11  ;;  %v9658_v11 = vld [vmem:[#allocation87_spill] sm:$0xff] }
 0x4e3   :  { %3468 = vmatpush.bf16.msrb.mxu0 %v9656_v5  ;;  %v6767_v5 = vld [vmem:[#allocation4 + $0x318] sm:$0xff] }
 0x4e4   :  { %3294 = vmatpush.bf16.msra.mxu2 %v6767_v5  ;;  %v9669_v5 = vld [vmem:[#allocation8_spill] sm:$0xff] }
 0x4e5   :  { %v2926_v55 = vpop.f32.mrf.mxu3  ;;  %3388 = vmatpush.bf16.msra.mxu3 %v9664_v33  ;;  %v9670_v33 = vld [vmem:[#allocation41_spill] sm:$0xff] }
 0x4e6   :  { %3483 = vmatpush.bf16.msra.mxu1 %v7274_v61 }
 0x4e7   :  { %3469 = vmatpush.bf16.msrb.mxu0 %v9659_v63  ;;  %v9663_v63 = vld [vmem:[#allocation71_spill] sm:$0xff] }
 0x4e9   :  { %3389 = vmatpush.bf16.msra.mxu3 %v9614_v49  ;;  %v9674_v49 = vld [vmem:[#allocation9_spill] sm:$0xff] }
 0x4ea   :  { %3515 = vmatpush.bf16.msrb.mxu1 %v7288_v6  ;;  %v9662_v6 = vld [vmem:[#allocation68_spill] sm:$0xff] }
 0x4eb   :  { %3470 = vmatpush.bf16.msrb.mxu0 %v9662_v6 }
 0x4ed   :  { %v2928_v31 = vpop.f32.mrf.mxu3  ;;  %6201 = vmatmul.msk.bf16.vlgmr.msra.gmra.mxu1 %vm573_vm1, %v8274_v41  ;;  %3390 = vmatpush.bf16.msra.mxu3 %v9670_v33  ;;  %v9678_v33 = vld [vmem:[#allocation49_spill] sm:$0xff] }
 0x4ee   :  { %3516 = vmatpush.bf16.msrb.mxu1 %v9658_v11  ;;  %3471 = vmatmul.bf16.vlgmr.msrb.gmra.mxu0 %v8280_v54  ;;  %v6765_v11 = vld [vmem:[#allocation4 + $0x308] sm:$0xff] }
 0x4ef   :  { %3533 = vmatpush.bf16.msra.mxu0 %v9663_v63  ;;  %v6764_v63 = vld [vmem:[#allocation4 + $0x300] sm:$0xff] }
 0x4f1   :  { %3391 = vmatpush.bf16.msra.mxu3 %v9515_v27 }
 0x4f2   :  { %3517 = vmatpush.bf16.msrb.mxu1 %v9661_v59  ;;  %v9666_v59 = vld [vmem:[#allocation75_spill] sm:$0xff] }
 0x4f3   :  { %3534 = vmatpush.bf16.msra.mxu0 %v9666_v59  ;;  %v9680_v59 = vld [vmem:[#allocation13_spill] sm:$0xff] }
 0x4f5   :  { %v3002_v38 = vpop.f32.mrf.mxu3  ;;  %3392 = vmatpush.bf16.msra.mxu3 %v9678_v33  ;;  %v9685_v33 = vld [vmem:[#allocation24_spill] sm:$0xff] }
 0x4f6   :  { %v8319_v31 = vadd.f32 %v8257_v0, %v3002_v38  ;;  %v9665_v0 = vld [vmem:[#allocation89_spill] sm:$0xff]  ;;  %v6766_v38 = vld [vmem:[#allocation4 + $0x310] sm:$0xff] }
 0x4f7   :  { %3518 = vmatpush.bf16.msrb.mxu1 %v9665_v0  ;;  %3295 = vmatpush.bf16.msra.mxu2 %v6766_v38  ;;  %v9671_v0 = vld [vmem:[#allocation91_spill] sm:$0xff] }
 0x4f8   :  { %3535 = vmatpush.bf16.msra.mxu0 %v9668_v32 }
 0x4fb   :  { %3519 = vmatpush.bf16.msrb.mxu1 %v9667_v10  ;;  %3296 = vmatpush.bf16.msra.mxu2 %v6765_v11  ;;  %v9673_v10 = vld [vmem:[#allocation92_spill] sm:$0xff]  ;;  %v9675_v11 = vld [vmem:[#allocation43_spill] sm:$0xff] }
 0x4fc   :  { %3719 = vmatpush.bf16.msrb.mxu0 %v9669_v5  ;;  %v9677_v5 = vld [vmem:[#allocation16_spill] sm:$0xff] }
 0x4fd   :  { %v3004_v6 = vpop.f32.mrf.mxu3 }
 0x4fe   :  { %v9672_v6 = vld [vmem:[#allocation10_spill] sm:$0xff]  ;;  %6203 = vmatmul.msk.bf16.vlgmr.msra.gmra.mxu0 %vm573_vm1, %v8274_v41 }
 0x4ff   :  { %3520 = vmatpush.bf16.msrb.mxu1 %v9671_v0  ;;  %3297 = vmatpush.bf16.msra.mxu2 %v6764_v63  ;;  %v9679_v0 = vld [vmem:[#allocation93_spill] sm:$0xff]  ;;  %v9681_v63 = vld [vmem:[#allocation11_spill] sm:$0xff] }
 0x500   :  { %3720 = vmatpush.bf16.msrb.mxu0 %v9672_v6 }
 0x503   :  { %3521 = vmatpush.bf16.msrb.mxu1 %v9673_v10  ;;  %3359 = vmatpush.bf16.msrb.mxu2 %v9674_v49  ;;  %v9682_v49 = vld [vmem:[#allocation20_spill] sm:$0xff] }
 0x504   :  { %3721 = vmatpush.bf16.msrb.mxu0 %v9677_v5  ;;  %v9688_v10 = vld [vmem:[#allocation12_spill] sm:$0xff] }
 0x505   :  { %v2913_v7 = vpop.f32.mrf.mxu2  ;;  %v3067_v61 = vpop.f32.mrf.mxu3 }
 0x506   :  { %v2927_v38 = vadd.f32 %v2926_v55, %v2913_v7 }
 0x507   :  { %3522 = vmatpush.bf16.msrb.mxu1 %v9679_v0  ;;  %3360 = vmatpush.bf16.msrb.mxu2 %v9680_v59  ;;  %v9686_v0 = vld [vmem:[#allocation22_spill] sm:$0xff] }
 0x508   :  { %v8344_v32 = vadd.f32 %v2927_v38, %v9675_v11  ;;  %3722 = vmatpush.bf16.msrb.mxu0 %v9682_v49  ;;  %v9683_v38 = vld [vmem:[#allocation17_spill] sm:$0xff]  ;;  %v9684_v11 = vld [vmem:[#allocation14_spill] sm:$0xff] }
 0x509   :  { %v9687_v59 = vld [vmem:[#allocation18_spill] sm:$0xff] }
 0x50a   :  { %9676 = vst [vmem:[#allocation96_spill] sm:$0xff] %v8344_v32  ;;  %3523 = vmatmul.bf16.vlgmr.msrb.gmra.mxu1 %v8280_v54 }
 0x50b   :  { %3737 = vmatpush.bf16.msra.mxu1 %v9681_v63  ;;  %3361 = vmatpush.bf16.msrb.mxu2 %v9683_v38 }
 0x50c   :  { %3723 = vmatpush.bf16.msrb.mxu0 %v9685_v33 }
 0x50d   :  { %v2915_v55 = vpop.f32.mrf.mxu2  ;;  %v3069_v7 = vpop.f32.mrf.mxu3 }
 0x50e   :  { %v9689_v55 = vld [vmem:[#allocation28_spill] sm:$0xff] }
 0x50f   :  { %3738 = vmatpush.bf16.msra.mxu1 %v9684_v11  ;;  %3362 = vmatpush.bf16.msrb.mxu2 %v9686_v0  ;;  %v9690_v11 = vld [vmem:[#allocation32_spill] sm:$0xff]  ;;  %v9691_v0 = vmax.f32 %v8272_v52, %v8283_v44  ;;  %v9692_v52 = vld [vmem:[#allocation62_spill] sm:$0xff]  ;;  %v9693_v44 = vld [vmem:[#allocation37_spill] sm:$0xff] }
 0x510   :  { %3724 = vmatpush.bf16.msrb.mxu0 %v9689_v55 }
 0x513   :  { %3739 = vmatpush.bf16.msra.mxu1 %v9687_v59  ;;  %3363 = vmatpush.bf16.msrb.mxu2 %v9638_v62 }
 0x514   :  { %3725 = vmatpush.bf16.msrb.mxu0 %v9690_v11 }
 0x515   :  { %v2976_v5 = vpop.f32.mrf.mxu2  ;;  %v3106_v32 = vpop.f32.mrf.mxu3 }
 0x516   :  { %v2990_v7 = vadd.f32 %v8259_v57, %v2976_v5  ;;  %v9696_v5 = vld [vmem:[#allocation72_spill] sm:$0xff] }
 0x517   :  { %3763 = vmatpush.bf16.msrb.mxu1 %v9688_v10  ;;  %3364 = vmatpush.bf16.msrb.mxu2 %v9535_v46 }
 0x518   :  { %v3150_v38 = vmax.f32 %v2990_v7, %v8267_v34  ;;  %3726 = vmatpush.bf16.msrb.mxu0 %v9591_v3 }
 0x51a   :  { %v3154_v59 = vmax.f32 %v3150_v38, %v9691_v0  ;;  %v9695_v0 = vld [vmem:[#allocation67_spill] sm:$0xff] }
 0x51b   :  { %3764 = vmatpush.bf16.msrb.mxu1 %v9639_v58  ;;  %3365 = vmatpush.bf16.msrb.mxu2 %v9593_v9 }
 0x51c   :  { %v3156_v10 = vadd.f32 %v3154_v59, %v9589_v8  ;;  %3789 = vmatpush.bf16.msra.mxu0 %v9642_v39 }
 0x51d   :  { %v2978_v33 = vpop.f32.mrf.mxu2  ;;  %v3108_v55 = vpop.f32.mrf.mxu3 }
 0x51e   :  { %v3158_v57 = vmax.f32 %v3156_v10, 0.0  ;;  %v9694_v33 = vld [vmem:[#allocation30_spill] sm:$0xff] }
 0x51f   :  { %3765 = vmatpush.bf16.msrb.mxu1 %v9590_v40  ;;  %3366 = vmatpush.bf16.msrb.mxu2 %v9693_v44 }
 0x520   :  { %v3160_v34 = vpack.c.bf16 %v3158_v57, %v3158_v57  ;;  %3790 = vmatpush.bf16.msra.mxu0 %v9645_v56 }
 0x522   :  { %3311 = vmatmul.bf16.vlgmr.msrb.gmra.mxu3 %v3160_v34  ;;  %v9697_v34 = vmax.f32 %v8246_v19, %v8319_v31 }
 0x523   :  { %3455 = vmatpush.bf16.msrb.mxu3 %v9692_v52 }
 0x524   :  { %3791 = vmatpush.bf16.msra.mxu0 %v9694_v33 }
 0x525   :  { %v3054_v59 = vpop.f32.mrf.mxu2 }
 0x526   :  { %v3068_v55 = vadd.f32 %v3067_v61, %v3054_v59 }
 0x527   :  { %3456 = vmatpush.bf16.msrb.mxu3 %v9695_v0 }
 0x52b   :  { %3457 = vmatpush.bf16.msrb.mxu3 %v9696_v5 }
 0x52d   :  { %v3056_v10 = vpop.f32.mrf.mxu2 }
 0x532   :  { %3393 = vmatmul.bf16.vlgmr.msra.gmra.mxu3 %v8280_v54 }
 0x533   :  { %3489 = vmatpush.bf16.msra.mxu3 %v9600_v2 }
 0x535   :  { %v3119_v38 = vpop.f32.mrf.mxu2 }
 0x536   :  { %v3120_v7 = vadd.f32 %v3119_v38, %v3106_v32  ;;  %v9699_v38 = vld [vmem:[#allocation69_spill] sm:$0xff] }
 0x537   :  { %3490 = vmatpush.bf16.msra.mxu3 %v9549_v26 }
 0x538   :  { %v3151_v57 = vmax.f32 %v3068_v55, %v3120_v7  ;;  %v9700_v7 = vld [vmem:[#allocation73_spill] sm:$0xff] }
 0x53a   :  { %v3153_v52 = vmax.f32 %v9697_v34, %v3151_v57  ;;  %v3355_v61 = vpop.f32.mrf.mxu1 }
 0x53b   :  { %3491 = vmatpush.bf16.msra.mxu3 %v9551_v13  ;;  %v3342_v19 = vpop.f32.mrf.mxu0 }
 0x53c   :  { %v3155_v0 = vadd.f32 %v3153_v52, %v9496_v14  ;;  %v8397_v31 = vadd.f32 %v3355_v61, %v3342_v19  ;;  %v9701_v19 = vld [vmem:[#allocation48_spill] sm:$0xff] }
 0x53d   :  { %v3121_v5 = vpop.f32.mrf.mxu2  ;;  %4106 = vrot.lane.b32.xlu1 %v9701_v19, %s6949_s13 }
 0x53e   :  { %v3157_v10 = vmax.f32 %v3155_v0, 0.0  ;;  %v9698_v0 = vld [vmem:[#allocation65_spill] sm:$0xff] }
 0x53f   :  { %3492 = vmatpush.bf16.msra.mxu3 %v9552_v18 }
 0x540   :  { %v3159_v33 = vpack.c.bf16 %v3157_v10, %v3157_v10 }
 0x542   :  { %3298 = vmatmul.bf16.vlgmr.msra.gmra.mxu2 %v3159_v33  ;;  %6200 = vmatmul.msk.bf16.vlgmr.msrb.gmra.mxu3 %vm573_vm1, %v8274_v41  ;;  %v3357_v32 = vpop.f32.mrf.mxu1 }
 0x543   :  { %3437 = vmatpush.bf16.msra.mxu2 %v9497_v48  ;;  %3493 = vmatpush.bf16.msra.mxu3 %v9553_v35  ;;  %v3344_v52 = vpop.f32.mrf.mxu0  ;;  %v9702_v32 = vld [vmem:[#allocation53_spill] sm:$0xff] }
 0x544   :  { %4104 = vrot.lane.b32.xlu0 %v9702_v32, %s6949_s13 }
 0x547   :  { %3438 = vmatpush.bf16.msra.mxu2 %v9498_v20  ;;  %3494 = vmatpush.bf16.msra.mxu3 %v9554_v51 }
 0x54a   :  { %v8406_v59 = vpop.f32.mrf.mxu1 }
 0x54b   :  { %3439 = vmatpush.bf16.msra.mxu2 %v9499_v43  ;;  %3495 = vmatpush.bf16.msra.mxu3 %v9555_v25  ;;  %v8409_v33 = vpop.f32.mrf.mxu0 }
 0x54c   :  { %4493 = vrot.lane.b32.xlu0 %v9701_v19, %s6950_s15 }
 0x54f   :  { %3440 = vmatpush.bf16.msra.mxu2 %v9500_v30  ;;  %3496 = vmatpush.bf16.msra.mxu3 %v9556_v15 }
 0x552   :  { %3367 = vmatmul.bf16.vlgmr.msrb.gmra.mxu2 %v8280_v54  ;;  %3497 = vmatmul.bf16.vlgmr.msra.gmra.mxu3 %v8280_v54  ;;  %v3383_v5 = vpop.f32.mrf.mxu1 }
 0x553   :  { %3441 = vmatpush.bf16.msra.mxu2 %v9602_v4  ;;  %v3409_v55 = vpop.f32.mrf.mxu0 }
 0x557   :  { %3442 = vmatpush.bf16.msra.mxu2 %v9651_v12 }
 0x55a   :  { %v3420_v57 = vpop.f32.mrf.mxu1 }
 0x55b   :  { %3443 = vmatpush.bf16.msra.mxu2 %v9698_v0  ;;  %v3433_v34 = vpop.f32.mrf.mxu0 }
 0x55c   :  { %v8417_v10 = vadd.f32 %v3433_v34, %v3420_v57  ;;  %v8427_v57 = vpop.permute.xlu2 %3711  ;;  %v3710_v34 = vpop.permute.xlu1 %3709 }
 0x55d   :  { %6268 = vmatmul.msk.bf16.vlgmr.msra.gmra.mxu1 %vm573_vm1, %v8427_v57 }
 0x55e   :  { %3797 = vmatpush.bf16.msra.mxu1 %v7093_v24 }
 0x55f   :  { %3444 = vmatpush.bf16.msra.mxu2 %v9699_v38 }
 0x562   :  { %3445 = vmatmul.bf16.vlgmr.msra.gmra.mxu2 %v8280_v54  ;;  %v3422_v61 = vpop.f32.mrf.mxu1  ;;  %3798 = vmatpush.bf16.msra.mxu1 %v7106_v47 }
 0x563   :  { %3507 = vmatpush.bf16.msrb.mxu2 %v9700_v7  ;;  %v3435_v52 = vpop.f32.mrf.mxu0  ;;  %v8432_v61 = vsel %vm3713_vm9, %v3710_v34, %v8427_v57 }
 0x564   :  { %3727 = vmatmul.bf16.vlgmr.msrb.gmra.mxu0 %v8432_v61  ;;  %v6795_v52 = vld [vmem:[#allocation4 + $0x3f8] sm:$0xff] }
 0x565   :  { %3815 = vmatpush.bf16.msrb.mxu0 %v7163_v29  ;;  %3695 = vmatpush.bf16.msrb.mxu3 %v6795_v52  ;;  %v6791_v52 = vld [vmem:[#allocation4 + $0x3d8] sm:$0xff] }
 0x566   :  { %3799 = vmatpush.bf16.msra.mxu1 %v9393_v50 }
 0x567   :  { %3508 = vmatpush.bf16.msrb.mxu2 %v9655_v60 }
 0x569   :  { %3816 = vmatpush.bf16.msrb.mxu0 %v7177_v21 }
 0x56a   :  { %v3485_v54 = vpop.f32.mrf.mxu1  ;;  %3800 = vmatpush.bf16.msra.mxu1 %v9396_v22 }
 0x56b   :  { %3509 = vmatpush.bf16.msrb.mxu2 %v9607_v23  ;;  %v3472_v5 = vpop.f32.mrf.mxu0 }
 0x56c   :  { %v8425_v55 = vadd.f32 %v3485_v54, %v3472_v5  ;;  %v6794_v54 = vld [vmem:[#allocation4 + $0x3f0] sm:$0xff] }
 0x56d   :  { %3817 = vmatpush.bf16.msrb.mxu0 %v7192_v28  ;;  %3696 = vmatpush.bf16.msrb.mxu3 %v6794_v54  ;;  %v6790_v54 = vld [vmem:[#allocation4 + $0x3d0] sm:$0xff] }
 0x56e   :  { %6269 = vmatmul.msk.bf16.vlgmr.msrb.gmra.mxu1 %vm573_vm1, %v8427_v57 }
 0x56f   :  { %3801 = vmatpush.bf16.msra.mxu1 %v9399_v45 }
 0x572   :  { %6202 = vmatmul.msk.bf16.vlgmr.msrb.gmra.mxu2 %vm573_vm1, %v8274_v41  ;;  %v3487_v60 = vpop.f32.mrf.mxu1 }
 0x573   :  { %v3474_v23 = vpop.f32.mrf.mxu0  ;;  %3802 = vmatpush.bf16.msra.mxu1 %v9402_v16  ;;  %v9709_v16 = vld [vmem:[#allocation59_spill] sm:$0xff] }
 0x574   :  { %6270 = vmatmul.msk.bf16.vlgmr.msra.gmra.mxu0 %vm573_vm1, %v8427_v57  ;;  %v6788_v23 = vld [vmem:[#allocation4 + $0x3c0] sm:$0xff] }
 0x575   :  { %3849 = vmatpush.bf16.msra.mxu0 %v9395_v36 }
 0x577   :  { %3803 = vmatpush.bf16.msra.mxu1 %v9405_v42  ;;  %v6785_v42 = vld [vmem:[#allocation4 + $0x3a8] sm:$0xff] }
 0x579   :  { %3850 = vmatpush.bf16.msra.mxu0 %v9398_v17  ;;  %v9708_v17 = vld [vmem:[#allocation85_spill] sm:$0xff] }
 0x57b   :  { %v3537_v41 = vpop.f32.mrf.mxu0  ;;  %3804 = vmatpush.bf16.msra.mxu1 %v9408_v53 }
 0x57d   :  { %3851 = vmatpush.bf16.msra.mxu0 %v9401_v37  ;;  %v9705_v37 = vld [vmem:[#allocation55_spill] sm:$0xff] }
 0x57e   :  { %3805 = vmatmul.bf16.vlgmr.msra.gmra.mxu1 %v8432_v61 }
 0x57f   :  { %3867 = vmatpush.bf16.msrb.mxu1 %v7245_v1  ;;  %v9706_v1 = vld [vmem:[#allocation82_spill] sm:$0xff] }
 0x583   :  { %v3539_v5 = vpop.f32.mrf.mxu0 }
 0x584   :  { %6271 = vmatmul.msk.bf16.vlgmr.msrb.gmra.mxu0 %vm573_vm1, %v8427_v57 }
 0x587   :  { %v3524_v32 = vpop.f32.mrf.mxu1 }
 0x588   :  { %v8437_v60 = vadd.f32 %v3537_v41, %v3524_v32  ;;  %v6793_v41 = vld [vmem:[#allocation4 + $0x3e8] sm:$0xff]  ;;  %v6792_v32 = vld [vmem:[#allocation4 + $0x3e0] sm:$0xff] }
 0x589   :  { %3697 = vmatpush.bf16.msrb.mxu3 %v6793_v41  ;;  %v6789_v41 = vld [vmem:[#allocation4 + $0x3c8] sm:$0xff] }
 0x58d   :  { %3698 = vmatpush.bf16.msrb.mxu3 %v6792_v32  ;;  %v6787_v32 = vld [vmem:[#allocation4 + $0x3b8] sm:$0xff] }
 0x58e   :  { %3682 = vmatpush.bf16.msra.mxu2 %v6787_v32  ;;  %v9712_v32 = vld [vmem:[#allocation64_spill] sm:$0xff] }
 0x58f   :  { %v3526_v34 = vpop.f32.mrf.mxu1 }
 0x590   :  { %v9703_v34 = vld [vmem:[#allocation51_spill] sm:$0xff] }
 0x591   :  { %3699 = vmatpush.bf16.msrb.mxu3 %v6791_v52  ;;  %3852 = vmatpush.bf16.msra.mxu0 %v9703_v34  ;;  %v9704_v52 = vld [vmem:[#allocation78_spill] sm:$0xff]  ;;  %v9707_v34 = vld [vmem:[#allocation21_spill] sm:$0xff] }
 0x592   :  { %3868 = vmatpush.bf16.msrb.mxu1 %v9704_v52  ;;  %v9711_v52 = vld [vmem:[#allocation87_spill] sm:$0xff] }
 0x595   :  { %3700 = vmatpush.bf16.msrb.mxu3 %v6790_v54  ;;  %3853 = vmatpush.bf16.msra.mxu0 %v9705_v37  ;;  %v6786_v54 = vld [vmem:[#allocation4 + $0x3b0] sm:$0xff]  ;;  %v6784_v37 = vld [vmem:[#allocation4 + $0x3a0] sm:$0xff] }
 0x596   :  { %3869 = vmatpush.bf16.msrb.mxu1 %v9706_v1  ;;  %3683 = vmatpush.bf16.msra.mxu2 %v6786_v54  ;;  %v9713_v1 = vld [vmem:[#allocation29_spill] sm:$0xff]  ;;  %v9714_v54 = vld [vmem:[#allocation88_spill] sm:$0xff] }
 0x599   :  { %3701 = vmatpush.bf16.msrb.mxu3 %v6789_v41  ;;  %3854 = vmatpush.bf16.msra.mxu0 %v9709_v16  ;;  %v9710_v41 = vld [vmem:[#allocation25_spill] sm:$0xff]  ;;  %v6783_v16 = vld [vmem:[#allocation4 + $0x398] sm:$0xff] }
 0x59a   :  { %3901 = vmatpush.bf16.msra.mxu1 %v9708_v17  ;;  %3684 = vmatpush.bf16.msra.mxu2 %v6785_v42  ;;  %v9716_v42 = vld [vmem:[#allocation71_spill] sm:$0xff] }
 0x59b   :  { %6273 = vmatmul.msk.bf16.vlgmr.msrb.gmra.mxu1 %vm573_vm1, %v8427_v57 }
 0x59d   :  { %3702 = vmatpush.bf16.msrb.mxu3 %v6788_v23  ;;  %3855 = vmatpush.bf16.msra.mxu0 %v9712_v32  ;;  %v9723_v32 = vld [vmem:[#allocation8_spill] sm:$0xff] }
 0x59e   :  { %3902 = vmatpush.bf16.msra.mxu1 %v9711_v52  ;;  %3685 = vmatpush.bf16.msra.mxu2 %v6784_v37  ;;  %v9717_v37 = vld [vmem:[#allocation33_spill] sm:$0xff]  ;;  %v9722_v52 = vld [vmem:[#allocation79_spill] sm:$0xff] }
 0x5a1   :  { %3771 = vmatpush.bf16.msra.mxu3 %v9707_v34  ;;  %v9715_v34 = vld [vmem:[#allocation68_spill] sm:$0xff] }
 0x5a2   :  { %3903 = vmatpush.bf16.msra.mxu1 %v9714_v54  ;;  %3856 = vmatpush.bf16.msra.mxu0 %v9715_v34  ;;  %v9720_v54 = vld [vmem:[#allocation36_spill] sm:$0xff] }
 0x5a3   :  { %3686 = vmatpush.bf16.msra.mxu2 %v6783_v16  ;;  %v9724_v16 = vld [vmem:[#allocation41_spill] sm:$0xff] }
 0x5a5   :  { %v3312_v5 = vpop.f32.mrf.mxu3  ;;  %3772 = vmatpush.bf16.msra.mxu3 %v9710_v41  ;;  %3857 = vmatmul.bf16.vlgmr.msra.gmra.mxu0 %v8432_v61  ;;  %v9721_v41 = vld [vmem:[#allocation90_spill] sm:$0xff] }
 0x5a6   :  { %3919 = vmatpush.bf16.msrb.mxu0 %v9716_v42  ;;  %v6781_v42 = vld [vmem:[#allocation4 + $0x388] sm:$0xff] }
 0x5a9   :  { %3773 = vmatpush.bf16.msra.mxu3 %v9713_v1  ;;  %v9718_v1 = vld [vmem:[#allocation89_spill] sm:$0xff] }
 0x5aa   :  { %3904 = vmatpush.bf16.msra.mxu1 %v9718_v1  ;;  %v6780_v1 = vld [vmem:[#allocation4 + $0x380] sm:$0xff] }
 0x5ad   :  { %v3314_v53 = vpop.f32.mrf.mxu3  ;;  %3774 = vmatpush.bf16.msra.mxu3 %v9717_v37  ;;  %v9725_v37 = vld [vmem:[#allocation91_spill] sm:$0xff] }
 0x5ae   :  { %3905 = vmatpush.bf16.msra.mxu1 %v9721_v41  ;;  %v9727_v41 = vld [vmem:[#allocation9_spill] sm:$0xff] }
 0x5b1   :  { %3775 = vmatpush.bf16.msra.mxu3 %v9720_v54  ;;  %v9726_v54 = vld [vmem:[#allocation92_spill] sm:$0xff] }
 0x5b2   :  { %3906 = vmatpush.bf16.msra.mxu1 %v9725_v37  ;;  %v9731_v37 = vld [vmem:[#allocation93_spill] sm:$0xff] }
 0x5b5   :  { %v3394_v23 = vpop.f32.mrf.mxu3  ;;  %3776 = vmatpush.bf16.msra.mxu3 %v9724_v16  ;;  %v9730_v16 = vld [vmem:[#allocation49_spill] sm:$0xff] }
 0x5b6   :  { %v8473_v53 = vadd.f32 %v8409_v33, %v3394_v23  ;;  %v6782_v33 = vld [vmem:[#allocation4 + $0x390] sm:$0xff]  ;;  %v9719_v23 = vld [vmem:[#allocation75_spill] sm:$0xff]  ;;  %3907 = vmatpush.bf16.msra.mxu1 %v9726_v54 }
 0x5b7   :  { %3920 = vmatpush.bf16.msrb.mxu0 %v9719_v23  ;;  %3687 = vmatpush.bf16.msra.mxu2 %v6782_v33 }
 0x5b9   :  { %3777 = vmatpush.bf16.msra.mxu3 %v9515_v27 }
 0x5ba   :  { %3908 = vmatpush.bf16.msra.mxu1 %v9731_v37  ;;  %v9738_v37 = vld [vmem:[#allocation12_spill] sm:$0xff] }
 0x5bb   :  { %3921 = vmatpush.bf16.msrb.mxu0 %v9722_v52  ;;  %3688 = vmatpush.bf16.msra.mxu2 %v6781_v42  ;;  %v9728_v52 = vld [vmem:[#allocation96_spill] sm:$0xff] }
 0x5bc   :  { %v9729_v42 = vld [vmem:[#allocation16_spill] sm:$0xff] }
 0x5bd   :  { %v3396_v34 = vpop.f32.mrf.mxu3  ;;  %3778 = vmatpush.bf16.msra.mxu3 %v9730_v16  ;;  %3909 = vmatmul.bf16.vlgmr.msra.gmra.mxu1 %v8432_v61  ;;  %v9736_v16 = vld [vmem:[#allocation22_spill] sm:$0xff] }
 0x5be   :  { %6275 = vmatmul.msk.bf16.vlgmr.msrb.gmra.mxu0 %vm573_vm1, %v8427_v57  ;;  %4135 = vmatpush.bf16.msrb.mxu1 %v9681_v63 }
 0x5bf   :  { %4117 = vmatpush.bf16.msra.mxu0 %v9723_v32  ;;  %3689 = vmatpush.bf16.msra.mxu2 %v6780_v1 }
 0x5c3   :  { %4118 = vmatpush.bf16.msra.mxu0 %v9672_v6  ;;  %3745 = vmatpush.bf16.msrb.mxu2 %v9727_v41  ;;  %v9732_v6 = vld [vmem:[#allocation13_spill] sm:$0xff] }
 0x5c5   :  { %v3299_v23 = vpop.f32.mrf.mxu2  ;;  %v3459_v34 = vpop.f32.mrf.mxu3 }
 0x5c6   :  { %v3313_v33 = vadd.f32 %v3312_v5, %v3299_v23  ;;  %v9734_v23 = vld [vmem:[#allocation14_spill] sm:$0xff] }
 0x5c7   :  { %4119 = vmatpush.bf16.msra.mxu0 %v9729_v42  ;;  %3746 = vmatpush.bf16.msrb.mxu2 %v9732_v6  ;;  %v9737_v6 = vld [vmem:[#allocation18_spill] sm:$0xff]  ;;  %v9739_v42 = vld [vmem:[#allocation28_spill] sm:$0xff] }
 0x5c8   :  { %v8497_v32 = vadd.f32 %v3313_v33, %v9728_v52  ;;  %v9733_v52 = vld [vmem:[#allocation17_spill] sm:$0xff]  ;;  %4136 = vmatpush.bf16.msrb.mxu1 %v9734_v23  ;;  %v9735_v33 = vld [vmem:[#allocation24_spill] sm:$0xff] }
 0x5cb   :  { %4120 = vmatpush.bf16.msra.mxu0 %v9682_v49  ;;  %3747 = vmatpush.bf16.msrb.mxu2 %v9733_v52 }
 0x5cc   :  { %4137 = vmatpush.bf16.msrb.mxu1 %v9737_v6 }
 0x5cd   :  { %v3301_v1 = vpop.f32.mrf.mxu2  ;;  %v3461_v5 = vpop.f32.mrf.mxu3 }
 0x5cf   :  { %4121 = vmatpush.bf16.msra.mxu0 %v9735_v33  ;;  %3748 = vmatpush.bf16.msrb.mxu2 %v9736_v16  ;;  %v9740_v16 = vmax.f32 %v8425_v55, %v8437_v60  ;;  %v9741_v55 = vld [vmem:[#allocation62_spill] sm:$0xff] }
 0x5d0   :  { %4161 = vmatpush.bf16.msra.mxu1 %v9738_v37  ;;  %v9742_v60 = vld [vmem:[#allocation30_spill] sm:$0xff] }
 0x5d3   :  { %4122 = vmatpush.bf16.msra.mxu0 %v9739_v42  ;;  %3749 = vmatpush.bf16.msrb.mxu2 %v9638_v62 }
 0x5d4   :  { %4162 = vmatpush.bf16.msra.mxu1 %v9639_v58 }
 0x5d5   :  { %v3368_v63 = vpop.f32.mrf.mxu2  ;;  %v3498_v49 = vpop.f32.mrf.mxu3 }
 0x5d6   :  { %v3382_v1 = vadd.f32 %v8406_v59, %v3368_v63 }
 0x5d7   :  { %4123 = vmatpush.bf16.msra.mxu0 %v9690_v11  ;;  %3750 = vmatpush.bf16.msrb.mxu2 %v9535_v46 }
 0x5d8   :  { %v3542_v5 = vmax.f32 %v3382_v1, %v8417_v10  ;;  %4163 = vmatpush.bf16.msra.mxu1 %v9590_v40 }
 0x5da   :  { %v3546_v6 = vmax.f32 %v3542_v5, %v9740_v16  ;;  %v9743_v16 = vld [vmem:[#allocation67_spill] sm:$0xff]  ;;  %v4097_v5 = vld [vmem:[%s9052_s0 + $0x28] sm:$0xff] }
 0x5db   :  { %4124 = vmatpush.bf16.msra.mxu0 %v9591_v3  ;;  %3751 = vmatpush.bf16.msrb.mxu2 %v9593_v9 }
 0x5dc   :  { %v3548_v42 = vadd.f32 %v3546_v6, %v9589_v8 }
 0x5dd   :  { %v3370_v63 = vpop.f32.mrf.mxu2  ;;  %v3500_v59 = vpop.f32.mrf.mxu3 }
 0x5de   :  { %v3550_v10 = vmax.f32 %v3548_v42, 0.0  ;;  %v8537_v42 = vpack.c.bf16 %v4097_v5, %v4097_v5  ;;  %v9744_v63 = vld [vmem:[#allocation72_spill] sm:$0xff]  ;;  %v9745_v5 = vmax.f32 %v8397_v31, %v8473_v53  ;;  %v3741_v31 = vpop.f32.mrf.mxu1 }
 0x5df   :  { %4187 = vmatpush.bf16.msrb.mxu0 %v9642_v39  ;;  %3752 = vmatpush.bf16.msrb.mxu2 %v9693_v44 }
 0x5e0   :  { %v3552_v1 = vpack.c.bf16 %v3550_v10, %v3550_v10  ;;  %4108 = vrot.lane.b32.xlu2 %v8537_v42, %s6949_s13  ;;  %4495 = vrot.lane.b32.xlu1 %v8537_v42, %s6950_s15 }
 0x5e1   :  { %4890 = vrot.lane.b32.xlu0 %v8537_v42, %s6951_s3 }
 0x5e2   :  { %3703 = vmatmul.bf16.vlgmr.msrb.gmra.mxu3 %v3552_v1 }
 0x5e3   :  { %4188 = vmatpush.bf16.msrb.mxu0 %v9645_v56  ;;  %3841 = vmatpush.bf16.msrb.mxu3 %v9741_v55 }
 0x5e5   :  { %v3446_v6 = vpop.f32.mrf.mxu2 }
 0x5e6   :  { %v3460_v1 = vadd.f32 %v3459_v34, %v3446_v6 }
 0x5e7   :  { %4189 = vmatpush.bf16.msrb.mxu0 %v9742_v60  ;;  %3842 = vmatpush.bf16.msrb.mxu3 %v9743_v16 }
 0x5eb   :  { %3843 = vmatpush.bf16.msrb.mxu3 %v9744_v63 }
 0x5ed   :  { %v3448_v59 = vpop.f32.mrf.mxu2 }
 0x5f2   :  { %3779 = vmatmul.bf16.vlgmr.msra.gmra.mxu3 %v8432_v61 }
 0x5f3   :  { %3875 = vmatpush.bf16.msra.mxu3 %v9600_v2 }
 0x5f5   :  { %v3511_v10 = vpop.f32.mrf.mxu2 }
 0x5f6   :  { %v3512_v60 = vadd.f32 %v3511_v10, %v3498_v49  ;;  %v3728_v49 = vpop.f32.mrf.mxu0 }
 0x5f7   :  { %3876 = vmatpush.bf16.msra.mxu3 %v9549_v26  ;;  %v8555_v53 = vadd.f32 %v3741_v31, %v3728_v49 }
 0x5f8   :  { %v3543_v16 = vmax.f32 %v3460_v1, %v3512_v60 }
 0x5fa   :  { %v3545_v55 = vmax.f32 %v9745_v5, %v3543_v16  ;;  %v9746_v16 = vld [vmem:[#allocation77_spill] sm:$0xff] }
 0x5fb   :  { %3877 = vmatpush.bf16.msra.mxu3 %v9551_v13  ;;  %v9747_v5 = vld [vmem:[#allocation81_spill] sm:$0xff] }
 0x5fc   :  { %v3547_v44 = vadd.f32 %v3545_v55, %v9496_v14 }
 0x5fd   :  { %v3513_v63 = vpop.f32.mrf.mxu2 }
 0x5fe   :  { %v3549_v59 = vmax.f32 %v3547_v44, 0.0  ;;  %v3743_v44 = vpop.f32.mrf.mxu1 }
 0x5ff   :  { %3878 = vmatpush.bf16.msra.mxu3 %v9552_v18 }
 0x600   :  { %v3551_v56 = vpack.c.bf16 %v3549_v59, %v3549_v59 }
 0x602   :  { %3690 = vmatmul.bf16.vlgmr.msra.gmra.mxu2 %v3551_v56  ;;  %6272 = vmatmul.msk.bf16.vlgmr.msrb.gmra.mxu3 %vm573_vm1, %v8427_v57  ;;  %v3730_v56 = vpop.f32.mrf.mxu0 }
 0x603   :  { %3823 = vmatpush.bf16.msra.mxu2 %v9497_v48  ;;  %3879 = vmatpush.bf16.msra.mxu3 %v9553_v35 }
 0x606   :  { %v8568_v55 = vpop.f32.mrf.mxu1 }
 0x607   :  { %3824 = vmatpush.bf16.msra.mxu2 %v9498_v20  ;;  %3880 = vmatpush.bf16.msra.mxu3 %v9554_v51 }
 0x60a   :  { %v8566_v34 = vpop.f32.mrf.mxu0 }
 0x60b   :  { %3825 = vmatpush.bf16.msra.mxu2 %v9499_v43  ;;  %3881 = vmatpush.bf16.msra.mxu3 %v9555_v25 }
 0x60e   :  { %v3769_v60 = vpop.f32.mrf.mxu1 }
 0x60f   :  { %3826 = vmatpush.bf16.msra.mxu2 %v9500_v30  ;;  %3882 = vmatpush.bf16.msra.mxu3 %v9556_v15  ;;  %v4107_v60 = vpop.permute.xlu1 %4106 }
 0x612   :  { %3753 = vmatmul.bf16.vlgmr.msrb.gmra.mxu2 %v8432_v61  ;;  %3883 = vmatmul.bf16.vlgmr.msra.gmra.mxu3 %v8432_v61  ;;  %v3795_v6 = vpop.f32.mrf.mxu0 }
 0x613   :  { %3827 = vmatpush.bf16.msra.mxu2 %v9602_v4 }
 0x616   :  { %v3806_v10 = vpop.f32.mrf.mxu1 }
 0x617   :  { %3828 = vmatpush.bf16.msra.mxu2 %v9651_v12 }
 0x61a   :  { %v3819_v63 = vpop.f32.mrf.mxu0 }
 0x61b   :  { %3829 = vmatpush.bf16.msra.mxu2 %v9698_v0  ;;  %v8576_v1 = vadd.f32 %v3819_v63, %v3806_v10 }
 0x61e   :  { %v3808_v49 = vpop.f32.mrf.mxu1 }
 0x61f   :  { %3830 = vmatpush.bf16.msra.mxu2 %v9699_v38 }
 0x622   :  { %3831 = vmatmul.bf16.vlgmr.msra.gmra.mxu2 %v8432_v61  ;;  %v3821_v59 = vpop.f32.mrf.mxu0 }
 0x623   :  { %3893 = vmatpush.bf16.msrb.mxu2 %v9700_v7  ;;  %v4105_v59 = vpop.permute.xlu0 %4104 }
 0x626   :  { %v3871_v31 = vpop.f32.mrf.mxu1 }
 0x627   :  { %3894 = vmatpush.bf16.msrb.mxu2 %v9746_v16 }
 0x62a   :  { %v3858_v61 = vpop.f32.mrf.mxu0 }
 0x62b   :  { %3895 = vmatpush.bf16.msrb.mxu2 %v9747_v5  ;;  %v8583_v56 = vadd.f32 %v3871_v31, %v3858_v61  ;;  %v9751_v61 = vld [vmem:[#allocation46_spill] sm:$0xff] }
 0x62e   :  { %v3873_v44 = vpop.f32.mrf.mxu1 }
 0x62f   :  { %v6811_v44 = vld [vmem:[#allocation4 + $0x478] sm:$0xff] }
 0x630   :  { %4081 = vmatpush.bf16.msrb.mxu3 %v6811_v44  ;;  %v9749_v44 = vld [vmem:[#allocation44_spill] sm:$0xff] }
 0x632   :  { %6274 = vmatmul.msk.bf16.vlgmr.msrb.gmra.mxu2 %vm573_vm1, %v8427_v57  ;;  %v3860_v6 = vpop.f32.mrf.mxu0  ;;  %v8589_v57 = vsel %vm4110_vm10, %v4105_v59, %v4107_v60  ;;  %v6809_v59 = vld [vmem:[#allocation4 + $0x468] sm:$0xff] }
 0x633   :  { %4125 = vmatmul.bf16.vlgmr.msra.gmra.mxu0 %v8589_v57  ;;  %v6810_v6 = vld [vmem:[#allocation4 + $0x470] sm:$0xff] }
 0x634   :  { %4213 = vmatpush.bf16.msra.mxu0 %v7163_v29  ;;  %4082 = vmatpush.bf16.msrb.mxu3 %v6810_v6  ;;  %v9750_v6 = vld [vmem:[#allocation56_spill] sm:$0xff] }
 0x638   :  { %4214 = vmatpush.bf16.msra.mxu0 %v7177_v21  ;;  %4083 = vmatpush.bf16.msrb.mxu3 %v6809_v59 }
 0x63a   :  { %v4109_v63 = vpop.permute.xlu2 %4108  ;;  %v3910_v49 = vpop.f32.mrf.mxu1 }
 0x63b   :  { %v8585_v10 = vsel %vm4110_vm10, %v4107_v60, %v4109_v63  ;;  %v3923_v19 = vpop.f32.mrf.mxu0 }
 0x63c   :  { %6340 = vmatmul.msk.bf16.vlgmr.msrb.gmra.mxu1 %vm573_vm1, %v8585_v10  ;;  %v8594_v31 = vadd.f32 %v3923_v19, %v3910_v49  ;;  %4215 = vmatpush.bf16.msra.mxu0 %v7192_v28  ;;  %v6808_v19 = vld [vmem:[#allocation4 + $0x460] sm:$0xff]  ;;  %v9754_v28 = vld [vmem:[#allocation51_spill] sm:$0xff] }
 0x63d   :  { %4195 = vmatpush.bf16.msrb.mxu1 %v7093_v24  ;;  %v9748_v49 = vld [vmem:[#allocation52_spill] sm:$0xff]  ;;  %4084 = vmatpush.bf16.msrb.mxu3 %v6808_v19  ;;  %v6803_v19 = vld [vmem:[#allocation4 + $0x438] sm:$0xff] }
 0x63e   :  { %4068 = vmatpush.bf16.msra.mxu2 %v6803_v19  ;;  %v9762_v19 = vld [vmem:[#allocation64_spill] sm:$0xff] }
 0x641   :  { %4196 = vmatpush.bf16.msrb.mxu1 %v7106_v47 }
 0x642   :  { %v3912_v63 = vpop.f32.mrf.mxu1 }
 0x643   :  { %v3925_v60 = vpop.f32.mrf.mxu0  ;;  %6342 = vmatmul.msk.bf16.vlgmr.msrb.gmra.mxu0 %vm573_vm1, %v8585_v10  ;;  %v6806_v63 = vld [vmem:[#allocation4 + $0x450] sm:$0xff] }
 0x644   :  { %4247 = vmatpush.bf16.msrb.mxu0 %v9395_v36  ;;  %v6807_v60 = vld [vmem:[#allocation4 + $0x458] sm:$0xff]  ;;  %v6805_v36 = vld [vmem:[#allocation4 + $0x448] sm:$0xff] }
 0x645   :  { %4197 = vmatpush.bf16.msrb.mxu1 %v9393_v50  ;;  %4085 = vmatpush.bf16.msrb.mxu3 %v6807_v60  ;;  %v6804_v60 = vld [vmem:[#allocation4 + $0x440] sm:$0xff]  ;;  %v9760_v50 = vld [vmem:[#allocation87_spill] sm:$0xff] }
 0x648   :  { %4248 = vmatpush.bf16.msrb.mxu0 %v9749_v44  ;;  %v9758_v44 = vld [vmem:[#allocation21_spill] sm:$0xff] }
 0x649   :  { %4198 = vmatpush.bf16.msrb.mxu1 %v9396_v22  ;;  %v9753_v22 = vld [vmem:[#allocation74_spill] sm:$0xff]  ;;  %4086 = vmatpush.bf16.msrb.mxu3 %v6806_v63 }
 0x64c   :  { %6341 = vmatmul.msk.bf16.vlgmr.msra.gmra.mxu1 %vm573_vm1, %v8585_v10  ;;  %4249 = vmatpush.bf16.msrb.mxu0 %v9751_v61  ;;  %v9756_v61 = vld [vmem:[#allocation55_spill] sm:$0xff] }
 0x64d   :  { %4199 = vmatpush.bf16.msrb.mxu1 %v9399_v45  ;;  %v9752_v45 = vld [vmem:[#allocation60_spill] sm:$0xff]  ;;  %4087 = vmatpush.bf16.msrb.mxu3 %v6805_v36  ;;  %v9761_v36 = vld [vmem:[#allocation25_spill] sm:$0xff] }
 0x650   :  { %4250 = vmatpush.bf16.msrb.mxu0 %v9754_v28  ;;  %v6801_v28 = vld [vmem:[#allocation4 + $0x428] sm:$0xff] }
 0x651   :  { %4200 = vmatpush.bf16.msrb.mxu1 %v9748_v49  ;;  %4088 = vmatpush.bf16.msrb.mxu3 %v6804_v60  ;;  %v9759_v49 = vld [vmem:[#allocation59_spill] sm:$0xff] }
 0x653   :  { %6343 = vmatmul.msk.bf16.vlgmr.msra.gmra.mxu0 %vm573_vm1, %v8585_v10 }
 0x654   :  { %4251 = vmatpush.bf16.msrb.mxu0 %v9756_v61  ;;  %v6800_v61 = vld [vmem:[#allocation4 + $0x420] sm:$0xff] }
 0x655   :  { %4201 = vmatpush.bf16.msrb.mxu1 %v9750_v6  ;;  %v9755_v6 = vld [vmem:[#allocation78_spill] sm:$0xff]  ;;  %4169 = vmatpush.bf16.msra.mxu3 %v9758_v44 }
 0x658   :  { %4252 = vmatpush.bf16.msrb.mxu0 %v9759_v49  ;;  %v6799_v49 = vld [vmem:[#allocation4 + $0x418] sm:$0xff] }
 0x659   :  { %4202 = vmatpush.bf16.msrb.mxu1 %v9752_v45  ;;  %v6802_v45 = vld [vmem:[#allocation4 + $0x430] sm:$0xff]  ;;  %4170 = vmatpush.bf16.msra.mxu3 %v9761_v36  ;;  %v9772_v36 = vld [vmem:[#allocation79_spill] sm:$0xff] }
 0x65a   :  { %4069 = vmatpush.bf16.msra.mxu2 %v6802_v45  ;;  %v9764_v45 = vld [vmem:[#allocation29_spill] sm:$0xff] }
 0x65c   :  { %4203 = vmatmul.bf16.vlgmr.msrb.gmra.mxu1 %v8589_v57  ;;  %4253 = vmatpush.bf16.msrb.mxu0 %v9762_v19  ;;  %v9773_v19 = vld [vmem:[#allocation8_spill] sm:$0xff] }
 0x65d   :  { %4265 = vmatpush.bf16.msra.mxu1 %v9753_v22  ;;  %v9757_v22 = vld [vmem:[#allocation82_spill] sm:$0xff]  ;;  %4171 = vmatpush.bf16.msra.mxu3 %v9764_v45  ;;  %v9771_v45 = vld [vmem:[#allocation36_spill] sm:$0xff] }
 0x65e   :  { %4070 = vmatpush.bf16.msra.mxu2 %v6801_v28  ;;  %v9766_v28 = vld [vmem:[#allocation71_spill] sm:$0xff] }
 0x661   :  { %4266 = vmatpush.bf16.msra.mxu1 %v9755_v6 }
 0x662   :  { %4071 = vmatpush.bf16.msra.mxu2 %v6800_v61  ;;  %v9768_v61 = vld [vmem:[#allocation33_spill] sm:$0xff] }
 0x663   :  { %4172 = vmatpush.bf16.msra.mxu3 %v9768_v61  ;;  %v6796_v61 = vld [vmem:[#allocation4 + $0x400] sm:$0xff] }
 0x665   :  { %v3704_v59 = vpop.f32.mrf.mxu3  ;;  %4267 = vmatpush.bf16.msra.mxu1 %v9757_v22  ;;  %v9763_v22 = vld [vmem:[#allocation88_spill] sm:$0xff] }
 0x666   :  { %4072 = vmatpush.bf16.msra.mxu2 %v6799_v49  ;;  %v9775_v49 = vld [vmem:[#allocation41_spill] sm:$0xff] }
 0x667   :  { %4173 = vmatpush.bf16.msra.mxu3 %v9771_v45 }
 0x669   :  { %4299 = vmatpush.bf16.msrb.mxu1 %v9708_v17  ;;  %v9776_v17 = vld [vmem:[#allocation10_spill] sm:$0xff] }
 0x66b   :  { %4174 = vmatpush.bf16.msra.mxu3 %v9775_v49  ;;  %v9779_v49 = vld [vmem:[#allocation49_spill] sm:$0xff] }
 0x66c   :  { %6345 = vmatmul.msk.bf16.vlgmr.msra.gmra.mxu1 %vm573_vm1, %v8585_v10 }
 0x66d   :  { %v3706_v63 = vpop.f32.mrf.mxu3  ;;  %4300 = vmatpush.bf16.msrb.mxu1 %v9760_v50  ;;  %v9767_v50 = vld [vmem:[#allocation89_spill] sm:$0xff] }
 0x66e   :  { %v9765_v63 = vld [vmem:[#allocation68_spill] sm:$0xff] }
 0x66f   :  { %4254 = vmatpush.bf16.msrb.mxu0 %v9765_v63  ;;  %4175 = vmatpush.bf16.msra.mxu3 %v9515_v27 }
 0x671   :  { %4301 = vmatpush.bf16.msrb.mxu1 %v9763_v22  ;;  %v9770_v22 = vld [vmem:[#allocation90_spill] sm:$0xff] }
 0x672   :  { %4255 = vmatmul.bf16.vlgmr.msrb.gmra.mxu0 %v8589_v57 }
 0x673   :  { %4317 = vmatpush.bf16.msra.mxu0 %v9766_v28  ;;  %v6797_v28 = vld [vmem:[#allocation4 + $0x408] sm:$0xff]  ;;  %4176 = vmatpush.bf16.msra.mxu3 %v9779_v49 }
 0x675   :  { %v3780_v6 = vpop.f32.mrf.mxu3  ;;  %4302 = vmatpush.bf16.msrb.mxu1 %v9767_v50  ;;  %v9774_v50 = vld [vmem:[#allocation91_spill] sm:$0xff] }
 0x676   :  { %v8630_v60 = vadd.f32 %v8566_v34, %v3780_v6  ;;  %v6798_v34 = vld [vmem:[#allocation4 + $0x410] sm:$0xff]  ;;  %v9769_v6 = vld [vmem:[#allocation75_spill] sm:$0xff] }
 0x677   :  { %4318 = vmatpush.bf16.msra.mxu0 %v9769_v6  ;;  %4073 = vmatpush.bf16.msra.mxu2 %v6798_v34 }
 0x679   :  { %4303 = vmatpush.bf16.msrb.mxu1 %v9770_v22 }
 0x67b   :  { %4319 = vmatpush.bf16.msra.mxu0 %v9772_v36  ;;  %4074 = vmatpush.bf16.msra.mxu2 %v6797_v28  ;;  %v9778_v28 = vld [vmem:[#allocation93_spill] sm:$0xff] }
 0x67d   :  { %v3782_v63 = vpop.f32.mrf.mxu3  ;;  %4304 = vmatpush.bf16.msrb.mxu1 %v9774_v50  ;;  %v9777_v50 = vld [vmem:[#allocation16_spill] sm:$0xff] }
 0x67f   :  { %4503 = vmatpush.bf16.msrb.mxu0 %v9773_v19  ;;  %4075 = vmatpush.bf16.msra.mxu2 %v6796_v61  ;;  %v9781_v61 = vld [vmem:[#allocation11_spill] sm:$0xff] }
 0x681   :  { %4305 = vmatpush.bf16.msrb.mxu1 %v9726_v54 }
 0x682   :  { %6347 = vmatmul.msk.bf16.vlgmr.msra.gmra.mxu0 %vm573_vm1, %v8585_v10 }
 0x683   :  { %4504 = vmatpush.bf16.msrb.mxu0 %v9776_v17  ;;  %4143 = vmatpush.bf16.msrb.mxu2 %v9727_v41  ;;  %v9780_v17 = vld [vmem:[#allocation13_spill] sm:$0xff] }
 0x685   :  { %v3691_v6 = vpop.f32.mrf.mxu2  ;;  %v3845_v63 = vpop.f32.mrf.mxu3  ;;  %4306 = vmatpush.bf16.msrb.mxu1 %v9778_v28  ;;  %v9785_v28 = vld [vmem:[#allocation28_spill] sm:$0xff] }
 0x686   :  { %v3705_v34 = vadd.f32 %v3704_v59, %v3691_v6  ;;  %v9782_v59 = vld [vmem:[#allocation20_spill] sm:$0xff] }
 0x687   :  { %4505 = vmatpush.bf16.msrb.mxu0 %v9777_v50  ;;  %4144 = vmatpush.bf16.msrb.mxu2 %v9780_v17  ;;  %v9784_v17 = vld [vmem:[#allocation18_spill] sm:$0xff] }
 0x688   :  { %v8654_v19 = vadd.f32 %v3705_v34, %v8497_v32  ;;  %4307 = vmatmul.bf16.vlgmr.msrb.gmra.mxu1 %v8589_v57  ;;  %v9783_v34 = vld [vmem:[#allocation22_spill] sm:$0xff] }
 0x689   :  { %4521 = vmatpush.bf16.msra.mxu1 %v9781_v61 }
 0x68b   :  { %4506 = vmatpush.bf16.msrb.mxu0 %v9782_v59  ;;  %4145 = vmatpush.bf16.msrb.mxu2 %v9733_v52 }
 0x68d   :  { %v3693_v6 = vpop.f32.mrf.mxu2  ;;  %v3847_v32 = vpop.f32.mrf.mxu3  ;;  %4522 = vmatpush.bf16.msra.mxu1 %v9734_v23 }
 0x68e   :  { %v9786_v32 = vmax.f32 %v8583_v56, %v8594_v31  ;;  %v9788_v56 = vld [vmem:[#allocation37_spill] sm:$0xff]  ;;  %v9789_v31 = vld [vmem:[#allocation62_spill] sm:$0xff] }
 0x68f   :  { %4507 = vmatpush.bf16.msrb.mxu0 %v9735_v33  ;;  %4146 = vmatpush.bf16.msrb.mxu2 %v9783_v34 }
 0x691   :  { %4523 = vmatpush.bf16.msra.mxu1 %v9784_v17 }
 0x693   :  { %4508 = vmatpush.bf16.msrb.mxu0 %v9785_v28  ;;  %4147 = vmatpush.bf16.msrb.mxu2 %v9638_v62 }
 0x695   :  { %4547 = vmatpush.bf16.msrb.mxu1 %v9738_v37  ;;  %v3754_v61 = vpop.f32.mrf.mxu2  ;;  %v3884_v49 = vpop.f32.mrf.mxu3 }
 0x696   :  { %v3768_v59 = vadd.f32 %v8568_v55, %v3754_v61 }
 0x697   :  { %4509 = vmatpush.bf16.msrb.mxu0 %v9690_v11  ;;  %4148 = vmatpush.bf16.msrb.mxu2 %v9535_v46  ;;  %v9787_v11 = vld [vmem:[#allocation26_spill] sm:$0xff] }
 0x698   :  { %v3928_v6 = vmax.f32 %v3768_v59, %v8576_v1 }
 0x699   :  { %4548 = vmatpush.bf16.msrb.mxu1 %v9639_v58 }
 0x69a   :  { %v3932_v17 = vmax.f32 %v3928_v6, %v9786_v32  ;;  %v9790_v6 = vld [vmem:[#allocation30_spill] sm:$0xff]  ;;  %v9791_v32 = vld [vmem:[#allocation67_spill] sm:$0xff] }
 0x69b   :  { %4510 = vmatpush.bf16.msrb.mxu0 %v9591_v3  ;;  %4149 = vmatpush.bf16.msrb.mxu2 %v9593_v9 }
 0x69c   :  { %v3934_v28 = vadd.f32 %v3932_v17, %v9589_v8 }
 0x69d   :  { %4549 = vmatpush.bf16.msrb.mxu1 %v9590_v40  ;;  %v3756_v55 = vpop.f32.mrf.mxu2  ;;  %v3886_v61 = vpop.f32.mrf.mxu3 }
 0x69e   :  { %v3936_v1 = vmax.f32 %v3934_v28, 0.0  ;;  %v9792_v55 = vld [vmem:[#allocation72_spill] sm:$0xff] }
 0x69f   :  { %4573 = vmatpush.bf16.msra.mxu0 %v9642_v39  ;;  %4150 = vmatpush.bf16.msrb.mxu2 %v9788_v56 }
 0x6a0   :  { %v3938_v59 = vpack.c.bf16 %v3936_v1, %v3936_v1 }
 0x6a2   :  { %4089 = vmatmul.bf16.vlgmr.msrb.gmra.mxu3 %v3938_v59 }
 0x6a3   :  { %4574 = vmatpush.bf16.msra.mxu0 %v9787_v11  ;;  %4239 = vmatpush.bf16.msrb.mxu3 %v9789_v31  ;;  %v9793_v31 = vmax.f32 %v8555_v53, %v8630_v60 }
 0x6a5   :  { %v3832_v17 = vpop.f32.mrf.mxu2 }
 0x6a6   :  { %v3846_v1 = vadd.f32 %v3845_v63, %v3832_v17 }
 0x6a7   :  { %4575 = vmatpush.bf16.msra.mxu0 %v9790_v6  ;;  %4240 = vmatpush.bf16.msrb.mxu3 %v9791_v32 }
 0x6ab   :  { %4241 = vmatpush.bf16.msrb.mxu3 %v9792_v55 }
 0x6ad   :  { %v3834_v61 = vpop.f32.mrf.mxu2 }
 0x6b0   :  { %v4126_v53 = vpop.f32.mrf.mxu0 }
 0x6b2   :  { %4177 = vmatmul.bf16.vlgmr.msra.gmra.mxu3 %v8589_v57 }
 0x6b3   :  { %4273 = vmatpush.bf16.msra.mxu3 %v9600_v2 }
 0x6b5   :  { %v3897_v28 = vpop.f32.mrf.mxu2 }
 0x6b6   :  { %v3898_v11 = vadd.f32 %v3897_v28, %v3884_v49 }
 0x6b7   :  { %4274 = vmatpush.bf16.msra.mxu3 %v9549_v26 }
 0x6b8   :  { %v3929_v59 = vmax.f32 %v3846_v1, %v3898_v11  ;;  %v4128_v63 = vpop.f32.mrf.mxu0 }
 0x6b9   :  { %v4139_v11 = vpop.f32.mrf.mxu1  ;;  %v8735_v63 = vpop.permute.xlu1 %4495 }
 0x6ba   :  { %v3931_v56 = vmax.f32 %v9793_v31, %v3929_v59  ;;  %v8705_v60 = vadd.f32 %v4139_v11, %v4126_v53  ;;  %6412 = vmatmul.msk.bf16.vlgmr.msra.gmra.mxu1 %vm573_vm1, %v8735_v63 }
 0x6bb   :  { %4275 = vmatpush.bf16.msra.mxu3 %v9551_v13  ;;  %4581 = vmatpush.bf16.msra.mxu1 %v7093_v24 }
 0x6bc   :  { %v3933_v32 = vadd.f32 %v3931_v56, %v9496_v14 }
 0x6bd   :  { %v3899_v55 = vpop.f32.mrf.mxu2 }
 0x6be   :  { %v3935_v61 = vmax.f32 %v3933_v32, 0.0 }
 0x6bf   :  { %4276 = vmatpush.bf16.msra.mxu3 %v9552_v18  ;;  %4582 = vmatpush.bf16.msra.mxu1 %v7106_v47 }
 0x6c0   :  { %v3937_v6 = vpack.c.bf16 %v3935_v61, %v3935_v61  ;;  %v8718_v31 = vpop.f32.mrf.mxu0 }
 0x6c1   :  { %v4141_v49 = vpop.f32.mrf.mxu1 }
 0x6c2   :  { %4076 = vmatmul.bf16.vlgmr.msra.gmra.mxu2 %v3937_v6  ;;  %6344 = vmatmul.msk.bf16.vlgmr.msrb.gmra.mxu3 %vm573_vm1, %v8585_v10 }
 0x6c3   :  { %4221 = vmatpush.bf16.msra.mxu2 %v9497_v48  ;;  %4277 = vmatpush.bf16.msra.mxu3 %v9553_v35 }
 0x6c7   :  { %4222 = vmatpush.bf16.msra.mxu2 %v9498_v20  ;;  %4278 = vmatpush.bf16.msra.mxu3 %v9554_v51 }
 0x6c8   :  { %v4193_v6 = vpop.f32.mrf.mxu0 }
 0x6c9   :  { %v8716_v56 = vpop.f32.mrf.mxu1 }
 0x6ca   :  { %6413 = vmatmul.msk.bf16.vlgmr.msrb.gmra.mxu1 %vm573_vm1, %v8735_v63 }
 0x6cb   :  { %4223 = vmatpush.bf16.msra.mxu2 %v9499_v43  ;;  %4279 = vmatpush.bf16.msra.mxu3 %v9555_v25 }
 0x6cf   :  { %4224 = vmatpush.bf16.msra.mxu2 %v9500_v30  ;;  %4280 = vmatpush.bf16.msra.mxu3 %v9556_v15 }
 0x6d0   :  { %v4217_v55 = vpop.f32.mrf.mxu0 }
 0x6d1   :  { %v4167_v17 = vpop.f32.mrf.mxu1 }
 0x6d2   :  { %4151 = vmatmul.bf16.vlgmr.msrb.gmra.mxu2 %v8589_v57  ;;  %4281 = vmatmul.bf16.vlgmr.msra.gmra.mxu3 %v8589_v57  ;;  %v4494_v17 = vpop.permute.xlu0 %4493 }
 0x6d3   :  { %4225 = vmatpush.bf16.msra.mxu2 %v9602_v4  ;;  %v8740_v6 = vsel %vm4497_vm11, %v4494_v17, %v8735_v63  ;;  %v9796_v17 = vld [vmem:[#allocation42_spill] sm:$0xff] }
 0x6d4   :  { %4511 = vmatmul.bf16.vlgmr.msrb.gmra.mxu0 %v8740_v6 }
 0x6d5   :  { %4599 = vmatpush.bf16.msrb.mxu0 %v7163_v29  ;;  %v9805_v29 = vld [vmem:[#allocation51_spill] sm:$0xff] }
 0x6d7   :  { %4226 = vmatpush.bf16.msra.mxu2 %v9651_v12 }
 0x6d8   :  { %v4219_v59 = vpop.f32.mrf.mxu0 }
 0x6d9   :  { %v4204_v32 = vpop.f32.mrf.mxu1  ;;  %4600 = vmatpush.bf16.msrb.mxu0 %v7177_v21  ;;  %v9794_v59 = vld [vmem:[#allocation38_spill] sm:$0xff] }
 0x6da   :  { %v8726_v28 = vadd.f32 %v4217_v55, %v4204_v32  ;;  %4583 = vmatpush.bf16.msra.mxu1 %v9794_v59  ;;  %v6824_v55 = vld [vmem:[#allocation4 + $0x4e0] sm:$0xff]  ;;  %v9802_v21 = vld [vmem:[#allocation46_spill] sm:$0xff] }
 0x6db   :  { %4227 = vmatpush.bf16.msra.mxu2 %v9698_v0  ;;  %v9804_v59 = vld [vmem:[#allocation74_spill] sm:$0xff] }
 0x6de   :  { %4584 = vmatpush.bf16.msra.mxu1 %v9796_v17  ;;  %v6822_v17 = vld [vmem:[#allocation4 + $0x4d0] sm:$0xff] }
 0x6df   :  { %4228 = vmatpush.bf16.msra.mxu2 %v9699_v38 }
 0x6e1   :  { %v4206_v1 = vpop.f32.mrf.mxu1 }
 0x6e2   :  { %4229 = vmatmul.bf16.vlgmr.msra.gmra.mxu2 %v8589_v57  ;;  %v6827_v1 = vld [vmem:[#allocation4 + $0x4f8] sm:$0xff] }
 0x6e3   :  { %4291 = vmatpush.bf16.msrb.mxu2 %v9700_v7  ;;  %4479 = vmatpush.bf16.msrb.mxu3 %v6827_v1  ;;  %v9798_v1 = vld [vmem:[#allocation40_spill] sm:$0xff] }
 0x6e4   :  { %6414 = vmatmul.msk.bf16.vlgmr.msra.gmra.mxu0 %vm573_vm1, %v8735_v63 }
 0x6e7   :  { %4292 = vmatpush.bf16.msrb.mxu2 %v9746_v16 }
 0x6e9   :  { %v4269_v61 = vpop.f32.mrf.mxu1 }
 0x6eb   :  { %4293 = vmatpush.bf16.msrb.mxu2 %v9747_v5 }
 0x6ef   :  { %v4256_v11 = vpop.f32.mrf.mxu0 }
 0x6f0   :  { %v8733_v57 = vadd.f32 %v4269_v61, %v4256_v11  ;;  %v6826_v61 = vld [vmem:[#allocation4 + $0x4f0] sm:$0xff] }
 0x6f1   :  { %v4271_v53 = vpop.f32.mrf.mxu1  ;;  %4480 = vmatpush.bf16.msrb.mxu3 %v6826_v61  ;;  %v9801_v61 = vld [vmem:[#allocation56_spill] sm:$0xff] }
 0x6f2   :  { %6346 = vmatmul.msk.bf16.vlgmr.msrb.gmra.mxu2 %vm573_vm1, %v8585_v10  ;;  %v9795_v53 = vld [vmem:[#allocation58_spill] sm:$0xff] }
 0x6f3   :  { %4601 = vmatpush.bf16.msrb.mxu0 %v9795_v53  ;;  %v6823_v53 = vld [vmem:[#allocation4 + $0x4d8] sm:$0xff] }
 0x6f6   :  { %6415 = vmatmul.msk.bf16.vlgmr.msrb.gmra.mxu0 %vm573_vm1, %v8735_v63 }
 0x6f7   :  { %v4258_v49 = vpop.f32.mrf.mxu0  ;;  %4633 = vmatpush.bf16.msra.mxu0 %v9798_v1  ;;  %v6821_v1 = vld [vmem:[#allocation4 + $0x4c8] sm:$0xff] }
 0x6ff   :  { %v4321_v42 = vpop.f32.mrf.mxu0 }
 0x705   :  { %v4308_v10 = vpop.f32.mrf.mxu1 }
 0x706   :  { %v8745_v32 = vadd.f32 %v4321_v42, %v4308_v10  ;;  %v6825_v42 = vld [vmem:[#allocation4 + $0x4e8] sm:$0xff]  ;;  %v9797_v10 = vld [vmem:[#allocation47_spill] sm:$0xff] }
 0x707   :  { %v4323_v11 = vpop.f32.mrf.mxu0  ;;  %4585 = vmatpush.bf16.msra.mxu1 %v9797_v10  ;;  %4481 = vmatpush.bf16.msrb.mxu3 %v6825_v42  ;;  %v9803_v10 = vld [vmem:[#allocation60_spill] sm:$0xff] }
 0x708   :  { %v9799_v11 = vld [vmem:[#allocation52_spill] sm:$0xff] }
 0x70b   :  { %4586 = vmatpush.bf16.msra.mxu1 %v9799_v11  ;;  %4482 = vmatpush.bf16.msrb.mxu3 %v6824_v55  ;;  %v6819_v55 = vld [vmem:[#allocation4 + $0x4b8] sm:$0xff] }
 0x70c   :  { %4466 = vmatpush.bf16.msra.mxu2 %v6819_v55  ;;  %v9810_v11 = vld [vmem:[#allocation59_spill] sm:$0xff]  ;;  %v9813_v55 = vld [vmem:[#allocation64_spill] sm:$0xff] }
 0x70d   :  { %v4310_v49 = vpop.f32.mrf.mxu1 }
 0x70e   :  { %v9800_v49 = vld [vmem:[#allocation44_spill] sm:$0xff] }
 0x70f   :  { %4634 = vmatpush.bf16.msra.mxu0 %v9800_v49  ;;  %4587 = vmatpush.bf16.msra.mxu1 %v9801_v61  ;;  %v6820_v49 = vld [vmem:[#allocation4 + $0x4c0] sm:$0xff]  ;;  %v9809_v61 = vld [vmem:[#allocation85_spill] sm:$0xff] }
 0x710   :  { %4483 = vmatpush.bf16.msrb.mxu3 %v6823_v53  ;;  %v9806_v53 = vld [vmem:[#allocation78_spill] sm:$0xff] }
 0x713   :  { %4635 = vmatpush.bf16.msra.mxu0 %v9802_v21  ;;  %4588 = vmatpush.bf16.msra.mxu1 %v9803_v10  ;;  %v9807_v21 = vld [vmem:[#allocation55_spill] sm:$0xff] }
 0x714   :  { %4484 = vmatpush.bf16.msrb.mxu3 %v6822_v17  ;;  %v6818_v17 = vld [vmem:[#allocation4 + $0x4b0] sm:$0xff] }
 0x715   :  { %4467 = vmatpush.bf16.msra.mxu2 %v6818_v17  ;;  %v9815_v17 = vld [vmem:[#allocation88_spill] sm:$0xff] }
 0x716   :  { %4589 = vmatmul.bf16.vlgmr.msra.gmra.mxu1 %v8740_v6 }
 0x717   :  { %4651 = vmatpush.bf16.msrb.mxu1 %v9804_v59  ;;  %4636 = vmatpush.bf16.msra.mxu0 %v9805_v29  ;;  %v9808_v59 = vld [vmem:[#allocation82_spill] sm:$0xff]  ;;  %v6817_v29 = vld [vmem:[#allocation4 + $0x4a8] sm:$0xff] }
 0x718   :  { %4485 = vmatpush.bf16.msrb.mxu3 %v6821_v1  ;;  %v9811_v1 = vld [vmem:[#allocation25_spill] sm:$0xff] }
 0x719   :  { %4468 = vmatpush.bf16.msra.mxu2 %v6817_v29  ;;  %v9817_v29 = vld [vmem:[#allocation71_spill] sm:$0xff] }
 0x71b   :  { %4652 = vmatpush.bf16.msrb.mxu1 %v9806_v53  ;;  %4637 = vmatpush.bf16.msra.mxu0 %v9807_v21  ;;  %v9812_v53 = vld [vmem:[#allocation87_spill] sm:$0xff]  ;;  %v6816_v21 = vld [vmem:[#allocation4 + $0x4a0] sm:$0xff] }
 0x71c   :  { %4486 = vmatpush.bf16.msrb.mxu3 %v6820_v49 }
 0x71d   :  { %4469 = vmatpush.bf16.msra.mxu2 %v6816_v21  ;;  %v9818_v21 = vld [vmem:[#allocation33_spill] sm:$0xff] }
 0x71f   :  { %4653 = vmatpush.bf16.msrb.mxu1 %v9808_v59  ;;  %4638 = vmatpush.bf16.msra.mxu0 %v9810_v11  ;;  %v9814_v59 = vld [vmem:[#allocation29_spill] sm:$0xff]  ;;  %v6815_v11 = vld [vmem:[#allocation4 + $0x498] sm:$0xff] }
 0x720   :  { %4555 = vmatpush.bf16.msra.mxu3 %v9758_v44  ;;  %v9816_v44 = vld [vmem:[#allocation68_spill] sm:$0xff] }
 0x721   :  { %4470 = vmatpush.bf16.msra.mxu2 %v6815_v11  ;;  %v9822_v11 = vld [vmem:[#allocation41_spill] sm:$0xff] }
 0x723   :  { %4685 = vmatpush.bf16.msra.mxu1 %v9809_v61  ;;  %4639 = vmatpush.bf16.msra.mxu0 %v9813_v55  ;;  %v9821_v55 = vld [vmem:[#allocation8_spill] sm:$0xff] }
 0x724   :  { %4556 = vmatpush.bf16.msra.mxu3 %v9811_v1 }
 0x725   :  { %v4090_v42 = vpop.f32.mrf.mxu3 }
 0x726   :  { %6417 = vmatmul.msk.bf16.vlgmr.msrb.gmra.mxu1 %vm573_vm1, %v8735_v63 }
 0x727   :  { %4686 = vmatpush.bf16.msra.mxu1 %v9812_v53  ;;  %4640 = vmatpush.bf16.msra.mxu0 %v9816_v44 }
 0x728   :  { %4557 = vmatpush.bf16.msra.mxu3 %v9814_v59  ;;  %v9819_v59 = vld [vmem:[#allocation89_spill] sm:$0xff] }
 0x72a   :  { %4641 = vmatmul.bf16.vlgmr.msra.gmra.mxu0 %v8740_v6 }
 0x72b   :  { %4687 = vmatpush.bf16.msra.mxu1 %v9815_v17  ;;  %4703 = vmatpush.bf16.msrb.mxu0 %v9817_v29  ;;  %v6813_v29 = vld [vmem:[#allocation4 + $0x488] sm:$0xff]  ;;  %v9824_v17 = vld [vmem:[#allocation10_spill] sm:$0xff] }
 0x72c   :  { %4558 = vmatpush.bf16.msra.mxu3 %v9818_v21  ;;  %v9823_v21 = vld [vmem:[#allocation91_spill] sm:$0xff] }
 0x72d   :  { %v4092_v10 = vpop.f32.mrf.mxu3 }
 0x72f   :  { %4688 = vmatpush.bf16.msra.mxu1 %v9819_v59  ;;  %v6812_v59 = vld [vmem:[#allocation4 + $0x480] sm:$0xff] }
 0x730   :  { %4559 = vmatpush.bf16.msra.mxu3 %v9771_v45 }
 0x733   :  { %4689 = vmatpush.bf16.msra.mxu1 %v9770_v22 }
 0x734   :  { %4560 = vmatpush.bf16.msra.mxu3 %v9822_v11  ;;  %v9826_v11 = vld [vmem:[#allocation93_spill] sm:$0xff] }
 0x735   :  { %v4178_v49 = vpop.f32.mrf.mxu3 }
 0x736   :  { %v8781_v10 = vadd.f32 %v8718_v31, %v4178_v49  ;;  %v6814_v31 = vld [vmem:[#allocation4 + $0x490] sm:$0xff]  ;;  %v9820_v49 = vld [vmem:[#allocation75_spill] sm:$0xff] }
 0x737   :  { %4704 = vmatpush.bf16.msrb.mxu0 %v9820_v49  ;;  %4471 = vmatpush.bf16.msra.mxu2 %v6814_v31 }
 0x738   :  { %4690 = vmatpush.bf16.msra.mxu1 %v9823_v21  ;;  %4561 = vmatpush.bf16.msra.mxu3 %v9515_v27 }
 0x73b   :  { %4705 = vmatpush.bf16.msrb.mxu0 %v9772_v36  ;;  %4472 = vmatpush.bf16.msra.mxu2 %v6813_v29  ;;  %v9825_v29 = vld [vmem:[#allocation49_spill] sm:$0xff] }
 0x73c   :  { %4691 = vmatpush.bf16.msra.mxu1 %v9726_v54  ;;  %4562 = vmatpush.bf16.msra.mxu3 %v9825_v29 }
 0x73d   :  { %v4180_v44 = vpop.f32.mrf.mxu3 }
 0x73e   :  { %6419 = vmatmul.msk.bf16.vlgmr.msrb.gmra.mxu0 %vm573_vm1, %v8735_v63 }
 0x73f   :  { %4901 = vmatpush.bf16.msra.mxu0 %v9821_v55  ;;  %4473 = vmatpush.bf16.msra.mxu2 %v6812_v59  ;;  %v9828_v59 = vld [vmem:[#allocation11_spill] sm:$0xff] }
 0x740   :  { %4692 = vmatpush.bf16.msra.mxu1 %v9826_v11 }
 0x743   :  { %4902 = vmatpush.bf16.msra.mxu0 %v9824_v17  ;;  %4529 = vmatpush.bf16.msrb.mxu2 %v9727_v41  ;;  %v9827_v17 = vld [vmem:[#allocation13_spill] sm:$0xff] }
 0x744   :  { %4919 = vmatpush.bf16.msrb.mxu1 %v9828_v59 }
 0x745   :  { %v4077_v49 = vpop.f32.mrf.mxu2  ;;  %v4243_v44 = vpop.f32.mrf.mxu3  ;;  %4693 = vmatmul.bf16.vlgmr.msra.gmra.mxu1 %v8740_v6 }
 0x746   :  { %v4091_v31 = vadd.f32 %v4090_v42, %v4077_v49  ;;  %v9829_v42 = vld [vmem:[#allocation20_spill] sm:$0xff] }
 0x747   :  { %4903 = vmatpush.bf16.msra.mxu0 %v9777_v50  ;;  %4530 = vmatpush.bf16.msrb.mxu2 %v9827_v17  ;;  %v4881_v50 = vld [vmem:[%s9052_s0 + $0x30] sm:$0xff] }
 0x748   :  { %v8805_v55 = vadd.f32 %v4091_v31, %v8654_v19  ;;  %v4884_v19 = vpack.c.bf16 %v4881_v50, %v4881_v50  ;;  %4920 = vmatpush.bf16.msrb.mxu1 %v9734_v23  ;;  %v9830_v31 = vld [vmem:[#allocation18_spill] sm:$0xff]  ;;  %v9832_v50 = vld [vmem:[#allocation32_spill] sm:$0xff] }
 0x74a   :  { %4892 = vrot.lane.b32.xlu1 %v4884_v19, %s6951_s3 }
 0x74b   :  { %4904 = vmatpush.bf16.msra.mxu0 %v9829_v42  ;;  %4531 = vmatpush.bf16.msrb.mxu2 %v9733_v52 }
 0x74c   :  { %4921 = vmatpush.bf16.msrb.mxu1 %v9830_v31 }
 0x74d   :  { %v4079_v49 = vpop.f32.mrf.mxu2  ;;  %v4245_v41 = vpop.f32.mrf.mxu3 }
 0x74e   :  { %v9831_v41 = vld [vmem:[#allocation28_spill] sm:$0xff] }
 0x74f   :  { %4905 = vmatpush.bf16.msra.mxu0 %v9735_v33  ;;  %4532 = vmatpush.bf16.msrb.mxu2 %v9783_v34  ;;  %v9833_v33 = vmax.f32 %v8733_v57, %v8745_v32  ;;  %v9835_v57 = vld [vmem:[#allocation37_spill] sm:$0xff]  ;;  %v9836_v32 = vld [vmem:[#allocation62_spill] sm:$0xff] }
 0x750   :  { %4945 = vmatpush.bf16.msra.mxu1 %v9738_v37 }
 0x753   :  { %4906 = vmatpush.bf16.msra.mxu0 %v9831_v41  ;;  %4533 = vmatpush.bf16.msrb.mxu2 %v9638_v62  ;;  %v9834_v41 = vld [vmem:[#allocation26_spill] sm:$0xff] }
 0x754   :  { %4946 = vmatpush.bf16.msra.mxu1 %v9639_v58 }
 0x755   :  { %v4152_v59 = vpop.f32.mrf.mxu2  ;;  %v4282_v42 = vpop.f32.mrf.mxu3 }
 0x756   :  { %v4166_v49 = vadd.f32 %v8716_v56, %v4152_v59 }
 0x757   :  { %4907 = vmatpush.bf16.msra.mxu0 %v9832_v50  ;;  %4534 = vmatpush.bf16.msrb.mxu2 %v9535_v46 }
 0x758   :  { %v4326_v23 = vmax.f32 %v4166_v49, %v8726_v28  ;;  %4947 = vmatpush.bf16.msra.mxu1 %v9590_v40  ;;  %v9837_v49 = vld [vmem:[#allocation30_spill] sm:$0xff]  ;;  %v9838_v40 = vld [vmem:[#allocation67_spill] sm:$0xff] }
 0x75a   :  { %v4330_v19 = vmax.f32 %v4326_v23, %v9833_v33 }
 0x75b   :  { %4908 = vmatpush.bf16.msra.mxu0 %v9591_v3  ;;  %4535 = vmatpush.bf16.msrb.mxu2 %v9593_v9  ;;  %v9839_v3 = vld [vmem:[#allocation72_spill] sm:$0xff] }
 0x75c   :  { %v4332_v37 = vadd.f32 %v4330_v19, %v9589_v8 }
 0x75d   :  { %v4154_v56 = vpop.f32.mrf.mxu2  ;;  %v4284_v31 = vpop.f32.mrf.mxu3 }
 0x75e   :  { %v4334_v28 = vmax.f32 %v4332_v37, 0.0  ;;  %v9840_v31 = vmax.f32 %v8705_v60, %v8781_v10  ;;  %v4525_v60 = vpop.f32.mrf.mxu1 }
 0x75f   :  { %4971 = vmatpush.bf16.msrb.mxu0 %v9642_v39  ;;  %4536 = vmatpush.bf16.msrb.mxu2 %v9835_v57  ;;  %v4879_v39 = vld [vmem:[%s9052_s0 + $0x20] sm:$0xff] }
 0x760   :  { %v4336_v58 = vpack.c.bf16 %v4334_v28, %v4334_v28  ;;  %v4882_v23 = vpack.c.bf16 %v4879_v39, %v4879_v39 }
 0x762   :  { %4487 = vmatmul.bf16.vlgmr.msrb.gmra.mxu3 %v4336_v58  ;;  %4888 = vrot.lane.b32.xlu2 %v4882_v23, %s6951_s3 }
 0x763   :  { %4972 = vmatpush.bf16.msrb.mxu0 %v9834_v41  ;;  %4625 = vmatpush.bf16.msrb.mxu3 %v9836_v32 }
 0x765   :  { %v4230_v59 = vpop.f32.mrf.mxu2 }
 0x766   :  { %v4244_v19 = vadd.f32 %v4243_v44, %v4230_v59  ;;  %v4512_v44 = vpop.f32.mrf.mxu0  ;;  %v4527_v59 = vpop.f32.mrf.mxu1 }
 0x767   :  { %4973 = vmatpush.bf16.msrb.mxu0 %v9837_v49  ;;  %4626 = vmatpush.bf16.msrb.mxu3 %v9838_v40  ;;  %v8864_v10 = vadd.f32 %v4525_v60, %v4512_v44 }
 0x76b   :  { %4627 = vmatpush.bf16.msrb.mxu3 %v9839_v3 }
 0x76d   :  { %v4232_v50 = vpop.f32.mrf.mxu2 }
 0x76e   :  { %v8877_v50 = vpop.f32.mrf.mxu1 }
 0x772   :  { %4563 = vmatmul.bf16.vlgmr.msra.gmra.mxu3 %v8740_v6 }
 0x773   :  { %4659 = vmatpush.bf16.msra.mxu3 %v9600_v2 }
 0x775   :  { %v4295_v33 = vpop.f32.mrf.mxu2 }
 0x776   :  { %v4296_v37 = vadd.f32 %v4295_v33, %v4282_v42  ;;  %v4514_v42 = vpop.f32.mrf.mxu0 }
 0x777   :  { %4660 = vmatpush.bf16.msra.mxu3 %v9549_v26 }
 0x778   :  { %v4327_v56 = vmax.f32 %v4244_v19, %v4296_v37  ;;  %v4553_v19 = vpop.f32.mrf.mxu1 }
 0x77a   :  { %v4329_v28 = vmax.f32 %v9840_v31, %v4327_v56 }
 0x77b   :  { %4661 = vmatpush.bf16.msra.mxu3 %v9551_v13 }
 0x77c   :  { %v4331_v58 = vadd.f32 %v4329_v28, %v9496_v14 }
 0x77d   :  { %v4297_v41 = vpop.f32.mrf.mxu2 }
 0x77e   :  { %v4333_v49 = vmax.f32 %v4331_v58, 0.0  ;;  %v8875_v23 = vpop.f32.mrf.mxu0 }
 0x77f   :  { %4662 = vmatpush.bf16.msra.mxu3 %v9552_v18 }
 0x780   :  { %v4335_v39 = vpack.c.bf16 %v4333_v49, %v4333_v49 }
 0x782   :  { %4474 = vmatmul.bf16.vlgmr.msra.gmra.mxu2 %v4335_v39  ;;  %6416 = vmatmul.msk.bf16.vlgmr.msrb.gmra.mxu3 %vm573_vm1, %v8735_v63 }
 0x783   :  { %4607 = vmatpush.bf16.msra.mxu2 %v9497_v48  ;;  %4663 = vmatpush.bf16.msra.mxu3 %v9553_v35 }
 0x786   :  { %v4579_v33 = vpop.f32.mrf.mxu0 }
 0x787   :  { %4608 = vmatpush.bf16.msra.mxu2 %v9498_v20  ;;  %4664 = vmatpush.bf16.msra.mxu3 %v9554_v51 }
 0x78b   :  { %4609 = vmatpush.bf16.msra.mxu2 %v9499_v43  ;;  %4665 = vmatpush.bf16.msra.mxu3 %v9555_v25 }
 0x78e   :  { %v4603_v37 = vpop.f32.mrf.mxu0 }
 0x78f   :  { %4610 = vmatpush.bf16.msra.mxu2 %v9500_v30  ;;  %4666 = vmatpush.bf16.msra.mxu3 %v9556_v15 }
 0x792   :  { %4537 = vmatmul.bf16.vlgmr.msrb.gmra.mxu2 %v8740_v6  ;;  %4667 = vmatmul.bf16.vlgmr.msra.gmra.mxu3 %v8740_v6 }
 0x793   :  { %4611 = vmatpush.bf16.msra.mxu2 %v9602_v4  ;;  %v4590_v56 = vpop.f32.mrf.mxu1 }
 0x794   :  { %v8885_v31 = vadd.f32 %v4603_v37, %v4590_v56 }
 0x796   :  { %v4605_v28 = vpop.f32.mrf.mxu0 }
 0x797   :  { %4612 = vmatpush.bf16.msra.mxu2 %v9651_v12  ;;  %v9841_v28 = vld [vmem:[#allocation50_spill] sm:$0xff] }
 0x79b   :  { %4613 = vmatpush.bf16.msra.mxu2 %v9698_v0  ;;  %v4592_v58 = vpop.f32.mrf.mxu1 }
 0x79f   :  { %4614 = vmatpush.bf16.msra.mxu2 %v9699_v38 }
 0x7a2   :  { %4615 = vmatmul.bf16.vlgmr.msra.gmra.mxu2 %v8740_v6  ;;  %v4891_v6 = vpop.permute.xlu0 %4890 }
 0x7a3   :  { %4677 = vmatpush.bf16.msrb.mxu2 %v9700_v7  ;;  %v4655_v41 = vpop.f32.mrf.mxu1 }
 0x7a7   :  { %4678 = vmatpush.bf16.msrb.mxu2 %v9746_v16  ;;  %v4642_v49 = vpop.f32.mrf.mxu0 }
 0x7a8   :  { %v8890_v39 = vadd.f32 %v4655_v41, %v4642_v49  ;;  %v9842_v41 = vld [vmem:[#allocation38_spill] sm:$0xff]  ;;  %v6843_v49 = vld [vmem:[#allocation4 + $0x578] sm:$0xff] }
 0x7a9   :  { %4865 = vmatpush.bf16.msrb.mxu3 %v6843_v49  ;;  %v9849_v49 = vld [vmem:[#allocation56_spill] sm:$0xff] }
 0x7ab   :  { %4679 = vmatpush.bf16.msrb.mxu2 %v9747_v5  ;;  %v4657_v44 = vpop.f32.mrf.mxu1 }
 0x7ac   :  { %v9843_v44 = vld [vmem:[#allocation54_spill] sm:$0xff] }
 0x7af   :  { %v4644_v60 = vpop.f32.mrf.mxu0 }
 0x7b2   :  { %6418 = vmatmul.msk.bf16.vlgmr.msrb.gmra.mxu2 %vm573_vm1, %v8735_v63 }
 0x7bb   :  { %v4707_v33 = vpop.f32.mrf.mxu0 }
 0x7bc   :  { %v4893_v42 = vpop.permute.xlu1 %4892  ;;  %v4889_v19 = vpop.permute.xlu2 %4888 }
 0x7bd   :  { %v8892_v59 = vsel %vm4894_vm12, %v4891_v6, %v4893_v42  ;;  %v8897_v37 = vsel %vm4894_vm12, %v4889_v19, %v4891_v6  ;;  %v9844_v6 = vld [vmem:[#allocation42_spill] sm:$0xff]  ;;  %v6841_v19 = vld [vmem:[#allocation4 + $0x568] sm:$0xff] }
 0x7be   :  { %6484 = vmatmul.msk.bf16.vlgmr.msrb.gmra.mxu1 %vm573_vm1, %v8892_v59  ;;  %4909 = vmatmul.bf16.vlgmr.msra.gmra.mxu0 %v8897_v37  ;;  %v9845_v42 = vld [vmem:[#allocation58_spill] sm:$0xff] }
 0x7bf   :  { %4979 = vmatpush.bf16.msrb.mxu1 %v7093_v24  ;;  %4997 = vmatpush.bf16.msra.mxu0 %v9841_v28  ;;  %v6842_v24 = vld [vmem:[#allocation4 + $0x570] sm:$0xff]  ;;  %v9847_v28 = vld [vmem:[#allocation52_spill] sm:$0xff] }
 0x7c0   :  { %4866 = vmatpush.bf16.msrb.mxu3 %v6842_v24  ;;  %v6839_v24 = vld [vmem:[#allocation4 + $0x558] sm:$0xff] }
 0x7c2   :  { %v4694_v63 = vpop.f32.mrf.mxu1 }
 0x7c3   :  { %4980 = vmatpush.bf16.msrb.mxu1 %v7106_v47  ;;  %v8901_v56 = vadd.f32 %v4707_v33, %v4694_v63  ;;  %4998 = vmatpush.bf16.msra.mxu0 %v9843_v44  ;;  %v4709_v60 = vpop.f32.mrf.mxu0  ;;  %v9846_v33 = vld [vmem:[#allocation47_spill] sm:$0xff]  ;;  %v6840_v63 = vld [vmem:[#allocation4 + $0x560] sm:$0xff] }
 0x7c4   :  { %4867 = vmatpush.bf16.msrb.mxu3 %v6841_v19  ;;  %v9850_v44 = vld [vmem:[#allocation44_spill] sm:$0xff]  ;;  %v6838_v60 = vld [vmem:[#allocation4 + $0x550] sm:$0xff] }
 0x7c5   :  { %v4714_v58 = vmax.f32 %v8890_v39, %v8901_v56  ;;  %v9854_v19 = vld [vmem:[#allocation78_spill] sm:$0xff] }
 0x7c7   :  { %4981 = vmatpush.bf16.msrb.mxu1 %v9842_v41  ;;  %4999 = vmatpush.bf16.msra.mxu0 %v9845_v42  ;;  %v9848_v41 = vld [vmem:[#allocation40_spill] sm:$0xff]  ;;  %v9853_v42 = vld [vmem:[#allocation46_spill] sm:$0xff] }
 0x7c8   :  { %4868 = vmatpush.bf16.msrb.mxu3 %v6840_v63  ;;  %v6837_v63 = vld [vmem:[#allocation4 + $0x548] sm:$0xff] }
 0x7ca   :  { %v4696_v47 = vpop.f32.mrf.mxu1 }
 0x7cb   :  { %4982 = vmatpush.bf16.msrb.mxu1 %v9844_v6  ;;  %v9851_v6 = vld [vmem:[#allocation60_spill] sm:$0xff]  ;;  %v9852_v47 = vld [vmem:[#allocation74_spill] sm:$0xff] }
 0x7cc   :  { %4869 = vmatpush.bf16.msrb.mxu3 %v6839_v24  ;;  %v9856_v24 = vld [vmem:[#allocation82_spill] sm:$0xff] }
 0x7ce   :  { %6485 = vmatmul.msk.bf16.vlgmr.msra.gmra.mxu1 %vm573_vm1, %v8892_v59  ;;  %6486 = vmatmul.msk.bf16.vlgmr.msrb.gmra.mxu0 %vm573_vm1, %v8892_v59 }
 0x7cf   :  { %4983 = vmatpush.bf16.msrb.mxu1 %v9846_v33  ;;  %5031 = vmatpush.bf16.msrb.mxu0 %v9848_v41  ;;  %v6835_v41 = vld [vmem:[#allocation4 + $0x538] sm:$0xff] }
 0x7d0   :  { %4870 = vmatpush.bf16.msrb.mxu3 %v6838_v60  ;;  %4852 = vmatpush.bf16.msra.mxu2 %v6835_v41  ;;  %v6834_v60 = vld [vmem:[#allocation4 + $0x530] sm:$0xff]  ;;  %v6832_v41 = vld [vmem:[#allocation4 + $0x520] sm:$0xff] }
 0x7d3   :  { %4984 = vmatpush.bf16.msrb.mxu1 %v9847_v28  ;;  %5032 = vmatpush.bf16.msrb.mxu0 %v9850_v44  ;;  %v9855_v28 = vld [vmem:[#allocation51_spill] sm:$0xff] }
 0x7d4   :  { %4871 = vmatpush.bf16.msrb.mxu3 %v6837_v63  ;;  %v9857_v44 = vld [vmem:[#allocation55_spill] sm:$0xff]  ;;  %4853 = vmatpush.bf16.msra.mxu2 %v6834_v60  ;;  %v9860_v63 = vld [vmem:[#allocation64_spill] sm:$0xff] }
 0x7d7   :  { %4985 = vmatpush.bf16.msrb.mxu1 %v9849_v49  ;;  %5033 = vmatpush.bf16.msrb.mxu0 %v9853_v42  ;;  %v6836_v49 = vld [vmem:[#allocation4 + $0x540] sm:$0xff]  ;;  %v6833_v42 = vld [vmem:[#allocation4 + $0x528] sm:$0xff] }
 0x7d8   :  { %4872 = vmatpush.bf16.msrb.mxu3 %v6836_v49  ;;  %4854 = vmatpush.bf16.msra.mxu2 %v6833_v42  ;;  %v9862_v49 = vld [vmem:[#allocation29_spill] sm:$0xff]  ;;  %v6830_v42 = vld [vmem:[#allocation4 + $0x510] sm:$0xff] }
 0x7db   :  { %4986 = vmatpush.bf16.msrb.mxu1 %v9851_v6  ;;  %5034 = vmatpush.bf16.msrb.mxu0 %v9855_v28  ;;  %v9861_v28 = vld [vmem:[#allocation88_spill] sm:$0xff] }
 0x7dc   :  { %4855 = vmatpush.bf16.msra.mxu2 %v6832_v41 }
 0x7de   :  { %4987 = vmatmul.bf16.vlgmr.msrb.gmra.mxu1 %v8897_v37  ;;  %6487 = vmatmul.msk.bf16.vlgmr.msra.gmra.mxu0 %vm573_vm1, %v8892_v59 }
 0x7df   :  { %5049 = vmatpush.bf16.msra.mxu1 %v9852_v47  ;;  %5035 = vmatpush.bf16.msrb.mxu0 %v9857_v44  ;;  %v9858_v47 = vld [vmem:[#allocation21_spill] sm:$0xff]  ;;  %v9863_v44 = vld [vmem:[#allocation68_spill] sm:$0xff] }
 0x7e0   :  { %4953 = vmatpush.bf16.msra.mxu3 %v9858_v47  ;;  %v9866_v47 = vld [vmem:[#allocation33_spill] sm:$0xff] }
 0x7e3   :  { %5050 = vmatpush.bf16.msra.mxu1 %v9854_v19  ;;  %v9859_v19 = vld [vmem:[#allocation59_spill] sm:$0xff] }
 0x7e4   :  { %5036 = vmatpush.bf16.msrb.mxu0 %v9859_v19  ;;  %4954 = vmatpush.bf16.msra.mxu3 %v9811_v1  ;;  %v6831_v1 = vld [vmem:[#allocation4 + $0x518] sm:$0xff] }
 0x7e5   :  { %v4488_v33 = vpop.f32.mrf.mxu3  ;;  %4856 = vmatpush.bf16.msra.mxu2 %v6831_v1 }
 0x7e7   :  { %5051 = vmatpush.bf16.msra.mxu1 %v9856_v24 }
 0x7e8   :  { %5037 = vmatpush.bf16.msrb.mxu0 %v9860_v63  ;;  %4955 = vmatpush.bf16.msra.mxu3 %v9862_v49  ;;  %v6829_v63 = vld [vmem:[#allocation4 + $0x508] sm:$0xff] }
 0x7e9   :  { %4857 = vmatpush.bf16.msra.mxu2 %v6830_v42  ;;  %v9869_v49 = vld [vmem:[#allocation9_spill] sm:$0xff]  ;;  %v6858_v42 = vld [vmem:[#allocation4 + $0x5f0] sm:$0xff] }
 0x7eb   :  { %5083 = vmatpush.bf16.msrb.mxu1 %v9809_v61 }
 0x7ec   :  { %5038 = vmatpush.bf16.msrb.mxu0 %v9863_v44  ;;  %4956 = vmatpush.bf16.msra.mxu3 %v9866_v47  ;;  %v6859_v47 = vld [vmem:[#allocation4 + $0x5f8] sm:$0xff] }
 0x7ed   :  { %v4490_v6 = vpop.f32.mrf.mxu3  ;;  %4858 = vmatpush.bf16.msra.mxu2 %v6829_v63  ;;  %v6855_v63 = vld [vmem:[#allocation4 + $0x5d8] sm:$0xff] }
 0x7ee   :  { %6489 = vmatmul.msk.bf16.vlgmr.msra.gmra.mxu1 %vm573_vm1, %v8892_v59  ;;  %v9865_v6 = vld [vmem:[#allocation71_spill] sm:$0xff] }
 0x7ef   :  { %5084 = vmatpush.bf16.msrb.mxu1 %v9812_v53  ;;  %v9864_v53 = vld [vmem:[#allocation89_spill] sm:$0xff]  ;;  %5039 = vmatmul.bf16.vlgmr.msrb.gmra.mxu0 %v8897_v37 }
 0x7f0   :  { %5101 = vmatpush.bf16.msra.mxu0 %v9865_v6  ;;  %4957 = vmatpush.bf16.msra.mxu3 %v9771_v45 }
 0x7f3   :  { %5085 = vmatpush.bf16.msrb.mxu1 %v9861_v28  ;;  %v6828_v28 = vld [vmem:[#allocation4 + $0x500] sm:$0xff] }
 0x7f4   :  { %4859 = vmatpush.bf16.msra.mxu2 %v6828_v28  ;;  %v6854_v28 = vld [vmem:[#allocation4 + $0x5d0] sm:$0xff] }
 0x7f5   :  { %v4564_v61 = vpop.f32.mrf.mxu3 }
 0x7f6   :  { %v8940_v24 = vadd.f32 %v8875_v23, %v4564_v61  ;;  %v9867_v23 = vld [vmem:[#allocation75_spill] sm:$0xff] }
 0x7f7   :  { %5086 = vmatpush.bf16.msrb.mxu1 %v9864_v53  ;;  %5102 = vmatpush.bf16.msra.mxu0 %v9867_v23  ;;  %v6857_v23 = vld [vmem:[#allocation4 + $0x5e8] sm:$0xff] }
 0x7f8   :  { %v4711_v60 = vmax.f32 %v8864_v10, %v8940_v24  ;;  %v9868_v10 = vld [vmem:[#allocation41_spill] sm:$0xff]  ;;  %4927 = vmatpush.bf16.msrb.mxu2 %v9869_v49 }
 0x7f9   :  { %4958 = vmatpush.bf16.msra.mxu3 %v9868_v10 }
 0x7fb   :  { %5087 = vmatpush.bf16.msrb.mxu1 %v9770_v22  ;;  %5103 = vmatpush.bf16.msra.mxu0 %v9772_v36 }
 0x7fc   :  { %4928 = vmatpush.bf16.msrb.mxu2 %v9827_v17 }
 0x7fd   :  { %v4566_v19 = vpop.f32.mrf.mxu3  ;;  %4959 = vmatpush.bf16.msra.mxu3 %v9515_v27 }
 0x7ff   :  { %5088 = vmatpush.bf16.msrb.mxu1 %v9823_v21  ;;  %6491 = vmatmul.msk.bf16.vlgmr.msra.gmra.mxu0 %vm573_vm1, %v8892_v59 }
 0x800   :  { %4929 = vmatpush.bf16.msrb.mxu2 %v9733_v52 }
 0x801   :  { %4960 = vmatpush.bf16.msra.mxu3 %v9825_v29 }
 0x803   :  { %5089 = vmatpush.bf16.msrb.mxu1 %v9726_v54 }
 0x804   :  { %4930 = vmatpush.bf16.msrb.mxu2 %v9783_v34 }
 0x805   :  { %v4475_v41 = vpop.f32.mrf.mxu2  ;;  %v4629_v22 = vpop.f32.mrf.mxu3 }
 0x806   :  { %v4489_v61 = vadd.f32 %v4488_v33, %v4475_v41 }
 0x807   :  { %5090 = vmatpush.bf16.msrb.mxu1 %v9826_v11 }
 0x808   :  { %v8960_v45 = vadd.f32 %v4489_v61, %v8805_v55  ;;  %4931 = vmatpush.bf16.msrb.mxu2 %v9638_v62  ;;  %v6853_v61 = vld [vmem:[#allocation4 + $0x5c8] sm:$0xff] }
 0x80a   :  { %5091 = vmatmul.bf16.vlgmr.msrb.gmra.mxu1 %v8897_v37 }
 0x80c   :  { %4932 = vmatpush.bf16.msrb.mxu2 %v9535_v46 }
 0x80d   :  { %v4477_v54 = vpop.f32.mrf.mxu2  ;;  %v4631_v36 = vpop.f32.mrf.mxu3 }
 0x80e   :  { %v6852_v54 = vld [vmem:[#allocation4 + $0x5c0] sm:$0xff]  ;;  %v6851_v36 = vld [vmem:[#allocation4 + $0x5b8] sm:$0xff] }
 0x810   :  { %4933 = vmatpush.bf16.msrb.mxu2 %v9593_v9 }
 0x814   :  { %4934 = vmatpush.bf16.msrb.mxu2 %v9835_v57 }
 0x815   :  { %v4538_v27 = vpop.f32.mrf.mxu2  ;;  %v4668_v21 = vpop.f32.mrf.mxu3 }
 0x816   :  { %v4552_v11 = vadd.f32 %v8877_v50, %v4538_v27 }
 0x818   :  { %v4712_v55 = vmax.f32 %v4552_v11, %v8885_v31  ;;  %v6850_v11 = vld [vmem:[#allocation4 + $0x5b0] sm:$0xff] }
 0x81a   :  { %v4716_v29 = vmax.f32 %v4712_v55, %v4714_v58 }
 0x81c   :  { %v4718_v17 = vadd.f32 %v4716_v29, %v9589_v8  ;;  %v6849_v29 = vld [vmem:[#allocation4 + $0x5a8] sm:$0xff] }
 0x81d   :  { %v4540_v33 = vpop.f32.mrf.mxu2  ;;  %v4670_v52 = vpop.f32.mrf.mxu3 }
 0x81e   :  { %v4720_v24 = vmax.f32 %v4718_v17, 0.0 }
 0x820   :  { %v4722_v34 = vpack.c.bf16 %v4720_v24, %v4720_v24  ;;  %v6848_v24 = vld [vmem:[#allocation4 + $0x5a0] sm:$0xff] }
 0x822   :  { %4873 = vmatmul.bf16.vlgmr.msrb.gmra.mxu3 %v4722_v34  ;;  %v6847_v34 = vld [vmem:[#allocation4 + $0x598] sm:$0xff] }
 0x823   :  { %5023 = vmatpush.bf16.msrb.mxu3 %v9836_v32 }
 0x825   :  { %v4616_v62 = vpop.f32.mrf.mxu2 }
 0x826   :  { %v4630_v31 = vadd.f32 %v4629_v22, %v4616_v62 }
 0x827   :  { %5024 = vmatpush.bf16.msrb.mxu3 %v9838_v40 }
 0x82b   :  { %5025 = vmatpush.bf16.msrb.mxu3 %v9839_v3 }
 0x82d   :  { %v4618_v50 = vpop.f32.mrf.mxu2 }
 0x832   :  { %4961 = vmatmul.bf16.vlgmr.msra.gmra.mxu3 %v8897_v37 }
 0x833   :  { %5057 = vmatpush.bf16.msra.mxu3 %v9600_v2 }
 0x835   :  { %v4681_v46 = vpop.f32.mrf.mxu2 }
 0x836   :  { %v4682_v39 = vadd.f32 %v4681_v46, %v4668_v21  ;;  %v6846_v46 = vld [vmem:[#allocation4 + $0x590] sm:$0xff] }
 0x837   :  { %5058 = vmatpush.bf16.msra.mxu3 %v9549_v26 }
 0x838   :  { %v4713_v9 = vmax.f32 %v4630_v31, %v4682_v39 }
 0x83a   :  { %v4715_v56 = vmax.f32 %v4711_v60, %v4713_v9  ;;  %v6845_v9 = vld [vmem:[#allocation4 + $0x588] sm:$0xff] }
 0x83b   :  { %5059 = vmatpush.bf16.msra.mxu3 %v9551_v13  ;;  %v4923_v2 = vpop.f32.mrf.mxu1  ;;  %v4910_v26 = vpop.f32.mrf.mxu0 }
 0x83c   :  { %v4717_v57 = vadd.f32 %v4715_v56, %v9496_v14  ;;  %v8994_v13 = vadd.f32 %v4923_v2, %v4910_v26 }
 0x83d   :  { %v4683_v32 = vpop.f32.mrf.mxu2 }
 0x83e   :  { %v4719_v40 = vmax.f32 %v4717_v57, 0.0 }
 0x83f   :  { %5060 = vmatpush.bf16.msra.mxu3 %v9552_v18 }
 0x840   :  { %v4721_v3 = vpack.c.bf16 %v4719_v40, %v4719_v40  ;;  %v6844_v40 = vld [vmem:[#allocation4 + $0x580] sm:$0xff] }
 0x842   :  { %4860 = vmatmul.bf16.vlgmr.msra.gmra.mxu2 %v4721_v3  ;;  %6488 = vmatmul.msk.bf16.vlgmr.msrb.gmra.mxu3 %vm573_vm1, %v8892_v59 }
 0x843   :  { %5005 = vmatpush.bf16.msra.mxu2 %v9497_v48  ;;  %5061 = vmatpush.bf16.msra.mxu3 %v9553_v35  ;;  %v4925_v58 = vpop.f32.mrf.mxu1  ;;  %v4912_v18 = vpop.f32.mrf.mxu0 }
 0x847   :  { %5006 = vmatpush.bf16.msra.mxu2 %v9498_v20  ;;  %5062 = vmatpush.bf16.msra.mxu3 %v9554_v51 }
 0x84b   :  { %5007 = vmatpush.bf16.msra.mxu2 %v9499_v43  ;;  %5063 = vmatpush.bf16.msra.mxu3 %v9555_v25  ;;  %v9002_v48 = vpop.f32.mrf.mxu1  ;;  %v4975_v20 = vpop.f32.mrf.mxu0 }
 0x84f   :  { %5008 = vmatpush.bf16.msra.mxu2 %v9500_v30  ;;  %5064 = vmatpush.bf16.msra.mxu3 %v9556_v15 }
 0x852   :  { %4935 = vmatmul.bf16.vlgmr.msrb.gmra.mxu2 %v8897_v37  ;;  %5065 = vmatmul.bf16.vlgmr.msra.gmra.mxu3 %v8897_v37 }
 0x853   :  { %5009 = vmatpush.bf16.msra.mxu2 %v9602_v4  ;;  %v4951_v35 = vpop.f32.mrf.mxu1  ;;  %v4977_v43 = vpop.f32.mrf.mxu0  ;;  %5263 = vmatpush.bf16.msrb.mxu3 %v6859_v47 }
 0x857   :  { %5010 = vmatpush.bf16.msra.mxu2 %v9651_v12  ;;  %5264 = vmatpush.bf16.msrb.mxu3 %v6858_v42 }
 0x85b   :  { %5011 = vmatpush.bf16.msra.mxu2 %v9698_v0  ;;  %v4988_v30 = vpop.f32.mrf.mxu1  ;;  %v5001_v51 = vpop.f32.mrf.mxu0  ;;  %5265 = vmatpush.bf16.msrb.mxu3 %v6857_v23  ;;  %v6884_v23 = vld [vmem:[%s9058_s6] ss:$0 sm:$0xff] }
 0x85c   :  { %v5002_v25 = vadd.f32 %v5001_v51, %v4988_v30 }
 0x85f   :  { %5012 = vmatpush.bf16.msra.mxu2 %v9699_v38 }
 0x862   :  { %5013 = vmatmul.bf16.vlgmr.msra.gmra.mxu2 %v8897_v37 }
 0x863   :  { %5075 = vmatpush.bf16.msrb.mxu2 %v9700_v7  ;;  %v4990_v15 = vpop.f32.mrf.mxu1  ;;  %v5003_v4 = vpop.f32.mrf.mxu0 }
 0x864   :  { %v6866_v15 = vld [vmem:[%s9057_s5 + $0x30] sm:$0xff]  ;;  %v6865_v4 = vld [vmem:[%s9057_s5 + $0x28] sm:$0xff] }
 0x867   :  { %5076 = vmatpush.bf16.msrb.mxu2 %v9746_v16 }
 0x86b   :  { %5077 = vmatpush.bf16.msrb.mxu2 %v9747_v5  ;;  %v5053_v12 = vpop.f32.mrf.mxu1 }
 0x86c   :  { %v5040_v0 = vpop.f32.mrf.mxu0 }
 0x86d   :  { %v5054_v38 = vadd.f32 %v5053_v12, %v5040_v0  ;;  %v6863_v12 = vld [vmem:[%s9057_s5 + $0x18] sm:$0xff]  ;;  %v6862_v0 = vld [vmem:[%s9057_s5 + $0x10] sm:$0xff] }
 0x86f   :  { %5250 = vmatpush.bf16.msra.mxu2 %v6851_v36 }
 0x872   :  { %6490 = vmatmul.msk.bf16.vlgmr.msrb.gmra.mxu2 %vm573_vm1, %v8892_v59  ;;  %v6856_v59 = vld [vmem:[#allocation4 + $0x5e0] sm:$0xff] }
 0x873   :  { %v5055_v44 = vpop.f32.mrf.mxu1  ;;  %5266 = vmatpush.bf16.msrb.mxu3 %v6856_v59  ;;  %5251 = vmatpush.bf16.msra.mxu2 %v6850_v11 }
 0x874   :  { %v5042_v53 = vpop.f32.mrf.mxu0  ;;  %v6861_v44 = vld [vmem:[%s9057_s5 + $0x8] sm:$0xff] }
 0x875   :  { %v6860_v53 = vld [vmem:[%s9057_s5] sm:$0xff] }
 0x877   :  { %5267 = vmatpush.bf16.msrb.mxu3 %v6855_v63  ;;  %5252 = vmatpush.bf16.msra.mxu2 %v6849_v29 }
 0x87b   :  { %5268 = vmatpush.bf16.msrb.mxu3 %v6854_v28  ;;  %5253 = vmatpush.bf16.msra.mxu2 %v6848_v24 }
 0x87c   :  { %v5105_v1 = vpop.f32.mrf.mxu0 }
 0x87f   :  { %5269 = vmatpush.bf16.msrb.mxu3 %v6853_v61  ;;  %5254 = vmatpush.bf16.msra.mxu2 %v6847_v34 }
 0x883   :  { %5270 = vmatpush.bf16.msrb.mxu3 %v6852_v54  ;;  %5255 = vmatpush.bf16.msra.mxu2 %v6846_v46 }
 0x884   :  { %v5107_v16 = vpop.f32.mrf.mxu0 }
 0x887   :  { %v5092_v7 = vpop.f32.mrf.mxu1  ;;  %5256 = vmatpush.bf16.msra.mxu2 %v6845_v9 }
 0x888   :  { %v5106_v37 = vadd.f32 %v5105_v1, %v5092_v7 }
 0x88a   :  { %v5112_v60 = vmax.f32 %v5054_v38, %v5106_v37 }
 0x88b   :  { %5257 = vmatpush.bf16.msra.mxu2 %v6844_v40 }
 0x88f   :  { %v5094_v6 = vpop.f32.mrf.mxu1 }
 0x8a5   :  { %v4874_v5 = vpop.f32.mrf.mxu3 }
 0x8ad   :  { %v4876_v19 = vpop.f32.mrf.mxu3 }
 0x8b5   :  { %v4962_v10 = vpop.f32.mrf.mxu3 }
 0x8b6   :  { %v4976_v41 = vadd.f32 %v4975_v20, %v4962_v10 }
 0x8b8   :  { %v5109_v22 = vmax.f32 %v8994_v13, %v4976_v41 }
 0x8bd   :  { %v4964_v49 = vpop.f32.mrf.mxu3 }
 0x8c5   :  { %v4861_v27 = vpop.f32.mrf.mxu2  ;;  %v5027_v21 = vpop.f32.mrf.mxu3 }
 0x8c6   :  { %v4875_v55 = vadd.f32 %v4874_v5, %v4861_v27 }
 0x8c8   :  { %v4878_v17 = vadd.f32 %v4875_v55, %v8960_v45 }
 0x8cd   :  { %v4863_v33 = vpop.f32.mrf.mxu2  ;;  %v5029_v52 = vpop.f32.mrf.mxu3 }
 0x8d5   :  { %v4936_v62 = vpop.f32.mrf.mxu2  ;;  %v5066_v50 = vpop.f32.mrf.mxu3 }
 0x8d6   :  { %v4950_v31 = vadd.f32 %v9002_v48, %v4936_v62 }
 0x8d8   :  { %v5110_v39 = vmax.f32 %v4950_v31, %v5002_v25 }
 0x8da   :  { %v5114_v56 = vmax.f32 %v5110_v39, %v5112_v60  ;;  %v6883_v60 = vld [vmem:[%s9056_s4] ss:$0 sm:$0xff] }
 0x8dc   :  { %v5116_v57 = vadd.f32 %v5114_v56, %v9589_v8  ;;  %v6867_v8 = vld [vmem:[%s9057_s5 + $0x38] sm:$0xff] }
 0x8dd   :  { %v4938_v45 = vpop.f32.mrf.mxu2  ;;  %v5068_v32 = vpop.f32.mrf.mxu3  ;;  %5352 = vmatpush.bf16.msrb.mxu0 %v6867_v8 }
 0x8de   :  { %v5118_v3 = vmax.f32 %v5116_v57, 0.0 }
 0x8e0   :  { %v5120_v2 = vpack.c.bf16 %v5118_v3, %v5118_v3 }
 0x8e1   :  { %5353 = vmatpush.bf16.msrb.mxu0 %v6866_v15 }
 0x8e2   :  { %5271 = vmatmul.bf16.vlgmr.msrb.gmra.mxu3 %v5120_v2 }
 0x8e5   :  { %v5014_v26 = vpop.f32.mrf.mxu2  ;;  %5354 = vmatpush.bf16.msrb.mxu0 %v6865_v4 }
 0x8e6   :  { %v5028_v18 = vadd.f32 %v5027_v21, %v5014_v26 }
 0x8ed   :  { %v5016_v13 = vpop.f32.mrf.mxu2 }
 0x8f5   :  { %v5079_v58 = vpop.f32.mrf.mxu2 }
 0x8f6   :  { %v5080_v20 = vadd.f32 %v5079_v58, %v5066_v50 }
 0x8f8   :  { %v5111_v48 = vmax.f32 %v5028_v18, %v5080_v20 }
 0x8fa   :  { %v5113_v35 = vmax.f32 %v5109_v22, %v5111_v48 }
 0x8fc   :  { %v5115_v43 = vadd.f32 %v5113_v35, %v9496_v14  ;;  %v6864_v14 = vld [vmem:[%s9057_s5 + $0x20] sm:$0xff] }
 0x8fd   :  { %v5081_v30 = vpop.f32.mrf.mxu2  ;;  %5355 = vmatpush.bf16.msrb.mxu0 %v6864_v14 }
 0x8fe   :  { %v5117_v51 = vmax.f32 %v5115_v43, 0.0 }
 0x900   :  { %v5119_v25 = vpack.c.bf16 %v5117_v51, %v5117_v51 }
 0x901   :  { %5356 = vmatpush.bf16.msrb.mxu0 %v6863_v12 }
 0x902   :  { %5258 = vmatmul.bf16.vlgmr.msra.gmra.mxu2 %v5119_v25 }
 0x905   :  { %5357 = vmatpush.bf16.msrb.mxu0 %v6862_v0 }
 0x909   :  { %5358 = vmatpush.bf16.msrb.mxu0 %v6861_v44 }
 0x90d   :  { %5359 = vmatpush.bf16.msrb.mxu0 %v6860_v53 }
 0x965   :  { %v5272_v38 = vpop.f32.mrf.mxu3 }
 0x96d   :  { %v5274_v7 = vpop.f32.mrf.mxu3 }
 0x985   :  { %v5259_v1 = vpop.f32.mrf.mxu2 }
 0x986   :  { %v5273_v37 = vadd.f32 %v5272_v38, %v5259_v1 }
 0x988   :  { %v5276_v6 = vadd.f32 %v5273_v37, %v4878_v17 }
 0x98a   :  { %v5281_v16 = vadd.f32 %v6883_v60, %v5276_v6 }
 0x98c   :  { %v5282_v47 = vmax.f32 %v5281_v16, 0.0 }
 0x98d   :  { %v5261_v5 = vpop.f32.mrf.mxu2 }
 0x98e   :  { %v5283_v42 = vpack.c.bf16 %v5282_v47, %v5282_v47 }
 0x990   :  { %5360 = vmatmul.bf16.vlgmr.msrb.gmra.mxu0 %v5283_v42 }
 0xa0d   :  { %v5361_v19 = vpop.f32.mrf.mxu0 }
 0xa0e   :  { %v5362_v59 = vadd.f32 %v6884_v23, %v5361_v19 }
 0xa10   :  { %5365 = vst [vmem:[%s9059_s7] sm:$0xff] %v5362_v59 }
 0xa15   :  { %v5363_v63 = vpop.f32.mrf.mxu0 }
 0xa16   :  { %5370 = vsyncpa [#allocation3], 1 }
 0xa17   :  { %5371 = vsyncpa [#allocation5], 1 }

</bundles_post_ra>
